<compile_context>
chip_gen: v5e
topology: v5e:2x2
jax: 0.10.0
libtpu: 0.0.40
codegen_flags: <defaults>
</compile_context>

<pallas_src>
import functools

import jax
import jax.numpy as jnp
from jax.experimental import pallas as pl
from jax.experimental.pallas import tpu as pltpu


# Tiling heuristics.
_TARGET_ROWS = 1024          # output pixels per grid step (amortize ~0.35us/step)
_ACC_TARGET_ELEMS = 32 * 1024  # f32 elems live per inner dot (~32 vregs)
_PATCH_BYTES_CAP = 2 << 20     # bf16 bytes per patch sub-buffer (x2 double buffer)


def _round_up(x, m):
    return (x + m - 1) // m * m


_VMEM_CAP = [0]


def _vmem_capacity_bytes():
    """Per-core VMEM capacity (generation aware), with a conservative fallback."""
    if _VMEM_CAP[0] == 0:
        cap = 64 << 20                      # v7x per-TensorCore VMEM (worst case)
        try:
            cap = int(getattr(pltpu.get_tpu_info(), "vmem_capacity_bytes", cap)) or cap
        except Exception:
            pass
        _VMEM_CAP[0] = cap
    return _VMEM_CAP[0]


# ----------------------------- Pallas kernel ------------------------------

def _conv_relu_fused_kernel(x_ref, w_ref, b_ref, o_ref, patch_ref, *,
                            kh, kw, stride, cin, oh_sub, n_sub, ow_pad):
    """Fused im2col + single big-K matmul + bias + ReLU for one (batch, row-tile).

    x_ref:     (1, Hp, Wp, Cin)               bf16 (full padded image; DMA'd once/batch)
    w_ref:     (KH*KW*Cin, Cout)              bf16
    b_ref:     (1, Cout)                      f32
    o_ref:     (1, tile_oh*OWp, Cout)         out dtype (flattened rows -> no reshape)
    patch_ref: (2, oh_sub, OWp, KH*KW*Cin)    bf16 VMEM scratch (double-buffered)
    """
    r = pl.program_id(1)
    k_tot = kh * kw * cin
    msub = oh_sub * ow_pad
    tile_oh = oh_sub * n_sub
    row_in0 = pl.multiple_of(r * (tile_oh * stride), tile_oh * stride)

    for j in range(n_sub):                       # static unroll (n_sub is small)
        slot = j & 1                             # static double-buffer slot
        h0 = row_in0 + j * (oh_sub * stride)

        # --- stage the im2col sub-tile: KH*KW shifted slab copies into VMEM ---
        for ikh in range(kh):
            for ikw in range(kw):
                if stride == 1:
                    h_sl = pl.ds(h0 + ikh, oh_sub)
                    w_sl = slice(ikw, ikw + ow_pad)          # static, dense
                else:
                    h_sl = pl.ds(h0 + ikh, oh_sub, stride)
                    w_sl = pl.ds(ikw, ow_pad, stride)
                tap = ikh * kw + ikw
                patch_ref[slot, :, :, tap * cin:(tap + 1) * cin] = \
                    x_ref[0, h_sl, w_sl, :]

        # --- one big-K MXU matmul (K = KH*KW*Cin), f32 accumulation ---
        # OWp % 8 == 0 -> this merge of (oh_sub, OWp) is tile-aligned (no relayout).
        patches = patch_ref[slot].reshape(msub, k_tot)
        acc = jnp.dot(patches, w_ref[...], preferred_element_type=jnp.float32)
        out = jnp.maximum(acc + b_ref[...], 0.0)             # bias + ReLU in f32
        o_ref[0, j * msub:(j + 1) * msub, :] = out.astype(o_ref.dtype)


# ------------------------------ host wrapper --------------------------------

@functools.partial(jax.jit,
                   static_argnames=("kernel_size", "stride", "padding", "out_dtype"))
def _conv_relu_forward(x, weight, bias, *, kernel_size, stride, padding,
                       out_dtype=jnp.float32):
    """x: (N, Cin, H, W) f32, weight: (Cout, Cin, KH, KW) f32, bias: (Cout,)."""
    n, cin, h, w = x.shape
    cout = weight.shape[0]
    kh = kw = kernel_size
    s, p = stride, padding

    oh = (h + 2 * p - kh) // s + 1
    ow = (w + 2 * p - kw) // s + 1
    k_tot = kh * kw * cin

    # --- tiling: ow padded to sublane multiple; M sub-tile ~32 vregs of f32 acc.
    ow_pad = _round_up(ow, 8)
    oh_sub = min(oh, max(1, _ACC_TARGET_ELEMS // (ow_pad * max(cout, 1))))
    oh_sub = max(1, min(oh_sub, max(1, _PATCH_BYTES_CAP // (ow_pad * k_tot * 2))))
    msub = oh_sub * ow_pad
    n_sub = max(1, _TARGET_ROWS // msub)
    n_sub = min(n_sub, -(-oh // oh_sub))
    tile_oh = oh_sub * n_sub
    oh_pad = _round_up(oh, tile_oh)
    r_steps = oh_pad // tile_oh
    # Give both v7x TensorCores work when batch == 1.
    while n * r_steps < 2 and n_sub > 1:
        n_sub //= 2
        tile_oh = oh_sub * n_sub
        oh_pad = _round_up(oh, tile_oh)
        r_steps = oh_pad // tile_oh

    # --- layouts: NCHW -> NHWC bf16, spatial zero-pad covering OHp/OWp exactly.
    x_nhwc = jnp.transpose(x, (0, 2, 3, 1)).astype(jnp.bfloat16)
    extra_h = max(0, (oh_pad - 1) * s + kh - (h + 2 * p))
    extra_w = max(0, (ow_pad - 1) * s + kw - (w + 2 * p))
    x_pad = jnp.pad(x_nhwc, ((0, 0), (p, p + extra_h), (p, p + extra_w), (0, 0)))
    hp, wp = x_pad.shape[1], x_pad.shape[2]

    # PyTorch weight (Cout, Cin, KH, KW) -> (KH*KW*Cin, Cout) bf16 (matches the
    # patch K ordering: index = (ikh*kw + ikw)*cin + c).  Cout stays UNPADDED.
    w_mat = jnp.transpose(weight, (2, 3, 1, 0)).reshape(k_tot, cout)
    w_mat = w_mat.astype(jnp.bfloat16)
    b_mat = bias.reshape(1, cout).astype(jnp.float32)

    # --- VMEM budget (generation aware), incl. double-buffered weight block.
    out_isz = jnp.dtype(out_dtype).itemsize
    img_b = hp * wp * cin * 2
    wgt_b = k_tot * cout * 2
    out_b = tile_oh * ow_pad * cout * out_isz
    patch_b = 2 * oh_sub * ow_pad * k_tot * 2
    need = 2 * img_b + 2 * wgt_b + 2 * out_b + patch_b + 2 * cout * 4
    vmem_cap = (_vmem_capacity_bytes() * 85) // 100
    vmem_limit = int(min(max(need + (4 << 20), 32 << 20), vmem_cap))

    kernel = functools.partial(_conv_relu_fused_kernel, kh=kh, kw=kw, stride=s,
                               cin=cin, oh_sub=oh_sub, n_sub=n_sub, ow_pad=ow_pad)

    out = pl.pallas_call(
        kernel,
        # Output rows are flattened (OHp*OWp) so the kernel store needs no reshape;
        # last dim is the unpadded Cout (no 128-lane-padded writeback).
        out_shape=jax.ShapeDtypeStruct((n, oh_pad * ow_pad, cout), out_dtype),
        grid_spec=pltpu.PrefetchScalarGridSpec(
            num_scalar_prefetch=0,
            grid=(n, r_steps),
            in_specs=[
                # Full padded image per batch element; index invariant over r
                # -> DMA'd from HBM exactly once per image.
                pl.BlockSpec((1, hp, wp, cin), lambda b, r: (b, 0, 0, 0)),
                pl.BlockSpec((k_tot, cout), lambda b, r: (0, 0)),
                pl.BlockSpec((1, cout), lambda b, r: (0, 0)),
            ],
            out_specs=pl.BlockSpec((1, tile_oh * ow_pad, cout),
                                   lambda b, r: (b, r, 0)),
            scratch_shapes=[pltpu.VMEM((2, oh_sub, ow_pad, k_tot), jnp.bfloat16)],
        ),
        compiler_params=pltpu.CompilerParams(
            dimension_semantics=("parallel", "parallel"),
            vmem_limit_bytes=vmem_limit),
    )(x_pad, w_mat, b_mat)

    out = out.reshape(n, oh_pad, ow_pad, cout)[:, :oh, :ow, :]   # free reshape + crop
    return jnp.transpose(out, (0, 3, 1, 2))                      # back to NCHW


class ConvReluPallas:
    """Pallas equivalent of the PyTorch ConvRelu module (Conv2d + ReLU)."""

    def __init__(self, in_channels, out_channels, kernel_size, stride=1,
                 padding=0, dilation=1, groups=1, name="conv1_1", key=None):
        assert "conv" in name
        # NOTE: like the reference module, `dilation` / `groups` are accepted
        # but not forwarded to the conv (nn.Conv2d gets only stride/padding).
        self.name = name
        self.in_channels = in_channels
        self.out_channels = out_channels
        self.kernel_size = kernel_size
        self.stride = stride
        self.padding = padding

        if key is None:
            key = jax.random.PRNGKey(0)
        k_w, k_b = jax.random.split(key)
        fan_in = in_channels * kernel_size * kernel_size
        bound = 1.0 / (fan_in ** 0.5)
        # PyTorch Conv2d weight layout: (Cout, Cin, KH, KW); master copy in f32.
        self.weight = jax.random.uniform(
            k_w, (out_channels, in_channels, kernel_size, kernel_size),
            minval=-bound, maxval=bound, dtype=jnp.float32)
        self.bias = jax.random.uniform(
            k_b, (out_channels,), minval=-bound, maxval=bound, dtype=jnp.float32)

    def __call__(self, x, out_dtype=jnp.float32):
        """x: (N, Cin, H, W) float32 -> (N, Cout, OH, OW) out_dtype (f32 default)."""
        return _conv_relu_forward(
            x, self.weight, self.bias,
            kernel_size=self.kernel_size, stride=self.stride,
            padding=self.padding, out_dtype=out_dtype)


# ------------------------------ demo / check -------------------------------

if __name__ == "__main__":
    key = jax.random.PRNGKey(0)
    k_x, k_p = jax.random.split(key)

    N, Cin, H, W = 2, 4, 16, 16
    Cout, K, stride, pad = 8, 3, 1, 1

    x = jax.random.normal(k_x, (N, Cin, H, W), dtype=jnp.float32)

    mod = ConvReluPallas(Cin, Cout, K, stride=stride, padding=pad,
                         name="conv1_1", key=k_p)
    y = jax.block_until_ready(mod(x))

    # Reference: XLA conv + relu (same semantics as PyTorch Conv2d + ReLU).
    ref = jax.lax.conv_general_dilated(
        x, mod.weight, window_strides=(stride, stride),
        padding=((pad, pad), (pad, pad)),
        dimension_numbers=("NCHW", "OIHW", "NCHW"))
    ref = jnp.maximum(ref + mod.bias[None, :, None, None], 0.0)

    assert y.shape == (N, Cout, H, W)
    # bf16 operands (f32 accumulation) -> looser tolerance than pure f32.
    assert jnp.allclose(y, ref, atol=2e-2, rtol=2e-2), \
        float(jnp.max(jnp.abs(y - ref)))
    print("KERNEL_OK")
</pallas_src>

<mosaic_0001>
module attributes {stable_mosaic.version = 11 : i64} {
  func.func @_conv_relu_fused_kernel(%arg0: i32, %arg1: i32, %arg2: memref<1x18x18x4xbf16, #tpu.memory_space<vmem>>, %arg3: memref<36x8xbf16, #tpu.memory_space<vmem>>, %arg4: memref<1x8xf32, #tpu.memory_space<vmem>>, %arg5: memref<1x256x8xf32, #tpu.memory_space<vmem>>, %arg6: memref<2x16x16x36xbf16, #tpu.memory_space<vmem>>) attributes {dimension_semantics = [#tpu.dimension_semantics<parallel>, #tpu.dimension_semantics<parallel>], iteration_bounds = array<i64: 2, 1>, scalar_prefetch = 0 : i64, scratch_operands = 1 : i64, tpu.core_type = #tpu.core_type<tc>, window_params = [{transform_indices = @transform_0, window_bounds = array<i64: 1, 18, 18, 4>}, {pipeline_mode = #tpu.pipeline_mode<synchronous>, transform_indices = @transform_1, window_bounds = array<i64: 36, 8>}, {pipeline_mode = #tpu.pipeline_mode<synchronous>, transform_indices = @transform_2, window_bounds = array<i64: 1, 8>}, {transform_indices = @transform_3, window_bounds = array<i64: 1, 256, 8>}]} {
    %c16_i32 = arith.constant 16 : i32
    %0 = arith.muli %arg1, %c16_i32 : i32
    %1 = tpu.assume_multiple %0, 16 : i32
    %c0_i32 = arith.constant 0 : i32
    %2 = arith.addi %1, %c0_i32 : i32
    %c0_i32_0 = arith.constant 0 : i32
    %3 = arith.addi %2, %c0_i32_0 : i32
    %c0 = arith.constant 0 : index
    %4 = arith.index_cast %3 : i32 to index
    %c0_1 = arith.constant 0 : index
    %c0_2 = arith.constant 0 : index
    %5 = vector.load %arg2[%c0, %4, %c0_1, %c0_2] : memref<1x18x18x4xbf16, #tpu.memory_space<vmem>>, vector<1x16x16x4xbf16>
    %6 = vector.shape_cast %5 : vector<1x16x16x4xbf16> to vector<16x16x4xbf16>
    %c0_3 = arith.constant 0 : index
    %c0_4 = arith.constant 0 : index
    %c0_5 = arith.constant 0 : index
    %c0_6 = arith.constant 0 : index
    %7 = vector.load %arg6[%c0_3, %c0_4, %c0_5, %c0_6] : memref<2x16x16x36xbf16, #tpu.memory_space<vmem>>, vector<1x16x16x4xbf16>
    %8 = vector.shape_cast %7 : vector<1x16x16x4xbf16> to vector<16x16x4xbf16>
    %9 = vector.shape_cast %6 : vector<16x16x4xbf16> to vector<1x16x16x4xbf16>
    tpu.vector_store %arg6[%c0_3, %c0_4, %c0_5, %c0_6], %9 {strides = array<i32>} : memref<2x16x16x36xbf16, #tpu.memory_space<vmem>>, vector<1x16x16x4xbf16>,
    %c0_i32_7 = arith.constant 0 : i32
    %10 = arith.addi %2, %c0_i32_7 : i32
    %c0_8 = arith.constant 0 : index
    %11 = arith.index_cast %10 : i32 to index
    %c1 = arith.constant 1 : index
    %c0_9 = arith.constant 0 : index
    %12 = vector.load %arg2[%c0_8, %11, %c1, %c0_9] : memref<1x18x18x4xbf16, #tpu.memory_space<vmem>>, vector<1x16x16x4xbf16>
    %13 = vector.shape_cast %12 : vector<1x16x16x4xbf16> to vector<16x16x4xbf16>
    %c0_10 = arith.constant 0 : index
    %c0_11 = arith.constant 0 : index
    %c0_12 = arith.constant 0 : index
    %c4 = arith.constant 4 : index
    %14 = vector.load %arg6[%c0_10, %c0_11, %c0_12, %c4] : memref<2x16x16x36xbf16, #tpu.memory_space<vmem>>, vector<1x16x16x4xbf16>
    %15 = vector.shape_cast %14 : vector<1x16x16x4xbf16> to vector<16x16x4xbf16>
    %16 = vector.shape_cast %13 : vector<16x16x4xbf16> to vector<1x16x16x4xbf16>
    tpu.vector_store %arg6[%c0_10, %c0_11, %c0_12, %c4], %16 {strides = array<i32>} : memref<2x16x16x36xbf16, #tpu.memory_space<vmem>>, vector<1x16x16x4xbf16>,
    %c0_i32_13 = arith.constant 0 : i32
    %17 = arith.addi %2, %c0_i32_13 : i32
    %c0_14 = arith.constant 0 : index
    %18 = arith.index_cast %17 : i32 to index
    %c2 = arith.constant 2 : index
    %c0_15 = arith.constant 0 : index
    %19 = vector.load %arg2[%c0_14, %18, %c2, %c0_15] : memref<1x18x18x4xbf16, #tpu.memory_space<vmem>>, vector<1x16x16x4xbf16>
    %20 = vector.shape_cast %19 : vector<1x16x16x4xbf16> to vector<16x16x4xbf16>
    %c0_16 = arith.constant 0 : index
    %c0_17 = arith.constant 0 : index
    %c0_18 = arith.constant 0 : index
    %c8 = arith.constant 8 : index
    %21 = vector.load %arg6[%c0_16, %c0_17, %c0_18, %c8] : memref<2x16x16x36xbf16, #tpu.memory_space<vmem>>, vector<1x16x16x4xbf16>
    %22 = vector.shape_cast %21 : vector<1x16x16x4xbf16> to vector<16x16x4xbf16>
    %23 = vector.shape_cast %20 : vector<16x16x4xbf16> to vector<1x16x16x4xbf16>
    tpu.vector_store %arg6[%c0_16, %c0_17, %c0_18, %c8], %23 {strides = array<i32>} : memref<2x16x16x36xbf16, #tpu.memory_space<vmem>>, vector<1x16x16x4xbf16>,
    %c1_i32 = arith.constant 1 : i32
    %24 = arith.addi %2, %c1_i32 : i32
    %c0_19 = arith.constant 0 : index
    %25 = arith.index_cast %24 : i32 to index
    %c0_20 = arith.constant 0 : index
    %c0_21 = arith.constant 0 : index
    %26 = vector.load %arg2[%c0_19, %25, %c0_20, %c0_21] : memref<1x18x18x4xbf16, #tpu.memory_space<vmem>>, vector<1x16x16x4xbf16>
    %27 = vector.shape_cast %26 : vector<1x16x16x4xbf16> to vector<16x16x4xbf16>
    %c0_22 = arith.constant 0 : index
    %c0_23 = arith.constant 0 : index
    %c0_24 = arith.constant 0 : index
    %c12 = arith.constant 12 : index
    %28 = vector.load %arg6[%c0_22, %c0_23, %c0_24, %c12] : memref<2x16x16x36xbf16, #tpu.memory_space<vmem>>, vector<1x16x16x4xbf16>
    %29 = vector.shape_cast %28 : vector<1x16x16x4xbf16> to vector<16x16x4xbf16>
    %30 = vector.shape_cast %27 : vector<16x16x4xbf16> to vector<1x16x16x4xbf16>
    tpu.vector_store %arg6[%c0_22, %c0_23, %c0_24, %c12], %30 {strides = array<i32>} : memref<2x16x16x36xbf16, #tpu.memory_space<vmem>>, vector<1x16x16x4xbf16>,
    %c1_i32_25 = arith.constant 1 : i32
    %31 = arith.addi %2, %c1_i32_25 : i32
    %c0_26 = arith.constant 0 : index
    %32 = arith.index_cast %31 : i32 to index
    %c1_27 = arith.constant 1 : index
    %c0_28 = arith.constant 0 : index
    %33 = vector.load %arg2[%c0_26, %32, %c1_27, %c0_28] : memref<1x18x18x4xbf16, #tpu.memory_space<vmem>>, vector<1x16x16x4xbf16>
    %34 = vector.shape_cast %33 : vector<1x16x16x4xbf16> to vector<16x16x4xbf16>
    %c0_29 = arith.constant 0 : index
    %c0_30 = arith.constant 0 : index
    %c0_31 = arith.constant 0 : index
    %c16 = arith.constant 16 : index
    %35 = vector.load %arg6[%c0_29, %c0_30, %c0_31, %c16] : memref<2x16x16x36xbf16, #tpu.memory_space<vmem>>, vector<1x16x16x4xbf16>
    %36 = vector.shape_cast %35 : vector<1x16x16x4xbf16> to vector<16x16x4xbf16>
    %37 = vector.shape_cast %34 : vector<16x16x4xbf16> to vector<1x16x16x4xbf16>
    tpu.vector_store %arg6[%c0_29, %c0_30, %c0_31, %c16], %37 {strides = array<i32>} : memref<2x16x16x36xbf16, #tpu.memory_space<vmem>>, vector<1x16x16x4xbf16>,
    %c1_i32_32 = arith.constant 1 : i32
    %38 = arith.addi %2, %c1_i32_32 : i32
    %c0_33 = arith.constant 0 : index
    %39 = arith.index_cast %38 : i32 to index
    %c2_34 = arith.constant 2 : index
    %c0_35 = arith.constant 0 : index
    %40 = vector.load %arg2[%c0_33, %39, %c2_34, %c0_35] : memref<1x18x18x4xbf16, #tpu.memory_space<vmem>>, vector<1x16x16x4xbf16>
    %41 = vector.shape_cast %40 : vector<1x16x16x4xbf16> to vector<16x16x4xbf16>
    %c0_36 = arith.constant 0 : index
    %c0_37 = arith.constant 0 : index
    %c0_38 = arith.constant 0 : index
    %c20 = arith.constant 20 : index
    %42 = vector.load %arg6[%c0_36, %c0_37, %c0_38, %c20] : memref<2x16x16x36xbf16, #tpu.memory_space<vmem>>, vector<1x16x16x4xbf16>
    %43 = vector.shape_cast %42 : vector<1x16x16x4xbf16> to vector<16x16x4xbf16>
    %44 = vector.shape_cast %41 : vector<16x16x4xbf16> to vector<1x16x16x4xbf16>
    tpu.vector_store %arg6[%c0_36, %c0_37, %c0_38, %c20], %44 {strides = array<i32>} : memref<2x16x16x36xbf16, #tpu.memory_space<vmem>>, vector<1x16x16x4xbf16>,
    %c2_i32 = arith.constant 2 : i32
    %45 = arith.addi %2, %c2_i32 : i32
    %c0_39 = arith.constant 0 : index
    %46 = arith.index_cast %45 : i32 to index
    %c0_40 = arith.constant 0 : index
    %c0_41 = arith.constant 0 : index
    %47 = vector.load %arg2[%c0_39, %46, %c0_40, %c0_41] : memref<1x18x18x4xbf16, #tpu.memory_space<vmem>>, vector<1x16x16x4xbf16>
    %48 = vector.shape_cast %47 : vector<1x16x16x4xbf16> to vector<16x16x4xbf16>
    %c0_42 = arith.constant 0 : index
    %c0_43 = arith.constant 0 : index
    %c0_44 = arith.constant 0 : index
    %c24 = arith.constant 24 : index
    %49 = vector.load %arg6[%c0_42, %c0_43, %c0_44, %c24] : memref<2x16x16x36xbf16, #tpu.memory_space<vmem>>, vector<1x16x16x4xbf16>
    %50 = vector.shape_cast %49 : vector<1x16x16x4xbf16> to vector<16x16x4xbf16>
    %51 = vector.shape_cast %48 : vector<16x16x4xbf16> to vector<1x16x16x4xbf16>
    tpu.vector_store %arg6[%c0_42, %c0_43, %c0_44, %c24], %51 {strides = array<i32>} : memref<2x16x16x36xbf16, #tpu.memory_space<vmem>>, vector<1x16x16x4xbf16>,
    %c2_i32_45 = arith.constant 2 : i32
    %52 = arith.addi %2, %c2_i32_45 : i32
    %c0_46 = arith.constant 0 : index
    %53 = arith.index_cast %52 : i32 to index
    %c1_47 = arith.constant 1 : index
    %c0_48 = arith.constant 0 : index
    %54 = vector.load %arg2[%c0_46, %53, %c1_47, %c0_48] : memref<1x18x18x4xbf16, #tpu.memory_space<vmem>>, vector<1x16x16x4xbf16>
    %55 = vector.shape_cast %54 : vector<1x16x16x4xbf16> to vector<16x16x4xbf16>
    %c0_49 = arith.constant 0 : index
    %c0_50 = arith.constant 0 : index
    %c0_51 = arith.constant 0 : index
    %c28 = arith.constant 28 : index
    %56 = vector.load %arg6[%c0_49, %c0_50, %c0_51, %c28] : memref<2x16x16x36xbf16, #tpu.memory_space<vmem>>, vector<1x16x16x4xbf16>
    %57 = vector.shape_cast %56 : vector<1x16x16x4xbf16> to vector<16x16x4xbf16>
    %58 = vector.shape_cast %55 : vector<16x16x4xbf16> to vector<1x16x16x4xbf16>
    tpu.vector_store %arg6[%c0_49, %c0_50, %c0_51, %c28], %58 {strides = array<i32>} : memref<2x16x16x36xbf16, #tpu.memory_space<vmem>>, vector<1x16x16x4xbf16>,
    %c2_i32_52 = arith.constant 2 : i32
    %59 = arith.addi %2, %c2_i32_52 : i32
    %c0_53 = arith.constant 0 : index
    %60 = arith.index_cast %59 : i32 to index
    %c2_54 = arith.constant 2 : index
    %c0_55 = arith.constant 0 : index
    %61 = vector.load %arg2[%c0_53, %60, %c2_54, %c0_55] : memref<1x18x18x4xbf16, #tpu.memory_space<vmem>>, vector<1x16x16x4xbf16>
    %62 = vector.shape_cast %61 : vector<1x16x16x4xbf16> to vector<16x16x4xbf16>
    %c0_56 = arith.constant 0 : index
    %c0_57 = arith.constant 0 : index
    %c0_58 = arith.constant 0 : index
    %c32 = arith.constant 32 : index
    %63 = vector.load %arg6[%c0_56, %c0_57, %c0_58, %c32] : memref<2x16x16x36xbf16, #tpu.memory_space<vmem>>, vector<1x16x16x4xbf16>
    %64 = vector.shape_cast %63 : vector<1x16x16x4xbf16> to vector<16x16x4xbf16>
    %65 = vector.shape_cast %62 : vector<16x16x4xbf16> to vector<1x16x16x4xbf16>
    tpu.vector_store %arg6[%c0_56, %c0_57, %c0_58, %c32], %65 {strides = array<i32>} : memref<2x16x16x36xbf16, #tpu.memory_space<vmem>>, vector<1x16x16x4xbf16>,
    %c0_59 = arith.constant 0 : index
    %c0_60 = arith.constant 0 : index
    %c0_61 = arith.constant 0 : index
    %c0_62 = arith.constant 0 : index
    %66 = vector.load %arg6[%c0_59, %c0_60, %c0_61, %c0_62] : memref<2x16x16x36xbf16, #tpu.memory_space<vmem>>, vector<1x16x16x36xbf16>
    %67 = vector.shape_cast %66 : vector<1x16x16x36xbf16> to vector<16x16x36xbf16>
    %68 = vector.shape_cast %67 : vector<16x16x36xbf16> to vector<256x36xbf16>
    %c0_63 = arith.constant 0 : index
    %c0_64 = arith.constant 0 : index
    %69 = vector.load %arg3[%c0_63, %c0_64] : memref<36x8xbf16, #tpu.memory_space<vmem>>, vector<36x8xbf16>
    %cst = arith.constant dense<0.000000e+00> : vector<256x8xf32>
    %70 = tpu.matmul %68, %69, %cst {dimension_numbers = #tpu.dot_dimension_numbers<[1], [0], [0], [1], [0, 0, 1, 1], [], []>} : vector<256x36xbf16>, vector<36x8xbf16>, vector<256x8xf32> -> vector<256x8xf32>
    %c0_65 = arith.constant 0 : index
    %c0_66 = arith.constant 0 : index
    %71 = vector.load %arg4[%c0_65, %c0_66] : memref<1x8xf32, #tpu.memory_space<vmem>>, vector<1x8xf32>
    %72 = vector.broadcast %71 : vector<1x8xf32> to vector<256x8xf32>
    %73 = arith.addf %70, %72 : vector<256x8xf32>
    %cst_67 = arith.constant 0.000000e+00 : f32
    %74 = vector.broadcast %cst_67 : f32 to vector<256x8xf32>
    %75 = arith.maximumf %73, %74 : vector<256x8xf32>
    %c0_68 = arith.constant 0 : index
    %c0_69 = arith.constant 0 : index
    %c0_70 = arith.constant 0 : index
    %76 = vector.load %arg5[%c0_68, %c0_69, %c0_70] : memref<1x256x8xf32, #tpu.memory_space<vmem>>, vector<1x256x8xf32>
    %77 = vector.shape_cast %76 : vector<1x256x8xf32> to vector<256x8xf32>
    %78 = vector.shape_cast %75 : vector<256x8xf32> to vector<1x256x8xf32>
    tpu.vector_store %arg5[%c0_68, %c0_69, %c0_70], %78 {strides = array<i32>} : memref<1x256x8xf32, #tpu.memory_space<vmem>>, vector<1x256x8xf32>,
    return
  }
  func.func @transform_0(%arg0: i32, %arg1: i32) -> (i32, i32, i32, i32) {
    %c0_i32 = arith.constant 0 : i32
    %c0_i32_0 = arith.constant 0 : i32
    %c0_i32_1 = arith.constant 0 : i32
    %c0_i32_2 = arith.constant 0 : i32
    return %arg0, %c0_i32, %c0_i32_0, %c0_i32_1 : i32, i32, i32, i32
  }
  func.func @transform_1(%arg0: i32, %arg1: i32) -> (i32, i32) {
    %c0_i32 = arith.constant 0 : i32
    %c0_i32_0 = arith.constant 0 : i32
    %c0_i32_1 = arith.constant 0 : i32
    return %c0_i32, %c0_i32_0 : i32, i32
  }
  func.func @transform_2(%arg0: i32, %arg1: i32) -> (i32, i32) {
    %c0_i32 = arith.constant 0 : i32
    %c0_i32_0 = arith.constant 0 : i32
    %c0_i32_1 = arith.constant 0 : i32
    return %c0_i32, %c0_i32_0 : i32, i32
  }
  func.func @transform_3(%arg0: i32, %arg1: i32) -> (i32, i32, i32) {
    %c0_i32 = arith.constant 0 : i32
    %c0_i32_0 = arith.constant 0 : i32
    return %arg0, %arg1, %c0_i32 : i32, i32, i32
  }
}

</mosaic_0001>

<bundles_post_ra>
// kernel: _conv_relu_forward.1
= control target key start
LH: loop header
LB: loop body
LE: loop exit
PB: predicated region body
PF: predicated region fallthrough
CT: control target
= control target key end

     0   :  { %s4308_s12 = smov 0   ;;  %s4310_s13 = smov 0   ;;  %s5869_s0 = inlined_call_operand.vmem [shape: bf16[2,18,18,4], index: 0, kind: input, shape index: {}]   ;;  %s5870_s1 = inlined_call_operand.vmem [shape: bf16[36,8], index: 1, kind: input, shape index: {}]   ;;  %s5871_s2 = inlined_call_operand.vmem [shape: f32[1,8], index: 2, kind: input, shape index: {}]   ;;  %s5872_s3 = inlined_call_operand.vmem [shape: f32[2,256,8], index: 3, kind: output, shape index: {}]  }
   0x1   :  { %s4312_s14 = smov 0  }
   0x2 LB: > { %s25_s15 = sadd.s32 1, %s4274_s13  ;;  %p3796_p0 = scmp.ge.s32.totalorder %s4278_s14, 1  ;;  %s4278_s14 = sphi %s4312_s14, %s13_s14   ;;  %s4274_s13 = sphi %s4310_s13, %s5878_s13   ;;  %s4270_s12 = sphi %s4308_s12, %s5877_s12  }
   0x3   : > { %p27_p1 = scmp.ge.s32.totalorder %s25_s15, 2  ;;  %p151_p2 = scmp.lt.s32.totalorder %s4278_s14, 3 }
   0x5   : > { %s5880_s15 = smov (%p27_p1, %s25_s15), 0  ;;  %p152_p3 = pnand %p3796_p0, %p151_p2 }
   0x6   : > { %p179_p4 = scmp.lt.s32.totalorder (!%p152_p3), %s4270_s12, 1  ;;  %s4280_s20 = smov (!%p152_p3), 4  }
   0x7   : > { %155 = sbr.rel (%p152_p3) target bundleno = 969 (0x3c9), region = 32  ;;  %s4281_s21 = smov (!%p152_p3), 8  }
   0x8   : > { %s4282_s22 = smov (!%p152_p3), 12   ;;  %s4283_s23 = smov (!%p152_p3), 16  }
   0x9   : > { %s4284_s24 = smov (!%p152_p3), 20   ;;  %s4285_s25 = smov (!%p152_p3), 24  }
   0xa   : > { %s4286_s26 = smov (!%p152_p3), 28   ;;  %s4287_s27 = smov (!%p152_p3), 32  }
   0xc   : > { %s5882_s12 = smov (!%p179_p4, %s4270_s12), 1  ;;  %vm312_vm0 = vsmask.f32 3328  ;;  %vm313_vm1 = vsmask.f32 7440  ;;  %vm924_vm3 = vcmask 1042432  }
   0xd   : > { %s4222_s16 = smul.u32 216, %s5882_s12  ;;  %vm4343_vm2 = vmor %vm312_vm0, %vm313_vm1  ;;  %vm925_vm4 = vcmask 1046532   ;;  %vm231_vm5 = vcmask 27648   ;;  %vm795_vm7 = vcmask 60448   ;;  %vm1135_vm8 = vcmask 93248   ;;  %s4194_s9 = sshll.u32 %s5882_s12, 8 }
   0xe   : > { %vm4518_vm6 = vmor %vm924_vm3, %vm925_vm4  ;;  %vm1332_vm9 = vcmask 126048   ;;  %vm1893_vm10 = vcmask 158848   ;;  %vm2230_vm11 = vcmask 191648   ;;  %vm2427_vm12 = vcmask 224448  }
   0xf   : > { %s4332_s19 = scalar_lea.vmem %s5869_s0, %s4222_s16  ;;  %vm3543_vm13 = vcmask 1041408   ;;  %vm2988_vm14 = vcmask 257248   ;;  %vm3325_vm15 = vcmask 290048   ;;  %vm3494_vm0 = vcmask 293888   ;;  %s5740_s16 = scalar_lea.vmem %s5872_s3, %s4194_s9 }
  0x10   : > { %v267_v0 = vld [vmem:[%s4332_s19 + $0xc] sm:$0xf]  ;;  %v268_v1 = vld [vmem:[%s4332_s19 + $0x10] sm:$0xf]  ;;  %v264_v2 = vld [vmem:[%s4332_s19] sm:$0xf] }
  0x11   : > { %v340_v3 = vshrl.u32 %v267_v0, 16  ;;  %v343_v4 = vshll.u32 %v267_v0, 16  ;;  %v349_v5 = vshll.u32 %v268_v1, 16  ;;  %v353_v6 = vshrl.u32 %v268_v1, 16  ;;  %v265_v7 = vld [vmem:[%s4332_s19 + $0x4] sm:$0xf] }
  0x12   : > { %v316_v8 = vshrl.u32 %v264_v2, 16  ;;  %v319_v9 = vshll.u32 %v264_v2, 16  ;;  %v325_v10 = vshll.u32 %v265_v7, 16  ;;  %v329_v11 = vshrl.u32 %v265_v7, 16  ;;  %v269_v12 = vld [vmem:[%s4332_s19 + $0x14] sm:$0x1] }
  0x13   : > { %v342_v13 = vrot.slane %v340_v3, 4  ;;  %v345_v14 = vrot.slane %v343_v4, 5  ;;  %v351_v15 = vrot.slane %v349_v5, 5  ;;  %v355_v16 = vrot.slane %v353_v6, 4  ;;  %v266_v17 = vld [vmem:[%s4332_s19 + $0x8] sm:$0x1] }
  0x14   : > { %v318_v18 = vrot.slane %v316_v8, 4  ;;  %v321_v19 = vrot.slane %v319_v9, 5  ;;  %v331_v20 = vrot.slane %v329_v11, 4  ;;  %v274_v21 = vld [vmem:[%s4332_s19 + $0x28] sm:$0xf]  ;;  %v359_v24 = vshll.u32 %v269_v12, 16 }
  0x15   : > { %v346_v22 = vor.u32 %v345_v14, %v342_v13  ;;  %v356_v23 = vor.u32 %v355_v16, %v351_v15  ;;  %v327_v27 = vrot.slane %v325_v10, 5  ;;  %v397_v28 = vshll.u32 %v274_v21, 16  ;;  %v273_v30 = vld [vmem:[%s4332_s19 + $0x24] sm:$0xf]  ;;  %v270_v35 = vld [vmem:[%s4332_s19 + $0x18] sm:$0xf] }
  0x16   : > { %v322_v26 = vor.u32 %v321_v19, %v318_v18  ;;  %v401_v29 = vshrl.u32 %v274_v21, 16  ;;  %v335_v32 = vshll.u32 %v266_v17, 16  ;;  %v361_v38 = vrot.slane %v359_v24, 5  ;;  %v271_v40 = vld [vmem:[%s4332_s19 + $0x1c] sm:$0xf] }
  0x17   : > { %v347_v31 = vrot.slane %v346_v22, 4  ;;  %v332_v34 = vor.u32 %v331_v20, %v327_v27  ;;  %v357_v37 = vrot.slane %v356_v23, 4  ;;  %v388_v39 = vshrl.u32 %v273_v30, 16  ;;  %v275_v42 = vld [vmem:[%s4332_s19 + $0x2c] sm:$0x1] }
  0x18   : > { %v323_v33 = vrot.slane %v322_v26, 4  ;;  %v4356_v43 = vrot.slane %v397_v28, 5  ;;  %v403_v44 = vrot.slane %v401_v29, 4  ;;  %v391_v45 = vshll.u32 %v273_v30, 16  ;;  %v279_v50 = vld [vmem:[%s4332_s19 + $0x3c] sm:$0xf] }
  0x19   : > { %v352_v36 = vsel %vm4343_vm2, %v347_v31, %v351_v15  ;;  %v337_v46 = vrot.slane %v335_v32, 5  ;;  %v390_v47 = vrot.slane %v388_v39, 4  ;;  %v364_v48 = vshrl.u32 %v270_v35, 16  ;;  %v277_v58 = vld [vmem:[%s4332_s19 + $0x34] sm:$0xf] }
  0x1a   : > { %703 = vrot.lane.b32.xlu1 %v352_v36, %s4280_s20  ;;  %v328_v41 = vsel %vm4343_vm2, %v323_v33, %v327_v27  ;;  %v367_v49 = vshll.u32 %v270_v35, 16  ;;  %v333_v51 = vrot.slane %v332_v34, 4  ;;  %v393_v52 = vrot.slane %v391_v45, 5  ;;  %v272_v6 = vld [vmem:[%s4332_s19 + $0x20] sm:$0x1] }
  0x1b   : > { %699 = vrot.lane.b32.xlu0 %v328_v41, %s4280_s20  ;;  %v373_v53 = vshll.u32 %v271_v40, 16  ;;  %v377_v54 = vshrl.u32 %v271_v40, 16  ;;  %v407_v55 = vshll.u32 %v275_v42, 16  ;;  %v366_v56 = vrot.slane %v364_v48, 4  ;;  %v280_v15 = vld [vmem:[%s4332_s19 + $0x40] sm:$0xf] }
  0x1c   : > { %v369_v57 = vrot.slane %v367_v49, 5  ;;  %v404_v59 = vor.u32 %v403_v44, %v4356_v43  ;;  %v436_v61 = vshrl.u32 %v279_v50, 16  ;;  %v439_v62 = vshll.u32 %v279_v50, 16  ;;  %v278_v16 = vld [vmem:[%s4332_s19 + $0x38] sm:$0x1] }
  0x1d   : > { %v379_v60 = vrot.slane %v377_v54, 4  ;;  %v362_v63 = vsel %vm4343_vm2, %v357_v37, %v361_v38  ;;  %v394_v0 = vor.u32 %v393_v52, %v390_v47  ;;  %v375_v2 = vrot.slane %v373_v53, 5  ;;  %v283_v20 = vld [vmem:[%s4332_s19 + $0x4c] sm:$0xf]  ;;  %v276_v21 = vld [vmem:[%s4332_s19 + $0x30] sm:$0xf] }
  0x1e   : > { %v370_v1 = vor.u32 %v369_v57, %v366_v56  ;;  %v338_v3 = vsel %vm4343_vm2, %v333_v51, %v337_v46  ;;  %v421_v4 = vshll.u32 %v277_v58, 16  ;;  %v425_v5 = vshrl.u32 %v277_v58, 16  ;;  %v282_v24 = vld [vmem:[%s4332_s19 + $0x48] sm:$0xf]  ;;  %v288_v47 = vld [vmem:[%s4332_s19 + $0x60] sm:$0xf] }
  0x1f   : > { %v409_v7 = vrot.slane %v407_v55, 5  ;;  %v405_v9 = vrot.slane %v404_v59, 4  ;;  %v438_v10 = vrot.slane %v436_v61, 4  ;;  %v441_v11 = vrot.slane %v439_v62, 5  ;;  %v284_v49 = vld [vmem:[%s4332_s19 + $0x50] sm:$0x1] }
  0x20   : > { %v371_v8 = vrot.slane %v370_v1, 4  ;;  %v380_v12 = vor.u32 %v379_v60, %v375_v2  ;;  %v395_v13 = vrot.slane %v394_v0, 4  ;;  %v383_v17 = vshll.u32 %v272_v6, 16  ;;  %v286_v53 = vld [vmem:[%s4332_s19 + $0x58] sm:$0xf] }
  0x21   : > { %v4374_v18 = vrot.slane %v421_v4, 5  ;;  %v427_v19 = vrot.slane %v425_v5, 4  ;;  %v410_v26 = vsel %vm4343_vm2, %v405_v9, %v409_v7  ;;  %v442_v27 = vor.u32 %v441_v11, %v438_v10  ;;  %v281_v58 = vld [vmem:[%s4332_s19 + $0x44] sm:$0x1]  ;;  %v292_v11 = vld [vmem:[%s4332_s19 + $0x70] sm:$0xf] }
  0x22   : > { %705 = vrot.lane.b32.xlu1 %v362_v63, %s4280_s20  ;;  %v376_v14 = vsel %vm4343_vm2, %v371_v8, %v375_v2  ;;  %v381_v22 = vrot.slane %v380_v12, 4  ;;  %v385_v23 = vrot.slane %v383_v17, 5  ;;  %v445_v28 = vshll.u32 %v280_v15, 16  ;;  %v285_v2 = vld [vmem:[%s4332_s19 + $0x54] sm:$0xf] }
  0x23   : > { %701 = vrot.lane.b32.xlu0 %v338_v3, %s4280_s20  ;;  %707 = vrot.lane.b32.xlu2 %v376_v14, %s4280_s20  ;;  %v431_v29 = vshll.u32 %v278_v16, 16  ;;  %v400_v30 = vsel %vm4343_vm2, %v395_v13, %v4356_v43  ;;  %v469_v31 = vshll.u32 %v283_v20, 16  ;;  %v473_v32 = vshrl.u32 %v283_v20, 16  ;;  %v289_v6 = vld [vmem:[%s4332_s19 + $0x64] sm:$0xf] }
  0x24   : > { %v412_v33 = vshrl.u32 %v276_v21, 16  ;;  %v428_v34 = vor.u32 %v427_v19, %v4374_v18  ;;  %v460_v35 = vshrl.u32 %v282_v24, 16  ;;  %v463_v36 = vshll.u32 %v282_v24, 16  ;;  %v291_v20 = vld [vmem:[%s4332_s19 + $0x6c] sm:$0xf] }
  0x25   : > { %v415_v37 = vshll.u32 %v276_v21, 16  ;;  %v449_v38 = vshrl.u32 %v280_v15, 16  ;;  %v386_v39 = vsel %vm4343_vm2, %v381_v22, %v385_v23  ;;  %v447_v41 = vrot.slane %v445_v28, 5  ;;  %v287_v15 = vld [vmem:[%s4332_s19 + $0x5c] sm:$0x1] }
  0x26   : > { %v414_v40 = vrot.slane %v412_v33, 4  ;;  %v443_v43 = vrot.slane %v442_v27, 4  ;;  %v433_v44 = vrot.slane %v431_v29, 5  ;;  %v4389_v45 = vrot.slane %v469_v31, 5 }
  0x27   : > { %v417_v42 = vrot.slane %v415_v37, 5  ;;  %v475_v46 = vrot.slane %v473_v32, 4  ;;  %v429_v48 = vrot.slane %v428_v34, 4  ;;  %v462_v50 = vrot.slane %v460_v35, 4 }
  0x28   : > { %v465_v51 = vrot.slane %v463_v36, 5  ;;  %v451_v54 = vrot.slane %v449_v38, 4  ;;  %v508_v56 = vshrl.u32 %v288_v47, 16  ;;  %v511_v57 = vshll.u32 %v288_v47, 16  ;;  %v295_v47 = vld [vmem:[%s4332_s19 + $0x7c] sm:$0xf] }
  0x29   : > { %v418_v52 = vor.u32 %v417_v42, %v414_v40  ;;  %v448_v59 = vsel %vm4343_vm2, %v443_v43, %v447_v41  ;;  %v476_v60 = vor.u32 %v475_v46, %v4389_v45  ;;  %v479_v61 = vshll.u32 %v284_v49, 16  ;;  %v297_v42 = vld [vmem:[%s4332_s19 + $0x84] sm:$0xf]  ;;  %v290_v49 = vld [vmem:[%s4332_s19 + $0x68] sm:$0x1] }
  0x2a   : > { %713 = vrot.lane.b32.xlu1 %v410_v26, %s4280_s20  ;;  %v434_v62 = vsel %vm4343_vm2, %v429_v48, %v433_v44  ;;  %v466_v63 = vor.u32 %v465_v51, %v462_v50  ;;  %v493_v0 = vshll.u32 %v286_v53, 16  ;;  %v497_v1 = vshrl.u32 %v286_v53, 16 }
  0x2b   : > { %711 = vrot.lane.b32.xlu0 %v400_v30, %s4280_s20  ;;  %709 = vrot.lane.b32.xlu2 %v386_v39, %s4280_s20  ;;  %v419_v55 = vrot.slane %v418_v52, 4  ;;  %v452_v4 = vor.u32 %v451_v54, %v447_v41  ;;  %v455_v5 = vshll.u32 %v281_v58, 16  ;;  %v510_v7 = vrot.slane %v508_v56, 4  ;;  %v293_v41 = vld [vmem:[%s4332_s19 + $0x74] sm:$0x1] }
  0x2c   : > { %v513_v8 = vrot.slane %v511_v57, 5  ;;  %v477_v9 = vrot.slane %v476_v60, 4  ;;  %v481_v10 = vrot.slane %v479_v61, 5  ;;  %v484_v12 = vshrl.u32 %v285_v2, 16  ;;  %v294_v54 = vld [vmem:[%s4332_s19 + $0x78] sm:$0xf] }
  0x2d   : > { %v424_v3 = vsel %vm4343_vm2, %v419_v55, %v4374_v18  ;;  %v487_v13 = vshll.u32 %v285_v2, 16  ;;  %v467_v14 = vrot.slane %v466_v63, 4  ;;  %v4411_v16 = vrot.slane %v493_v0, 5 }
  0x2e   : > { %v499_v17 = vrot.slane %v497_v1, 4  ;;  %v453_v18 = vrot.slane %v452_v4, 4  ;;  %v457_v19 = vrot.slane %v455_v5, 5  ;;  %v486_v21 = vrot.slane %v484_v12, 4  ;;  %v298_v4 = vld [vmem:[%s4332_s19 + $0x88] sm:$0xf] }
  0x2f   : > { %v489_v22 = vrot.slane %v487_v13, 5  ;;  %v514_v23 = vor.u32 %v513_v8, %v510_v7  ;;  %v517_v24 = vshll.u32 %v289_v6, 16  ;;  %v541_v26 = vshll.u32 %v292_v11, 16 }
  0x30   : > { %v545_v27 = vshrl.u32 %v292_v11, 16  ;;  %v482_v28 = vsel %vm4343_vm2, %v477_v9, %v481_v10  ;;  %v503_v29 = vshll.u32 %v287_v15, 16  ;;  %v472_v30 = vsel %vm4343_vm2, %v467_v14, %v4389_v45  ;;  %v301_v9 = vld [vmem:[%s4332_s19 + $0x94] sm:$0xf]  ;;  %v296_v11 = vld [vmem:[%s4332_s19 + $0x80] sm:$0x1] }
  0x31   : > { %v500_v31 = vor.u32 %v499_v17, %v4411_v16  ;;  %v532_v32 = vshrl.u32 %v291_v20, 16  ;;  %v535_v33 = vshll.u32 %v291_v20, 16  ;;  %v521_v34 = vshrl.u32 %v289_v6, 16  ;;  %v300_v14 = vld [vmem:[%s4332_s19 + $0x90] sm:$0xf] }
  0x32   : > { %719 = vrot.lane.b32.xlu1 %v448_v59, %s4280_s20  ;;  %v458_v35 = vsel %vm4343_vm2, %v453_v18, %v457_v19  ;;  %v490_v36 = vor.u32 %v489_v22, %v486_v21  ;;  %v515_v37 = vrot.slane %v514_v23, 4  ;;  %v519_v38 = vrot.slane %v517_v24, 5 }
  0x33   : > { %717 = vrot.lane.b32.xlu0 %v434_v62, %s4280_s20  ;;  %715 = vrot.lane.b32.xlu2 %v424_v3, %s4280_s20  ;;  %v4423_v39 = vrot.slane %v541_v26, 5  ;;  %v547_v40 = vrot.slane %v545_v27, 4  ;;  %v501_v43 = vrot.slane %v500_v31, 4  ;;  %v505_v44 = vrot.slane %v503_v29, 5 }
  0x34   : > { %v534_v45 = vrot.slane %v532_v32, 4  ;;  %v537_v46 = vrot.slane %v535_v33, 5  ;;  %v491_v48 = vrot.slane %v490_v36, 4  ;;  %v523_v50 = vrot.slane %v521_v34, 4 }
  0x35   : > { %v520_v51 = vsel %vm4343_vm2, %v515_v37, %v519_v38  ;;  %v548_v52 = vor.u32 %v547_v40, %v4423_v39  ;;  %v551_v53 = vshll.u32 %v293_v41, 16  ;;  %v580_v55 = vshrl.u32 %v297_v42, 16  ;;  %v302_v37 = vld [vmem:[%s4332_s19 + $0x98] sm:$0x1]  ;;  %v306_v40 = vld [vmem:[%s4332_s19 + $0xa8] sm:$0xf] }
  0x36   : > { %v583_v56 = vshll.u32 %v297_v42, 16  ;;  %v565_v57 = vshll.u32 %v295_v47, 16  ;;  %v569_v58 = vshrl.u32 %v295_v47, 16  ;;  %v506_v59 = vsel %vm4343_vm2, %v501_v43, %v505_v44  ;;  %v304_v42 = vld [vmem:[%s4332_s19 + $0xa0] sm:$0xf] }
  0x37   : > { %v538_v60 = vor.u32 %v537_v46, %v534_v45  ;;  %v527_v61 = vshll.u32 %v290_v49, 16  ;;  %v496_v62 = vsel %vm4343_vm2, %v491_v48, %v4411_v16  ;;  %v524_v63 = vor.u32 %v523_v50, %v519_v38  ;;  %v299_v43 = vld [vmem:[%s4332_s19 + $0x8c] sm:$0x1]  ;;  %v303_v47 = vld [vmem:[%s4332_s19 + $0x9c] sm:$0xf] }
  0x38   : > { %v556_v0 = vshrl.u32 %v294_v54, 16  ;;  %v559_v1 = vshll.u32 %v294_v54, 16  ;;  %v549_v2 = vrot.slane %v548_v52, 4  ;;  %v553_v3 = vrot.slane %v551_v53, 5 }
  0x39   : > { %v582_v5 = vrot.slane %v580_v55, 4  ;;  %v585_v6 = vrot.slane %v583_v56, 5  ;;  %v4443_v7 = vrot.slane %v565_v57, 5  ;;  %v571_v8 = vrot.slane %v569_v58, 4 }
  0x3a   : > { %725 = vrot.lane.b32.xlu1 %v482_v28, %s4280_s20  ;;  %v539_v10 = vrot.slane %v538_v60, 4  ;;  %v525_v12 = vrot.slane %v524_v63, 4  ;;  %v529_v13 = vrot.slane %v527_v61, 5  ;;  %v558_v15 = vrot.slane %v556_v0, 4 }
  0x3b   : > { %723 = vrot.lane.b32.xlu0 %v472_v30, %s4280_s20  ;;  %721 = vrot.lane.b32.xlu2 %v458_v35, %s4280_s20  ;;  %v561_v16 = vrot.slane %v559_v1, 5  ;;  %v589_v17 = vshll.u32 %v298_v4, 16  ;;  %v613_v18 = vshll.u32 %v301_v9, 16  ;;  %v617_v19 = vshrl.u32 %v301_v9, 16  ;;  %v305_v1 = vld [vmem:[%s4332_s19 + $0xa4] sm:$0x1] }
  0x3c   : > { %v554_v20 = vsel %vm4343_vm2, %v549_v2, %v553_v3  ;;  %v586_v21 = vor.u32 %v585_v6, %v582_v5  ;;  %v572_v22 = vor.u32 %v571_v8, %v4443_v7  ;;  %v575_v23 = vshll.u32 %v296_v11, 16  ;;  %v310_v5 = vld [vmem:[%s4332_s19 + $0xb8] sm:$0xf]  ;;  %v309_v8 = vld [vmem:[%s4332_s19 + $0xb4] sm:$0xf] }
  0x3d   : > { %v544_v24 = vsel %vm4343_vm2, %v539_v10, %v4423_v39  ;;  %v604_v26 = vshrl.u32 %v300_v14, 16  ;;  %v607_v27 = vshll.u32 %v300_v14, 16  ;;  %v593_v28 = vshrl.u32 %v298_v4, 16 }
  0x3e   : > { %v530_v29 = vsel %vm4343_vm2, %v525_v12, %v529_v13  ;;  %v562_v30 = vor.u32 %v561_v16, %v558_v15  ;;  %v4458_v31 = vrot.slane %v613_v18, 5  ;;  %v619_v32 = vrot.slane %v617_v19, 4 }
  0x3f   : > { %v587_v33 = vrot.slane %v586_v21, 4  ;;  %v591_v34 = vrot.slane %v589_v17, 5  ;;  %v573_v35 = vrot.slane %v572_v22, 4  ;;  %v577_v36 = vrot.slane %v575_v23, 5 }
  0x40   : > { %v606_v38 = vrot.slane %v604_v26, 4  ;;  %v609_v39 = vrot.slane %v607_v27, 5  ;;  %v563_v41 = vrot.slane %v562_v30, 4  ;;  %v595_v44 = vrot.slane %v593_v28, 4 }
  0x41   : > { %v620_v45 = vor.u32 %v619_v32, %v4458_v31  ;;  %v623_v46 = vshll.u32 %v302_v37, 16  ;;  %v592_v48 = vsel %vm4343_vm2, %v587_v33, %v591_v34  ;;  %v578_v49 = vsel %vm4343_vm2, %v573_v35, %v577_v36  ;;  %v308_v36 = vld [vmem:[%s4332_s19 + $0xb0] sm:$0x1] }
  0x42   : > { %731 = vrot.lane.b32.xlu1 %v520_v51, %s4280_s20  ;;  %v652_v50 = vshrl.u32 %v306_v40, 16  ;;  %v655_v51 = vshll.u32 %v306_v40, 16  ;;  %v610_v52 = vor.u32 %v609_v39, %v606_v38  ;;  %v637_v53 = vshll.u32 %v304_v42, 16 }
  0x43   : > { %729 = vrot.lane.b32.xlu0 %v506_v59, %s4280_s20  ;;  %727 = vrot.lane.b32.xlu2 %v496_v62, %s4280_s20  ;;  %v641_v54 = vshrl.u32 %v304_v42, 16  ;;  %v599_v55 = vshll.u32 %v299_v43, 16  ;;  %v568_v56 = vsel %vm4343_vm2, %v563_v41, %v4443_v7  ;;  %v596_v57 = vor.u32 %v595_v44, %v591_v34  ;;  %v307_v62 = vld [vmem:[%s4332_s19 + $0xac] sm:$0xf] }
  0x44   : > { %v628_v58 = vshrl.u32 %v303_v47, 16  ;;  %v631_v59 = vshll.u32 %v303_v47, 16  ;;  %v621_v60 = vrot.slane %v620_v45, 4  ;;  %v625_v61 = vrot.slane %v623_v46, 5 }
  0x45   : > { %v654_v63 = vrot.slane %v652_v50, 4  ;;  %v657_v0 = vrot.slane %v655_v51, 5  ;;  %v611_v2 = vrot.slane %v610_v52, 4  ;;  %v639_v3 = vrot.slane %v637_v53, 5  ;;  %v831_v51 = vld [vmem:[%s4332_s19 + $0xc] sm:$0xe] }
  0x46   : > { %v643_v4 = vrot.slane %v641_v54, 4  ;;  %v597_v6 = vrot.slane %v596_v57, 4  ;;  %v601_v7 = vrot.slane %v599_v55, 5  ;;  %v630_v9 = vrot.slane %v628_v58, 4  ;;  %v832_v53 = vld [vmem:[%s4332_s19 + $0x10] sm:$0xf] }
  0x47   : > { %v633_v10 = vrot.slane %v631_v59, 5  ;;  %v626_v11 = vsel %vm4343_vm2, %v621_v60, %v625_v61  ;;  %v661_v12 = vshll.u32 %v307_v62, 16  ;;  %v658_v13 = vor.u32 %v657_v0, %v654_v63  ;;  %v830_v54 = vld [vmem:[%s4332_s19 + $0x8] sm:$0x1]  ;;  %v828_v61 = vld [vmem:[%s4332_s19] sm:$0xe] }
  0x48   : > { %v647_v14 = vshll.u32 %v305_v1, 16  ;;  %v685_v15 = vshll.u32 %v310_v5, 16  ;;  %v689_v16 = vshrl.u32 %v310_v5, 16  ;;  %v616_v17 = vsel %vm4343_vm2, %v611_v2, %v4458_v31  ;;  %v311_v31 = vld [vmem:[%s4332_s19 + $0xbc] sm:$0x1] }
  0x49   : > { %v644_v18 = vor.u32 %v643_v4, %v639_v3  ;;  %v676_v19 = vshrl.u32 %v309_v8, 16  ;;  %v665_v21 = vshrl.u32 %v307_v62, 16  ;;  %v602_v22 = vsel %vm4343_vm2, %v597_v6, %v601_v7  ;;  %v835_v63 = vld [vmem:[%s4332_s19 + $0x1c] sm:$0xf]  ;;  %v203_v0 = vld [vmem:[%s4332_s19 + $0x18] sm:$0xf] }
  0x4a   : > { %737 = vrot.lane.b32.xlu1 %v554_v20, %s4280_s20  ;;  %v679_v20 = vshll.u32 %v309_v8, 16  ;;  %v634_v23 = vor.u32 %v633_v10, %v630_v9  ;;  %v663_v26 = vrot.slane %v661_v12, 5  ;;  %v687_v27 = vrot.slane %v685_v15, 5  ;;  %236 = vst.msk [vmem:[#allocation2 + $0x10] sm:$0xf] %vm231_vm5, %v203_v0 }
  0x4b   : > { %735 = vrot.lane.b32.xlu0 %v544_v24, %s4280_s20  ;;  %733 = vrot.lane.b32.xlu2 %v530_v29, %s4280_s20  ;;  %v659_v24 = vrot.slane %v658_v13, 4  ;;  %v691_v28 = vrot.slane %v689_v16, 4  ;;  %v645_v29 = vrot.slane %v644_v18, 4  ;;  %v649_v30 = vrot.slane %v647_v14, 5  ;;  %v201_v2 = vld [vmem:[%s4332_s19 + $0xc] sm:$0xf] }
  0x4c   : > { %v678_v32 = vrot.slane %v676_v19, 4  ;;  %v681_v33 = vrot.slane %v679_v20, 5  ;;  %v635_v34 = vrot.slane %v634_v23, 4  ;;  %v667_v35 = vrot.slane %v665_v21, 4  ;;  %234 = vst.msk [vmem:[#allocation2 + $0x8] sm:$0xf] %vm231_vm5, %v201_v2 }
  0x4d   : > { %v664_v37 = vsel %vm4343_vm2, %v659_v24, %v663_v26  ;;  %v692_v38 = vor.u32 %v691_v28, %v687_v27  ;;  %v695_v39 = vshll.u32 %v311_v31, 16  ;;  %v650_v40 = vsel %vm4343_vm2, %v645_v29, %v649_v30  ;;  %v836_v6 = vld [vmem:[%s4332_s19 + $0x20] sm:$0x1]  ;;  %v834_v9 = vld [vmem:[%s4332_s19 + $0x18] sm:$0xe] }
  0x4e   : > { %v682_v41 = vor.u32 %v681_v33, %v678_v32  ;;  %v640_v42 = vsel %vm4343_vm2, %v635_v34, %v639_v3  ;;  %v668_v43 = vor.u32 %v667_v35, %v663_v26  ;;  %v671_v44 = vshll.u32 %v308_v36, 16  ;;  %v199_v3 = vld [vmem:[%s4332_s19] sm:$0xf]  ;;  %v833_v12 = vld [vmem:[%s4332_s19 + $0x14] sm:$0x1] }
  0x4f   : > { %v693_v45 = vrot.slane %v692_v38, 4  ;;  %v697_v46 = vrot.slane %v695_v39, 5  ;;  %v3801_v58 = vrot.slane %v831_v51, 9  ;;  %v936_v59 = vrot.slane %v832_v53, 5  ;;  %232 = vst.msk [vmem:[#allocation2] sm:$0xf] %vm231_vm5, %v199_v3 }
  0x50   : > { %v683_v47 = vrot.slane %v682_v41, 4  ;;  %v673_v50 = vrot.slane %v671_v44, 5  ;;  %v932_v60 = vrot.slane %v830_v54, 5  ;;  %v3800_v4 = vrot.slane %v828_v61, 9  ;;  %v838_v15 = vld [vmem:[%s4332_s19 + $0x28] sm:$0xf] }
  0x51   : > { %v698_v52 = vsel %vm4343_vm2, %v693_v45, %v697_v46  ;;  %v937_v5 = vsel %vm4518_vm6, %v3801_v58, %v936_v59  ;;  %v943_v7 = vrot.slane %v835_v63, 5  ;;  %v3802_v14 = vrot.slane %v834_v9, 9  ;;  %v204_v16 = vld [vmem:[%s4332_s19 + $0x1c] sm:$0xf]  ;;  %v200_v18 = vld [vmem:[%s4332_s19 + $0x4] sm:$0xf] }
  0x52   : > { %743 = vrot.lane.b32.xlu1 %v592_v48, %s4280_s20  ;;  %v829_v48 = vld [vmem:[%s4332_s19 + $0x4] sm:$0xf]  ;;  %237 = vst.msk [vmem:[#allocation2 + $0x14] sm:$0xf] %vm231_vm5, %v204_v16  ;;  %v938_v19 = vrot.slane %v936_v59, 4  ;;  %v939_v20 = vrot.slane %v833_v12, 5 }
  0x53   : > { %741 = vrot.lane.b32.xlu0 %v578_v49, %s4280_s20  ;;  %739 = vrot.lane.b32.xlu2 %v568_v56, %s4280_s20  ;;  %v669_v49 = vrot.slane %v668_v43, 4  ;;  %v929_v55 = vrot.slane %v829_v48, 5  ;;  %v688_v56 = vsel %vm4343_vm2, %v683_v47, %v687_v27  ;;  %v945_v13 = vrot.slane %v943_v7, 4  ;;  %233 = vst.msk [vmem:[#allocation2 + $0x4] sm:$0xf] %vm231_vm5, %v200_v18 }
  0x54   : > { %v841_v23 = vld [vmem:[%s4332_s19 + $0x34] sm:$0xf]  ;;  %v950_v24 = vrot.slane %v838_v15, 5  ;;  %v944_v26 = vsel %vm4518_vm6, %v3802_v14, %v943_v7  ;;  %v839_v27 = vld [vmem:[%s4332_s19 + $0x2c] sm:$0x1]  ;;  %v940_v28 = vsel %vm4518_vm6, %v938_v19, %v939_v20  ;;  %vm3668_vm1 = vcmask 64512  }
  0x55   : > { %v674_v57 = vsel %vm4343_vm2, %v669_v49, %v673_v50  ;;  %v931_v62 = vrot.slane %v929_v55, 4  ;;  %v930_v10 = vsel %vm4518_vm6, %v3800_v4, %v929_v55  ;;  %v957_v30 = vrot.slane %v841_v23, 5  ;;  %v837_v31 = vld [vmem:[%s4332_s19 + $0x24] sm:$0xe]  ;;  %v844_v34 = vld [vmem:[%s4332_s19 + $0x40] sm:$0xf] }
  0x56   : > { %v952_v32 = vrot.slane %v950_v24, 4  ;;  %v953_v33 = vrot.slane %v839_v27, 5  ;;  %v207_v35 = vld [vmem:[%s4332_s19 + $0x30] sm:$0xf]  ;;  %v206_v36 = vld [vmem:[%s4332_s19 + $0x28] sm:$0xf] }
  0x57   : > { %v933_v8 = vsel %vm4518_vm6, %v931_v62, %v932_v60  ;;  %240 = vst.msk [vmem:[#allocation2 + $0x20] sm:$0xf] %vm231_vm5, %v207_v35  ;;  %v3803_v38 = vrot.slane %v837_v31, 9  ;;  %v964_v41 = vrot.slane %v844_v34, 5  ;;  %v845_v43 = vld [vmem:[%s4332_s19 + $0x44] sm:$0x1] }
  0x58   : > { %239 = vst.msk [vmem:[#allocation2 + $0x1c] sm:$0xf] %vm231_vm5, %v206_v36  ;;  %v843_v44 = vld [vmem:[%s4332_s19 + $0x3c] sm:$0xe]  ;;  %v842_v46 = vld [vmem:[%s4332_s19 + $0x38] sm:$0x1] }
  0x59   : > { %v951_v45 = vsel %vm4518_vm6, %v3803_v38, %v950_v24  ;;  %v966_v47 = vrot.slane %v964_v41, 4  ;;  %v967_v48 = vrot.slane %v845_v43, 5  ;;  %v3805_v49 = vrot.slane %v843_v44, 9  ;;  %v210_v50 = vld [vmem:[%s4332_s19 + $0x40] sm:$0xf] }
  0x5a   : > { %749 = vrot.lane.b32.xlu1 %v626_v11, %s4280_s20  ;;  %v946_v11 = vrot.slane %v836_v6, 5  ;;  %243 = vst.msk [vmem:[#allocation2 + $0x2c] sm:$0xf] %vm231_vm5, %v210_v50  ;;  %v209_v51 = vld [vmem:[%s4332_s19 + $0x3c] sm:$0xf]  ;;  %v959_v54 = vrot.slane %v957_v30, 4 }
  0x5b   : > { %747 = vrot.lane.b32.xlu0 %v616_v17, %s4280_s20  ;;  %745 = vrot.lane.b32.xlu2 %v602_v22, %s4280_s20  ;;  %v202_v17 = vld [vmem:[%s4332_s19 + $0x10] sm:$0xf]  ;;  %v847_v53 = vld [vmem:[%s4332_s19 + $0x4c] sm:$0xf]  ;;  %v960_v55 = vrot.slane %v842_v46, 5  ;;  %v965_v58 = vsel %vm4518_vm6, %v3805_v49, %v964_v41 }
  0x5c   : > { %235 = vst.msk [vmem:[#allocation2 + $0xc] sm:$0xf] %vm231_vm5, %v202_v17  ;;  %v947_v21 = vsel %vm4518_vm6, %v945_v13, %v946_v11  ;;  %v840_v22 = vld [vmem:[%s4332_s19 + $0x30] sm:$0xe]  ;;  %v849_v59 = vld [vmem:[%s4332_s19 + $0x54] sm:$0xe] }
  0x5d   : > { %v3804_v29 = vrot.slane %v840_v22, 9  ;;  %242 = vst.msk [vmem:[#allocation2 + $0x28] sm:$0xf] %vm231_vm5, %v209_v51  ;;  %v850_v60 = vld [vmem:[%s4332_s19 + $0x58] sm:$0xf]  ;;  %v971_v61 = vrot.slane %v847_v53, 5  ;;  %v961_v63 = vsel %vm4518_vm6, %v959_v54, %v960_v55 }
  0x5e   : > { %v848_v62 = vld [vmem:[%s4332_s19 + $0x50] sm:$0x1]  ;;  %v846_v0 = vld [vmem:[%s4332_s19 + $0x48] sm:$0xe]  ;;  %v3807_v2 = vrot.slane %v849_v59, 9  ;;  %v978_v3 = vrot.slane %v850_v60, 5 }
  0x5f   : > { %v213_v4 = vld [vmem:[%s4332_s19 + $0x54] sm:$0xf]  ;;  %v973_v6 = vrot.slane %v971_v61, 4  ;;  %v974_v7 = vrot.slane %v848_v62, 5  ;;  %v212_v11 = vld [vmem:[%s4332_s19 + $0x4c] sm:$0xf] }
  0x60   : > { %246 = vst.msk [vmem:[#allocation2 + $0x38] sm:$0xf] %vm231_vm5, %v213_v4  ;;  %v211_v13 = vld [vmem:[%s4332_s19 + $0x48] sm:$0xf]  ;;  %v979_v14 = vsel %vm4518_vm6, %v3807_v2, %v978_v3  ;;  %v852_v18 = vld [vmem:[%s4332_s19 + $0x60] sm:$0xe] }
  0x61   : > { %v975_v16 = vsel %vm4518_vm6, %v973_v6, %v974_v7  ;;  %v854_v17 = vld [vmem:[%s4332_s19 + $0x68] sm:$0x1]  ;;  %245 = vst.msk [vmem:[#allocation2 + $0x34] sm:$0xf] %vm231_vm5, %v212_v11  ;;  %v851_v20 = vld [vmem:[%s4332_s19 + $0x5c] sm:$0x1] }
  0x62   : > { %755 = vrot.lane.b32.xlu1 %v664_v37, %s4280_s20  ;;  %v205_v37 = vld [vmem:[%s4332_s19 + $0x24] sm:$0xf]  ;;  %244 = vst.msk [vmem:[#allocation2 + $0x30] sm:$0xf] %vm231_vm5, %v211_v13  ;;  %v988_v22 = vrot.slane %v854_v17, 5 }
  0x63   : > { %753 = vrot.lane.b32.xlu0 %v650_v40, %s4280_s20  ;;  %751 = vrot.lane.b32.xlu2 %v640_v42, %s4280_s20  ;;  %238 = vst.msk [vmem:[#allocation2 + $0x18] sm:$0xf] %vm231_vm5, %v205_v37  ;;  %v958_v40 = vsel %vm4518_vm6, %v3804_v29, %v957_v30  ;;  %v954_v42 = vsel %vm4518_vm6, %v952_v32, %v953_v33  ;;  %v216_v23 = vld [vmem:[%s4332_s19 + $0x64] sm:$0xf]  ;;  %v856_v27 = vld [vmem:[%s4332_s19 + $0x70] sm:$0xf] }
  0x64   : > { %249 = vst.msk [vmem:[#allocation2 + $0x44] sm:$0xf] %vm231_vm5, %v216_v23  ;;  %v980_v29 = vrot.slane %v978_v3, 4  ;;  %v981_v30 = vrot.slane %v851_v20, 5  ;;  %v215_v31 = vld [vmem:[%s4332_s19 + $0x60] sm:$0xf] }
  0x65   : > { %v214_v33 = vld [vmem:[%s4332_s19 + $0x58] sm:$0xf]  ;;  %v859_v37 = vld [vmem:[%s4332_s19 + $0x7c] sm:$0xf]  ;;  %v992_v38 = vrot.slane %v856_v27, 5 }
  0x66   : > { %v858_v35 = vld [vmem:[%s4332_s19 + $0x78] sm:$0xe]  ;;  %248 = vst.msk [vmem:[#allocation2 + $0x40] sm:$0xf] %vm231_vm5, %v215_v31  ;;  %v855_v41 = vld [vmem:[%s4332_s19 + $0x6c] sm:$0xe] }
  0x67   : > { %247 = vst.msk [vmem:[#allocation2 + $0x3c] sm:$0xf] %vm231_vm5, %v214_v33  ;;  %v999_v43 = vrot.slane %v859_v37, 5  ;;  %v219_v44 = vld [vmem:[%s4332_s19 + $0x78] sm:$0xf]  ;;  %v994_v46 = vrot.slane %v992_v38, 4 }
  0x68   : > { %252 = vst.msk [vmem:[#allocation2 + $0x50] sm:$0xf] %vm231_vm5, %v219_v44  ;;  %v3809_v50 = vrot.slane %v855_v41, 9  ;;  %v218_v51 = vld [vmem:[%s4332_s19 + $0x70] sm:$0xf] }
  0x69   : > { %v217_v53 = vld [vmem:[%s4332_s19 + $0x6c] sm:$0xf]  ;;  %251 = vst.msk [vmem:[#allocation2 + $0x4c] sm:$0xf] %vm231_vm5, %v218_v51  ;;  %v860_v60 = vld [vmem:[%s4332_s19 + $0x80] sm:$0x1] }
  0x6a   : > { %761 = vrot.lane.b32.xlu1 %v698_v52, %s4280_s20  ;;  %v208_v52 = vld [vmem:[%s4332_s19 + $0x34] sm:$0xf]  ;;  %v993_v59 = vsel %vm4518_vm6, %v3809_v50, %v992_v38  ;;  %250 = vst.msk [vmem:[#allocation2 + $0x48] sm:$0xf] %vm231_vm5, %v217_v53  ;;  %v1002_v6 = vrot.slane %v860_v60, 5 }
  0x6b   : > { %759 = vrot.lane.b32.xlu0 %v688_v56, %s4280_s20  ;;  %757 = vrot.lane.b32.xlu2 %v674_v57, %s4280_s20  ;;  %241 = vst.msk [vmem:[#allocation2 + $0x24] sm:$0xf] %vm231_vm5, %v208_v52  ;;  %v968_v57 = vsel %vm4518_vm6, %v966_v47, %v967_v48  ;;  %v862_v48 = vld [vmem:[%s4332_s19 + $0x88] sm:$0xf]  ;;  %v865_v3 = vld [vmem:[%s4332_s19 + $0x94] sm:$0xf] }
  0x6c   : > { %v1006_v55 = vrot.slane %v862_v48, 5  ;;  %v221_v7 = vld [vmem:[%s4332_s19 + $0x84] sm:$0xf]  ;;  %v867_v11 = vld [vmem:[%s4332_s19 + $0x9c] sm:$0xe] }
  0x6d   : > { %v868_v13 = vld [vmem:[%s4332_s19 + $0xa0] sm:$0xf]  ;;  %254 = vst.msk [vmem:[#allocation2 + $0x58] sm:$0xf] %vm231_vm5, %v221_v7  ;;  %v864_v17 = vld [vmem:[%s4332_s19 + $0x90] sm:$0xe] }
  0x6e   : > { %v225_v20 = vld [vmem:[%s4332_s19 + $0x9c] sm:$0xf]  ;;  %v3812_v27 = vrot.slane %v864_v17, 9  ;;  %v869_v37 = vld [vmem:[%s4332_s19 + $0xa4] sm:$0x1] }
  0x6f   : > { %258 = vst.msk [vmem:[#allocation2 + $0x68] sm:$0xf] %vm231_vm5, %v225_v20  ;;  %v875_v53 = vld [vmem:[%s4332_s19 + $0xbc] sm:$0x1] }
  0x70   : > { %v3819_v7 = vld [vmem:[%s4332_s19 + $0x1c] sm:$0xf] }
  0x71   : > { %v3824_v20 = vld [vmem:[%s4332_s19 + $0x3c] sm:$0xf] }
  0x72   : > { %1043 = vrot.lane.b32.xlu1 %v937_v5, %s4281_s21 }
  0x73   : > { %1041 = vrot.lane.b32.xlu0 %v933_v8, %s4281_s21  ;;  %1039 = vrot.lane.b32.xlu2 %v930_v10, %s4281_s21  ;;  %v853_v8 = vld [vmem:[%s4332_s19 + $0x64] sm:$0xf]  ;;  %v3806_v10 = vrot.slane %v846_v0, 9 }
  0x74   : > { %v985_v15 = vrot.slane %v853_v8, 5 }
  0x75   : > { %v972_v19 = vsel %vm4518_vm6, %v3806_v10, %v971_v61  ;;  %v1008_v61 = vrot.slane %v1006_v55, 4 }
  0x7a   : > { %1049 = vrot.lane.b32.xlu1 %v947_v21, %s4281_s21  ;;  %v987_v21 = vrot.slane %v985_v15, 4 }
  0x7b   : > { %1047 = vrot.lane.b32.xlu0 %v944_v26, %s4281_s21  ;;  %1045 = vrot.lane.b32.xlu2 %v940_v28, %s4281_s21  ;;  %v3808_v26 = vrot.slane %v852_v18, 9  ;;  %v3813_v18 = vrot.slane %v867_v11, 9 }
  0x7c   : > { %v989_v34 = vsel %vm4518_vm6, %v987_v21, %v988_v22 }
  0x7d   : > { %v708_v39 = vpop.permute.xlu2 %707  ;;  %v986_v36 = vsel %vm4518_vm6, %v3808_v26, %v985_v15  ;;  %v866_v15 = vld [vmem:[%s4332_s19 + $0x98] sm:$0x1] }
  0x7e   : > { %800 = vst.msk [vmem:[#allocation2 + $0x10] sm:$0xf] %vm795_vm7, %v708_v39  ;;  %v857_v39 = vld [vmem:[%s4332_s19 + $0x74] sm:$0x1]  ;;  %v1016_v23 = vrot.slane %v866_v15, 5 }
  0x7f   : > { %v995_v47 = vrot.slane %v857_v39, 5  ;;  %v3820_v15 = vld [vmem:[%s4332_s19 + $0x24] sm:$0xf] }
  0x82   : > { %1055 = vrot.lane.b32.xlu1 %v958_v40, %s4281_s21  ;;  %v982_v40 = vsel %vm4518_vm6, %v980_v29, %v981_v30  ;;  %v223_v30 = vld [vmem:[%s4332_s19 + $0x90] sm:$0xf] }
  0x83   : > { %1053 = vrot.lane.b32.xlu0 %v954_v42, %s4281_s21  ;;  %1051 = vrot.lane.b32.xlu2 %v951_v45, %s4281_s21  ;;  %v3810_v42 = vrot.slane %v858_v35, 9  ;;  %v870_v35 = vld [vmem:[%s4332_s19 + $0xa8] sm:$0xe]  ;;  %256 = vst.msk [vmem:[#allocation2 + $0x60] sm:$0xf] %vm231_vm5, %v223_v30 }
  0x85   : > { %v710_v56 = vpop.permute.xlu2 %709  ;;  %v1000_v54 = vsel %vm4518_vm6, %v3810_v42, %v999_v43  ;;  %v3814_v42 = vrot.slane %v870_v35, 9 }
  0x86   : > { %801 = vst.msk [vmem:[#allocation2 + $0x14] sm:$0xf] %vm795_vm7, %v710_v56  ;;  %v996_v56 = vsel %vm4518_vm6, %v994_v46, %v995_v47  ;;  %v1023_v46 = vrot.slane %v869_v37, 5  ;;  %v227_v47 = vld [vmem:[%s4332_s19 + $0xa8] sm:$0xf] }
  0x87   : > { %260 = vst.msk [vmem:[#allocation2 + $0x70] sm:$0xf] %vm231_vm5, %v227_v47 }
  0x8a   : > { %1061 = vrot.lane.b32.xlu1 %v968_v57, %s4281_s21  ;;  %v863_v57 = vld [vmem:[%s4332_s19 + $0x8c] sm:$0x1] }
  0x8b   : > { %1059 = vrot.lane.b32.xlu0 %v965_v58, %s4281_s21  ;;  %1057 = vrot.lane.b32.xlu2 %v961_v63, %s4281_s21  ;;  %v861_v58 = vld [vmem:[%s4332_s19 + $0x84] sm:$0xe]  ;;  %v1009_v62 = vrot.slane %v863_v57, 5  ;;  %v222_v63 = vld [vmem:[%s4332_s19 + $0x88] sm:$0xf] }
  0x8c   : > { %v704_v5 = vpop.permute.xlu1 %703  ;;  %v3811_v2 = vrot.slane %v861_v58, 9  ;;  %255 = vst.msk [vmem:[#allocation2 + $0x5c] sm:$0xf] %vm231_vm5, %v222_v63  ;;  %v1037_v58 = vrot.slane %v875_v53, 5  ;;  %v229_v63 = vld [vmem:[%s4332_s19 + $0xb4] sm:$0xf] }
  0x8d   : > { %798 = vst.msk [vmem:[#allocation2 + $0x8] sm:$0xf] %vm795_vm7, %v704_v5  ;;  %v700_v9 = vpop.permute.xlu0 %699  ;;  %v716_v12 = vpop.permute.xlu2 %715  ;;  %v1001_v5 = vrot.slane %v999_v43, 4  ;;  %v1010_v10 = vsel %vm4518_vm6, %v1008_v61, %v1009_v62  ;;  %v874_v43 = vld [vmem:[%s4332_s19 + $0xb8] sm:$0xf] }
  0x8e   : > { %796 = vst.msk [vmem:[#allocation2] sm:$0xf] %vm795_vm7, %v700_v9  ;;  %v220_v9 = vld [vmem:[%s4332_s19 + $0x7c] sm:$0xf]  ;;  %v230_v61 = vld [vmem:[%s4332_s19 + $0xb8] sm:$0xf] }
  0x8f   : > { %804 = vst.msk [vmem:[#allocation2 + $0x20] sm:$0xf] %vm795_vm7, %v716_v12  ;;  %v1007_v12 = vsel %vm4518_vm6, %v3811_v2, %v1006_v55  ;;  %v873_v55 = vld [vmem:[%s4332_s19 + $0xb4] sm:$0xe]  ;;  %v3849_v53 = vld [vmem:[%s4332_s19 + $0x10] sm:$0xf] }
  0x90   : > { %253 = vst.msk [vmem:[#allocation2 + $0x54] sm:$0xf] %vm231_vm5, %v220_v9  ;;  %v3815_v60 = vrot.slane %v873_v55, 9  ;;  %v3817_v9 = vld [vmem:[%s4332_s19 + $0x10] sm:$0xf] }
  0x91   : > { %263 = vst.msk [vmem:[#allocation2 + $0x7c] sm:$0xf] %vm231_vm5, %v230_v61  ;;  %v3842_v61 = vld [vmem:[%s4332_s19 + $0xa8] sm:$0xf] }
  0x92   : > { %1067 = vrot.lane.b32.xlu1 %v979_v14, %s4281_s21  ;;  %v1013_v14 = vrot.slane %v865_v3, 5  ;;  %262 = vst.msk [vmem:[#allocation2 + $0x78] sm:$0xf] %vm231_vm5, %v229_v63 }
  0x93   : > { %1065 = vrot.lane.b32.xlu0 %v975_v16, %s4281_s21  ;;  %1063 = vrot.lane.b32.xlu2 %v972_v19, %s4281_s21  ;;  %v1003_v16 = vsel %vm4518_vm6, %v1001_v5, %v1002_v6  ;;  %v1020_v19 = vrot.slane %v868_v13, 5  ;;  %v3822_v13 = vld [vmem:[%s4332_s19 + $0x30] sm:$0xf] }
  0x94   : > { %v706_v24 = vpop.permute.xlu1 %705  ;;  %v1015_v22 = vrot.slane %v1013_v14, 4 }
  0x95   : > { %799 = vst.msk [vmem:[#allocation2 + $0xc] sm:$0xf] %vm795_vm7, %v706_v24  ;;  %v702_v28 = vpop.permute.xlu0 %701  ;;  %v722_v32 = vpop.permute.xlu2 %721  ;;  %v871_v24 = vld [vmem:[%s4332_s19 + $0xac] sm:$0xf]  ;;  %v1021_v31 = vsel %vm4518_vm6, %v3813_v18, %v1020_v19 }
  0x96   : > { %797 = vst.msk [vmem:[#allocation2 + $0x4] sm:$0xf] %vm795_vm7, %v702_v28  ;;  %v224_v28 = vld [vmem:[%s4332_s19 + $0x94] sm:$0xf]  ;;  %v1017_v33 = vsel %vm4518_vm6, %v1015_v22, %v1016_v23 }
  0x97   : > { %807 = vst.msk [vmem:[#allocation2 + $0x2c] sm:$0xf] %vm795_vm7, %v722_v32  ;;  %v1027_v32 = vrot.slane %v871_v24, 5 }
  0x98   : > { %257 = vst.msk [vmem:[#allocation2 + $0x64] sm:$0xf] %vm231_vm5, %v224_v28  ;;  %v3826_v28 = vld [vmem:[%s4332_s19 + $0x48] sm:$0xf] }
  0x99   : > { %v1029_v38 = vrot.slane %v1027_v32, 4  ;;  %v1028_v51 = vsel %vm4518_vm6, %v3814_v42, %v1027_v32  ;;  %v3831_v32 = vld [vmem:[%s4332_s19 + $0x64] sm:$0xf] }
  0x9a   : > { %1073 = vrot.lane.b32.xlu1 %v989_v34, %s4281_s21  ;;  %v872_v34 = vld [vmem:[%s4332_s19 + $0xb0] sm:$0x1] }
  0x9b   : > { %1071 = vrot.lane.b32.xlu0 %v986_v36, %s4281_s21  ;;  %1069 = vrot.lane.b32.xlu2 %v982_v40, %s4281_s21  ;;  %v1014_v36 = vsel %vm4518_vm6, %v3812_v27, %v1013_v14  ;;  %v1030_v39 = vrot.slane %v872_v34, 5  ;;  %v228_v40 = vld [vmem:[%s4332_s19 + $0xac] sm:$0xf]  ;;  %v3821_v14 = vld [vmem:[%s4332_s19 + $0x28] sm:$0xf] }
  0x9c   : > { %v714_v45 = vpop.permute.xlu1 %713  ;;  %261 = vst.msk [vmem:[#allocation2 + $0x74] sm:$0xf] %vm231_vm5, %v228_v40  ;;  %v3827_v27 = vld [vmem:[%s4332_s19 + $0x4c] sm:$0xf]  ;;  %v3829_v34 = vld [vmem:[%s4332_s19 + $0x58] sm:$0xf] }
  0x9d   : > { %803 = vst.msk [vmem:[#allocation2 + $0x1c] sm:$0xf] %vm795_vm7, %v714_v45  ;;  %v712_v49 = vpop.permute.xlu0 %711  ;;  %v728_v52 = vpop.permute.xlu2 %727  ;;  %v1022_v45 = vrot.slane %v1020_v19, 4  ;;  %v1031_v50 = vsel %vm4518_vm6, %v1029_v38, %v1030_v39  ;;  %v3825_v19 = vld [vmem:[%s4332_s19 + $0x40] sm:$0xf] }
  0x9e   : > { %802 = vst.msk [vmem:[#allocation2 + $0x18] sm:$0xf] %vm795_vm7, %v712_v49  ;;  %v226_v49 = vld [vmem:[%s4332_s19 + $0xa0] sm:$0xf]  ;;  %v3834_v38 = vld [vmem:[%s4332_s19 + $0x78] sm:$0xf] }
  0x9f   : > { %810 = vst.msk [vmem:[#allocation2 + $0x38] sm:$0xf] %vm795_vm7, %v728_v52  ;;  %v1034_v52 = vrot.slane %v874_v43, 5  ;;  %v3833_v39 = vld [vmem:[%s4332_s19 + $0x70] sm:$0xf] }
  0xa0   : > { %259 = vst.msk [vmem:[#allocation2 + $0x6c] sm:$0xf] %vm231_vm5, %v226_v49  ;;  %v3832_v40 = vld [vmem:[%s4332_s19 + $0x6c] sm:$0xf] }
  0xa1   : > { %v1036_v57 = vrot.slane %v1034_v52, 4  ;;  %v1035_v3 = vsel %vm4518_vm6, %v3815_v60, %v1034_v52  ;;  %v3838_v52 = vld [vmem:[%s4332_s19 + $0x90] sm:$0xf]  ;;  %v3843_v60 = vld [vmem:[%s4332_s19 + $0xac] sm:$0xf] }
  0xa2   : > { %1079 = vrot.lane.b32.xlu1 %v1000_v54, %s4281_s21  ;;  %v1024_v54 = vsel %vm4518_vm6, %v1022_v45, %v1023_v46  ;;  %v3836_v45 = vld [vmem:[%s4332_s19 + $0x84] sm:$0xf]  ;;  %v3835_v46 = vld [vmem:[%s4332_s19 + $0x7c] sm:$0xf] }
  0xa3   : > { %1077 = vrot.lane.b32.xlu0 %v996_v56, %s4281_s21  ;;  %1075 = vrot.lane.b32.xlu2 %v993_v59, %s4281_s21  ;;  %v1038_v2 = vsel %vm4518_vm6, %v1036_v57, %v1037_v58  ;;  %v1423_v58 = vshll.u32 %v3849_v53, 16 }
  0xa4   : > { %v720_v0 = vpop.permute.xlu1 %719 }
  0xa5   : > { %806 = vst.msk [vmem:[#allocation2 + $0x28] sm:$0xf] %vm795_vm7, %v720_v0  ;;  %v718_v4 = vpop.permute.xlu0 %717  ;;  %v734_v8 = vpop.permute.xlu2 %733  ;;  %v3816_v0 = vld [vmem:[%s4332_s19 + $0xc] sm:$0xf] }
  0xa6   : > { %805 = vst.msk [vmem:[#allocation2 + $0x24] sm:$0xf] %vm795_vm7, %v718_v4 }
  0xa7   : > { %813 = vst.msk [vmem:[#allocation2 + $0x44] sm:$0xf] %vm795_vm7, %v734_v8  ;;  %v3818_v8 = vld [vmem:[%s4332_s19 + $0x18] sm:$0xf] }
  0xaa   : > { %1085 = vrot.lane.b32.xlu1 %v1010_v10, %s4281_s21 }
  0xab   : > { %1083 = vrot.lane.b32.xlu0 %v1007_v12, %s4281_s21  ;;  %1081 = vrot.lane.b32.xlu2 %v1003_v16, %s4281_s21 }
  0xac   : > { %v726_v21 = vpop.permute.xlu1 %725 }
  0xad   : > { %809 = vst.msk [vmem:[#allocation2 + $0x34] sm:$0xf] %vm795_vm7, %v726_v21  ;;  %v724_v26 = vpop.permute.xlu0 %723  ;;  %v740_v29 = vpop.permute.xlu2 %739  ;;  %v3823_v21 = vld [vmem:[%s4332_s19 + $0x34] sm:$0xf] }
  0xae   : > { %808 = vst.msk [vmem:[#allocation2 + $0x30] sm:$0xf] %vm795_vm7, %v724_v26  ;;  %v3828_v26 = vld [vmem:[%s4332_s19 + $0x54] sm:$0xf] }
  0xaf   : > { %816 = vst.msk [vmem:[#allocation2 + $0x50] sm:$0xf] %vm795_vm7, %v740_v29 }
  0xb2   : > { %1091 = vrot.lane.b32.xlu1 %v1021_v31, %s4281_s21 }
  0xb3   : > { %1089 = vrot.lane.b32.xlu0 %v1017_v33, %s4281_s21  ;;  %1087 = vrot.lane.b32.xlu2 %v1014_v36, %s4281_s21  ;;  %v3830_v33 = vld [vmem:[%s4332_s19 + $0x60] sm:$0xf] }
  0xb4   : > { %v732_v41 = vpop.permute.xlu1 %731 }
  0xb5   : > { %812 = vst.msk [vmem:[#allocation2 + $0x40] sm:$0xf] %vm795_vm7, %v732_v41  ;;  %v730_v44 = vpop.permute.xlu0 %729  ;;  %v746_v48 = vpop.permute.xlu2 %745 }
  0xb6   : > { %811 = vst.msk [vmem:[#allocation2 + $0x3c] sm:$0xf] %vm795_vm7, %v730_v44  ;;  %v3837_v44 = vld [vmem:[%s4332_s19 + $0x88] sm:$0xf] }
  0xb7   : > { %819 = vst.msk [vmem:[#allocation2 + $0x5c] sm:$0xf] %vm795_vm7, %v746_v48 }
  0xba   : > { %1097 = vrot.lane.b32.xlu1 %v1031_v50, %s4281_s21  ;;  %v3840_v50 = vld [vmem:[%s4332_s19 + $0x9c] sm:$0xf] }
  0xbb   : > { %1095 = vrot.lane.b32.xlu0 %v1028_v51, %s4281_s21  ;;  %1093 = vrot.lane.b32.xlu2 %v1024_v54, %s4281_s21  ;;  %v3839_v51 = vld [vmem:[%s4332_s19 + $0x94] sm:$0xf] }
  0xbc   : > { %v738_v56 = vpop.permute.xlu1 %737 }
  0xbd   : > { %815 = vst.msk [vmem:[#allocation2 + $0x4c] sm:$0xf] %vm795_vm7, %v738_v56  ;;  %v736_v59 = vpop.permute.xlu0 %735  ;;  %v752_v62 = vpop.permute.xlu2 %751  ;;  %v3848_v56 = vld [vmem:[%s4332_s19 + $0xc] sm:$0xf] }
  0xbe   : > { %814 = vst.msk [vmem:[#allocation2 + $0x48] sm:$0xf] %vm795_vm7, %v736_v59  ;;  %v1427_v59 = vshrl.u32 %v3849_v53, 16  ;;  %v1417_v63 = vshll.u32 %v3848_v56, 16  ;;  %v3847_v53 = vld [vmem:[%s4332_s19 + $0xc4] sm:$0xf] }
  0xbf   : > { %822 = vst.msk [vmem:[#allocation2 + $0x68] sm:$0xf] %vm795_vm7, %v752_v62  ;;  %v1414_v62 = vshrl.u32 %v3848_v56, 16 }
  0xc2   : > { %1236 = vrot.lane.b32.xlu1 %v3816_v0, %s4282_s22  ;;  %v3841_v0 = vld [vmem:[%s4332_s19 + $0xa0] sm:$0xf] }
  0xc3   : > { %1101 = vrot.lane.b32.xlu0 %v1038_v2, %s4281_s21  ;;  %1099 = vrot.lane.b32.xlu2 %v1035_v3, %s4281_s21  ;;  %v4830_v2 = vrot.slane %v1423_v58, 5  ;;  %v1429_v3 = vrot.slane %v1427_v59, 4 }
  0xc4   : > { %v744_v4 = vpop.permute.xlu1 %743 }
  0xc5   : > { %818 = vst.msk [vmem:[#allocation2 + $0x58] sm:$0xf] %vm795_vm7, %v744_v4  ;;  %v742_v5 = vpop.permute.xlu0 %741  ;;  %v758_v6 = vpop.permute.xlu2 %757  ;;  %v3850_v4 = vld [vmem:[%s4332_s19 + $0x14] sm:$0x1] }
  0xc6   : > { %817 = vst.msk [vmem:[#allocation2 + $0x54] sm:$0xf] %vm795_vm7, %v742_v5 }
  0xc7   : > { %825 = vst.msk [vmem:[#allocation2 + $0x74] sm:$0xf] %vm795_vm7, %v758_v6  ;;  %v1416_v6 = vrot.slane %v1414_v62, 4  ;;  %v3863_v62 = vld [vmem:[%s4332_s19 + $0x48] sm:$0xf] }
  0xca   : > { %1242 = vrot.lane.b32.xlu1 %v3819_v7, %s4282_s22  ;;  %v1419_v7 = vrot.slane %v1417_v63, 5 }
  0xcb   : > { %1240 = vrot.lane.b32.xlu0 %v3818_v8, %s4282_s22  ;;  %1238 = vrot.lane.b32.xlu2 %v3817_v9, %s4282_s22  ;;  %v3854_v8 = vld [vmem:[%s4332_s19 + $0x24] sm:$0xf] }
  0xcc   : > { %v750_v10 = vpop.permute.xlu1 %749 }
  0xcd   : > { %821 = vst.msk [vmem:[#allocation2 + $0x64] sm:$0xf] %vm795_vm7, %v750_v10  ;;  %v748_v11 = vpop.permute.xlu0 %747  ;;  %v1040_v12 = vpop.permute.xlu2 %1039  ;;  %v3852_v10 = vld [vmem:[%s4332_s19 + $0x1c] sm:$0xf] }
  0xce   : > { %820 = vst.msk [vmem:[#allocation2 + $0x60] sm:$0xf] %vm795_vm7, %v748_v11  ;;  %v1430_v11 = vor.u32 %v1429_v3, %v4830_v2  ;;  %v3861_v3 = vld [vmem:[%s4332_s19 + $0x40] sm:$0xf] }
  0xcf   : > { %1136 = vst.msk [vmem:[#allocation2] sm:$0xf] %vm1135_vm8, %v1040_v12  ;;  %v1433_v12 = vshll.u32 %v3850_v4, 16 }
  0xd2   : > { %1248 = vrot.lane.b32.xlu1 %v3822_v13, %s4282_s22 }
  0xd3   : > { %1246 = vrot.lane.b32.xlu0 %v3821_v14, %s4282_s22  ;;  %1244 = vrot.lane.b32.xlu2 %v3820_v15, %s4282_s22  ;;  %v3851_v14 = vld [vmem:[%s4332_s19 + $0x18] sm:$0xf]  ;;  %v3846_v15 = vld [vmem:[%s4332_s19 + $0xc0] sm:$0xf] }
  0xd4   : > { %v756_v16 = vpop.permute.xlu1 %755 }
  0xd5   : > { %824 = vst.msk [vmem:[#allocation2 + $0x70] sm:$0xf] %vm795_vm7, %v756_v16  ;;  %v754_v17 = vpop.permute.xlu0 %753  ;;  %v1046_v18 = vpop.permute.xlu2 %1045  ;;  %v1462_v16 = vshrl.u32 %v3854_v8, 16 }
  0xd6   : > { %823 = vst.msk [vmem:[#allocation2 + $0x6c] sm:$0xf] %vm795_vm7, %v754_v17  ;;  %v1465_v17 = vshll.u32 %v3854_v8, 16 }
  0xd7   : > { %1139 = vst.msk [vmem:[#allocation2 + $0xc] sm:$0xf] %vm1135_vm8, %v1046_v18  ;;  %v3845_v18 = vld [vmem:[%s4332_s19 + $0xb8] sm:$0xf] }
  0xda   : > { %1254 = vrot.lane.b32.xlu1 %v3825_v19, %s4282_s22  ;;  %v1420_v19 = vor.u32 %v1419_v7, %v1416_v6  ;;  %v3860_v7 = vld [vmem:[%s4332_s19 + $0x3c] sm:$0xf] }
  0xdb   : > { %1252 = vrot.lane.b32.xlu0 %v3824_v20, %s4282_s22  ;;  %1250 = vrot.lane.b32.xlu2 %v3823_v21, %s4282_s22  ;;  %v1447_v20 = vshll.u32 %v3852_v10, 16  ;;  %v1451_v21 = vshrl.u32 %v3852_v10, 16 }
  0xdc   : > { %v762_v22 = vpop.permute.xlu1 %761 }
  0xdd   : > { %827 = vst.msk [vmem:[#allocation2 + $0x7c] sm:$0xf] %vm795_vm7, %v762_v22  ;;  %v760_v23 = vpop.permute.xlu0 %759  ;;  %v1052_v24 = vpop.permute.xlu2 %1051  ;;  %v3844_v22 = vld [vmem:[%s4332_s19 + $0xb4] sm:$0xf] }
  0xde   : > { %826 = vst.msk [vmem:[#allocation2 + $0x78] sm:$0xf] %vm795_vm7, %v760_v23  ;;  %v1438_v23 = vshrl.u32 %v3851_v14, 16 }
  0xdf   : > { %1142 = vst.msk [vmem:[#allocation2 + $0x18] sm:$0xf] %vm1135_vm8, %v1052_v24  ;;  %v1441_v24 = vshll.u32 %v3851_v14, 16 }
  0xe2   : > { %1260 = vrot.lane.b32.xlu1 %v3828_v26, %s4282_s22  ;;  %v1431_v26 = vrot.slane %v1430_v11, 4 }
  0xe3   : > { %1258 = vrot.lane.b32.xlu0 %v3827_v27, %s4282_s22  ;;  %1256 = vrot.lane.b32.xlu2 %v3826_v28, %s4282_s22  ;;  %v1435_v27 = vrot.slane %v1433_v12, 5  ;;  %v1464_v28 = vrot.slane %v1462_v16, 4  ;;  %v1534_v12 = vshrl.u32 %v3863_v62, 16  ;;  %v1519_v16 = vshll.u32 %v3861_v3, 16 }
  0xe4   : > { %v1044_v29 = vpop.permute.xlu1 %1043 }
  0xe5   : > { %1138 = vst.msk [vmem:[#allocation2 + $0x8] sm:$0xf] %vm1135_vm8, %v1044_v29  ;;  %v1042_v30 = vpop.permute.xlu0 %1041  ;;  %v1058_v31 = vpop.permute.xlu2 %1057  ;;  %v1467_v29 = vrot.slane %v1465_v17, 5  ;;  %v1523_v17 = vshrl.u32 %v3861_v3, 16 }
  0xe6   : > { %1137 = vst.msk [vmem:[#allocation2 + $0x4] sm:$0xf] %vm1135_vm8, %v1042_v30  ;;  %v3858_v30 = vld [vmem:[%s4332_s19 + $0x34] sm:$0xf] }
  0xe7   : > { %1145 = vst.msk [vmem:[#allocation2 + $0x24] sm:$0xf] %vm1135_vm8, %v1058_v31  ;;  %v3857_v31 = vld [vmem:[%s4332_s19 + $0x30] sm:$0xf] }
  0xea   : > { %1266 = vrot.lane.b32.xlu1 %v3831_v32, %s4282_s22 }
  0xeb   : > { %1264 = vrot.lane.b32.xlu0 %v3830_v33, %s4282_s22  ;;  %1262 = vrot.lane.b32.xlu2 %v3829_v34, %s4282_s22  ;;  %v1421_v33 = vrot.slane %v1420_v19, 4  ;;  %v3855_v34 = vld [vmem:[%s4332_s19 + $0x28] sm:$0xf]  ;;  %v3867_v19 = vld [vmem:[%s4332_s19 + $0x58] sm:$0xf] }
  0xec   : > { %v1050_v35 = vpop.permute.xlu1 %1049 }
  0xed   : > { %1141 = vst.msk [vmem:[#allocation2 + $0x14] sm:$0xf] %vm1135_vm8, %v1050_v35  ;;  %v1048_v36 = vpop.permute.xlu0 %1047  ;;  %v1064_v37 = vpop.permute.xlu2 %1063  ;;  %v4851_v35 = vrot.slane %v1447_v20, 5  ;;  %v1510_v20 = vshrl.u32 %v3860_v7, 16 }
  0xee   : > { %1140 = vst.msk [vmem:[#allocation2 + $0x10] sm:$0xf] %vm1135_vm8, %v1048_v36  ;;  %v1453_v36 = vrot.slane %v1451_v21, 4  ;;  %v1513_v21 = vshll.u32 %v3860_v7, 16  ;;  %v3870_v7 = vld [vmem:[%s4332_s19 + $0x64] sm:$0xf] }
  0xef   : > { %1148 = vst.msk [vmem:[#allocation2 + $0x30] sm:$0xf] %vm1135_vm8, %v1064_v37 }
  0xf2   : > { %1272 = vrot.lane.b32.xlu1 %v3834_v38, %s4282_s22  ;;  %v3853_v38 = vld [vmem:[%s4332_s19 + $0x20] sm:$0x1] }
  0xf3   : > { %1270 = vrot.lane.b32.xlu0 %v3833_v39, %s4282_s22  ;;  %1268 = vrot.lane.b32.xlu2 %v3832_v40, %s4282_s22  ;;  %v1440_v39 = vrot.slane %v1438_v23, 4  ;;  %v1443_v40 = vrot.slane %v1441_v24, 5 }
  0xf4   : > { %v1056_v41 = vpop.permute.xlu1 %1055 }
  0xf5   : > { %1144 = vst.msk [vmem:[#allocation2 + $0x20] sm:$0xf] %vm1135_vm8, %v1056_v41  ;;  %v1054_v42 = vpop.permute.xlu0 %1053  ;;  %v1070_v43 = vpop.permute.xlu2 %1069 }
  0xf6   : > { %1143 = vst.msk [vmem:[#allocation2 + $0x1c] sm:$0xf] %vm1135_vm8, %v1054_v42  ;;  %v1495_v42 = vshll.u32 %v3858_v30, 16 }
  0xf7   : > { %1151 = vst.msk [vmem:[#allocation2 + $0x3c] sm:$0xf] %vm1135_vm8, %v1070_v43  ;;  %v1499_v43 = vshrl.u32 %v3858_v30, 16  ;;  %v1536_v30 = vrot.slane %v1534_v12, 4 }
  0xf9   : > { %v1501_v56 = vrot.slane %v1499_v43, 4 }
  0xfa   : > { %1278 = vrot.lane.b32.xlu1 %v3837_v44, %s4282_s22  ;;  %v1486_v44 = vshrl.u32 %v3857_v31, 16 }
  0xfb   : > { %1276 = vrot.lane.b32.xlu0 %v3836_v45, %s4282_s22  ;;  %1274 = vrot.lane.b32.xlu2 %v3835_v46, %s4282_s22  ;;  %v1489_v45 = vshll.u32 %v3857_v31, 16  ;;  %v1436_v46 = vsel %vm4343_vm2, %v1431_v26, %v1435_v27 }
  0xfc   : > { %v1062_v47 = vpop.permute.xlu1 %1061 }
  0xfd   : > { %1147 = vst.msk [vmem:[#allocation2 + $0x2c] sm:$0xf] %vm1135_vm8, %v1062_v47  ;;  %v1060_v48 = vpop.permute.xlu0 %1059  ;;  %v1076_v49 = vpop.permute.xlu2 %1075  ;;  %v1468_v47 = vor.u32 %v1467_v29, %v1464_v28  ;;  %v1491_v58 = vrot.slane %v1489_v45, 5  ;;  %v3864_v29 = vld [vmem:[%s4332_s19 + $0x4c] sm:$0xf] }
  0xfe   : > { %1146 = vst.msk [vmem:[#allocation2 + $0x28] sm:$0xf] %vm1135_vm8, %v1060_v48  ;;  %v1471_v48 = vshll.u32 %v3855_v34, 16 }
  0xff   : > { %1154 = vst.msk [vmem:[#allocation2 + $0x48] sm:$0xf] %vm1135_vm8, %v1076_v49  ;;  %v1426_v49 = vsel %vm4343_vm2, %v1421_v33, %v4830_v2  ;;  %v1469_v59 = vrot.slane %v1468_v47, 4  ;;  %v4890_v33 = vrot.slane %v1519_v16, 5 }
 0x102   : > { %1284 = vrot.lane.b32.xlu1 %v3840_v50, %s4282_s22  ;;  %v1454_v50 = vor.u32 %v1453_v36, %v4851_v35  ;;  %v1567_v36 = vshll.u32 %v3867_v19, 16 }
 0x103   : > { %1282 = vrot.lane.b32.xlu0 %v3839_v51, %s4282_s22  ;;  %1280 = vrot.lane.b32.xlu2 %v3838_v52, %s4282_s22  ;;  %v1457_v51 = vshll.u32 %v3853_v38, 16  ;;  %v1475_v52 = vshrl.u32 %v3855_v34, 16  ;;  %v1525_v34 = vrot.slane %v1523_v17, 4  ;;  %v3866_v38 = vld [vmem:[%s4332_s19 + $0x54] sm:$0xf]  ;;  %v1591_v17 = vshll.u32 %v3870_v7, 16 }
 0x104   : > { %v1068_v54 = vpop.permute.xlu1 %1067 }
 0x105   : > { %1150 = vst.msk [vmem:[#allocation2 + $0x38] sm:$0xf] %vm1135_vm8, %v1068_v54  ;;  %v1066_v55 = vpop.permute.xlu0 %1065  ;;  %v1082_v57 = vpop.permute.xlu2 %1081  ;;  %v1444_v54 = vor.u32 %v1443_v40, %v1440_v39  ;;  %v1459_v2 = vrot.slane %v1457_v51, 5  ;;  %v1477_v6 = vrot.slane %v1475_v52, 4  ;;  %v1512_v39 = vrot.slane %v1510_v20, 4 }
 0x106   : > { %1149 = vst.msk [vmem:[#allocation2 + $0x34] sm:$0xf] %vm1135_vm8, %v1066_v55  ;;  %v4865_v55 = vrot.slane %v1495_v42, 5  ;;  %v1515_v40 = vrot.slane %v1513_v21, 5  ;;  %v1558_v51 = vshrl.u32 %v3866_v38, 16  ;;  %v4903_v52 = vrot.slane %v1567_v36, 5 }
 0x107   : > { %1157 = vst.msk [vmem:[#allocation2 + $0x54] sm:$0xf] %vm1135_vm8, %v1082_v57  ;;  %v1488_v57 = vrot.slane %v1486_v44, 4 }
 0x108   : > { %v1502_v8 = vor.u32 %v1501_v56, %v4865_v55  ;;  %v1516_v56 = vor.u32 %v1515_v40, %v1512_v39 }
 0x109   : > { %v1492_v10 = vor.u32 %v1491_v58, %v1488_v57  ;;  %v1547_v57 = vshrl.u32 %v3864_v29, 16 }
 0x10a   : > { %1290 = vrot.lane.b32.xlu1 %v3843_v60, %s4282_s22  ;;  %v1473_v60 = vrot.slane %v1471_v48, 5  ;;  %v1503_v26 = vrot.slane %v1502_v8, 4 }
 0x10b   : > { %1288 = vrot.lane.b32.xlu0 %v3842_v61, %s4282_s22  ;;  %1286 = vrot.lane.b32.xlu2 %v3841_v0, %s4282_s22  ;;  %v3859_v61 = vld [vmem:[%s4332_s19 + $0x38] sm:$0x1]  ;;  %v1455_v0 = vrot.slane %v1454_v50, 4  ;;  %v1493_v28 = vrot.slane %v1492_v10, 4 }
 0x10c   : > { %v1074_v5 = vpop.permute.xlu1 %1073  ;;  %v1474_v14 = vsel %vm4343_vm2, %v1469_v59, %v1473_v60  ;;  %v1478_v23 = vor.u32 %v1477_v6, %v1473_v60  ;;  %v3872_v60 = vld [vmem:[%s4332_s19 + $0x6c] sm:$0xf]  ;;  %v1517_v6 = vrot.slane %v1516_v56, 4 }
 0x10d   : > { %1153 = vst.msk [vmem:[#allocation2 + $0x44] sm:$0xf] %vm1135_vm8, %v1074_v5  ;;  %v1072_v9 = vpop.permute.xlu0 %1071  ;;  %v1088_v13 = vpop.permute.xlu2 %1087  ;;  %v1445_v5 = vrot.slane %v1444_v54, 4  ;;  %v1498_v45 = vsel %vm4343_vm2, %v1493_v28, %v4865_v55  ;;  %v1561_v54 = vshll.u32 %v3866_v38, 16  ;;  %v3868_v55 = vld [vmem:[%s4332_s19 + $0x5c] sm:$0x1] }
 0x10e   : > { %1152 = vst.msk [vmem:[#allocation2 + $0x40] sm:$0xf] %vm1135_vm8, %v1072_v9  ;;  %v1505_v9 = vshll.u32 %v3859_v61, 16  ;;  %v1479_v42 = vrot.slane %v1478_v23, 4  ;;  %v1609_v10 = vshll.u32 %v3872_v60, 16 }
 0x10f   : > { %1160 = vst.msk [vmem:[#allocation2 + $0x60] sm:$0xf] %vm1135_vm8, %v1088_v13  ;;  %v3856_v13 = vld [vmem:[%s4332_s19 + $0x2c] sm:$0x1]  ;;  %v3871_v38 = vld [vmem:[%s4332_s19 + $0x68] sm:$0x1] }
 0x110   : > { %v1481_v24 = vshll.u32 %v3856_v13, 16  ;;  %v1507_v27 = vrot.slane %v1505_v9, 5  ;;  %v1606_v9 = vshrl.u32 %v3872_v60, 16  ;;  %v3865_v13 = vld [vmem:[%s4332_s19 + $0x50] sm:$0x1] }
 0x112   : > { %1296 = vrot.lane.b32.xlu1 %v3846_v15, %s4282_s22  ;;  %v1537_v15 = vshll.u32 %v3863_v62, 16  ;;  %v1483_v43 = vrot.slane %v1481_v24, 5  ;;  %v1508_v44 = vsel %vm4343_vm2, %v1503_v26, %v1507_v27  ;;  %v1553_v24 = vshll.u32 %v3865_v13, 16 }
 0x113   : > { %1294 = vrot.lane.b32.xlu0 %v3845_v18, %s4282_s22  ;;  %1292 = vrot.lane.b32.xlu2 %v3844_v22, %s4282_s22  ;;  %v1460_v18 = vsel %vm4343_vm2, %v1455_v0, %v1459_v2  ;;  %v1450_v22 = vsel %vm4343_vm2, %v1445_v5, %v4851_v35  ;;  %v1571_v35 = vshrl.u32 %v3867_v19, 16  ;;  %v1560_v0 = vrot.slane %v1558_v51, 4 }
 0x114   : > { %v1080_v32 = vpop.permute.xlu1 %1079  ;;  %v1539_v31 = vrot.slane %v1537_v15, 5  ;;  %v1484_v58 = vsel %vm4343_vm2, %v1479_v42, %v1483_v43  ;;  %v1563_v5 = vrot.slane %v1561_v54, 5  ;;  %v1608_v28 = vrot.slane %v1606_v9, 4  ;;  %v3878_v9 = vld [vmem:[%s4332_s19 + $0x84] sm:$0xf] }
 0x115   : > { %1156 = vst.msk [vmem:[#allocation2 + $0x50] sm:$0xf] %vm1135_vm8, %v1080_v32  ;;  %v1078_v37 = vpop.permute.xlu0 %1077  ;;  %v1094_v41 = vpop.permute.xlu2 %1093  ;;  %v3862_v32 = vld [vmem:[%s4332_s19 + $0x44] sm:$0x1] }
 0x116   : > { %1155 = vst.msk [vmem:[#allocation2 + $0x4c] sm:$0xf] %vm1135_vm8, %v1078_v37  ;;  %v1540_v48 = vor.u32 %v1539_v31, %v1536_v30  ;;  %v1529_v50 = vshll.u32 %v3862_v32, 16  ;;  %v1564_v21 = vor.u32 %v1563_v5, %v1560_v0  ;;  %v4928_v30 = vrot.slane %v1591_v17, 5  ;;  %v3876_v32 = vld [vmem:[%s4332_s19 + $0x7c] sm:$0xf] }
 0x117   : > { %1163 = vst.msk [vmem:[#allocation2 + $0x6c] sm:$0xf] %vm1135_vm8, %v1094_v41  ;;  %v3879_v5 = vld [vmem:[%s4332_s19 + $0x88] sm:$0xf] }
 0x118   : > { %v1541_v61 = vrot.slane %v1540_v48, 4 }
 0x11a   : > { %1799 = vrot.lane.b32.xlu1 %v1436_v46, %s4283_s23  ;;  %v1543_v46 = vshll.u32 %v3864_v29, 16  ;;  %v1611_v29 = vrot.slane %v1609_v10, 5 }
 0x11b   : > { %1797 = vrot.lane.b32.xlu0 %v1426_v49, %s4283_s23  ;;  %1298 = vrot.lane.b32.xlu2 %v3847_v53, %s4282_s22  ;;  %v1526_v49 = vor.u32 %v1525_v34, %v4890_v33  ;;  %v1573_v53 = vrot.slane %v1571_v35, 4  ;;  %v3875_v34 = vld [vmem:[%s4332_s19 + $0x78] sm:$0xf]  ;;  %v3873_v35 = vld [vmem:[%s4332_s19 + $0x70] sm:$0xf] }
 0x11c   : > { %v1086_v63 = vpop.permute.xlu1 %1085  ;;  %v1545_v59 = vrot.slane %v1543_v46, 5  ;;  %v1643_v46 = vshrl.u32 %v3876_v32, 16  ;;  %v1633_v48 = vshll.u32 %v3875_v34, 16  ;;  %v1619_v56 = vshrl.u32 %v3873_v35, 16 }
 0x11d   : > { %1159 = vst.msk [vmem:[#allocation2 + $0x5c] sm:$0xf] %vm1135_vm8, %v1086_v63  ;;  %v1084_v4 = vpop.permute.xlu0 %1083  ;;  %v1100_v11 = vpop.permute.xlu2 %1099  ;;  %v1527_v62 = vrot.slane %v1526_v49, 4  ;;  %v1531_v63 = vrot.slane %v1529_v50, 5  ;;  %v1574_v3 = vor.u32 %v1573_v53, %v4903_v52  ;;  %v1612_v49 = vor.u32 %v1611_v29, %v1608_v28 }
 0x11e   : > { %1158 = vst.msk [vmem:[#allocation2 + $0x58] sm:$0xf] %vm1135_vm8, %v1084_v4  ;;  %v1577_v4 = vshll.u32 %v3868_v55, 16  ;;  %v1546_v15 = vsel %vm4343_vm2, %v1541_v61, %v1545_v59  ;;  %v1615_v50 = vshll.u32 %v3873_v35, 16  ;;  %v1601_v53 = vshll.u32 %v3871_v38, 16 }
 0x11f   : > { %1166 = vst.msk [vmem:[#allocation2 + $0x78] sm:$0xf] %vm1135_vm8, %v1100_v11  ;;  %v1549_v11 = vrot.slane %v1547_v57, 4  ;;  %v1532_v16 = vsel %vm4343_vm2, %v1527_v62, %v1531_v63  ;;  %v1575_v19 = vrot.slane %v1574_v3, 4  ;;  %v1635_v61 = vrot.slane %v1633_v48, 5 }
 0x120   : > { %v1579_v20 = vrot.slane %v1577_v4, 5  ;;  %v1613_v62 = vrot.slane %v1612_v49, 4  ;;  %v1617_v63 = vrot.slane %v1615_v50, 5  ;;  %v1603_v0 = vrot.slane %v1601_v53, 5  ;;  %v3881_v4 = vld [vmem:[%s4332_s19 + $0x90] sm:$0xf] }
 0x121   : > { %v1550_v23 = vor.u32 %v1549_v11, %v1545_v59  ;;  %v1645_v59 = vrot.slane %v1643_v46, 4  ;;  %v1678_v17 = vshrl.u32 %v3881_v4, 16 }
 0x122   : > { %1805 = vrot.lane.b32.xlu1 %v1474_v14, %s4283_s23  ;;  %v3869_v14 = vld [vmem:[%s4332_s19 + $0x60] sm:$0xf] }
 0x123   : > { %1803 = vrot.lane.b32.xlu0 %v1460_v18, %s4283_s23  ;;  %1801 = vrot.lane.b32.xlu2 %v1450_v22, %s4283_s23  ;;  %v1595_v18 = vshrl.u32 %v3870_v7, 16  ;;  %v1522_v22 = vsel %vm4343_vm2, %v1517_v6, %v4890_v33  ;;  %v1582_v26 = vshrl.u32 %v3869_v14, 16  ;;  %v1585_v27 = vshll.u32 %v3869_v14, 16  ;;  %v3874_v14 = vld [vmem:[%s4332_s19 + $0x74] sm:$0x1] }
 0x124   : > { %v1092_v37 = vpop.permute.xlu1 %1091  ;;  %v1580_v33 = vsel %vm4343_vm2, %v1575_v19, %v1579_v20  ;;  %v1551_v40 = vrot.slane %v1550_v23, 4  ;;  %v1663_v19 = vshll.u32 %v3879_v5, 16  ;;  %v1667_v20 = vshrl.u32 %v3879_v5, 16 }
 0x125   : > { %1162 = vst.msk [vmem:[#allocation2 + $0x68] sm:$0xf] %vm1135_vm8, %v1092_v37  ;;  %v1090_v41 = vpop.permute.xlu0 %1089  ;;  %v1239_v47 = vpop.permute.xlu2 %1238  ;;  %v1597_v31 = vrot.slane %v1595_v18, 4  ;;  %v1565_v37 = vrot.slane %v1564_v21, 4  ;;  %v1584_v42 = vrot.slane %v1582_v26, 4  ;;  %v1587_v43 = vrot.slane %v1585_v27, 5 }
 0x126   : > { %1161 = vst.msk [vmem:[#allocation2 + $0x64] sm:$0xf] %vm1135_vm8, %v1090_v41  ;;  %v1555_v41 = vrot.slane %v1553_v24, 5  ;;  %v1681_v18 = vshll.u32 %v3881_v4, 16  ;;  %v1654_v21 = vshrl.u32 %v3878_v9, 16  ;;  %v1625_v26 = vshll.u32 %v3874_v14, 16 }
 0x127   : > { %1334 = vst.msk [vmem:[#allocation2 + $0x4] sm:$0xf] %vm1332_vm9, %v1239_v47  ;;  %v1630_v47 = vshrl.u32 %v3875_v34, 16  ;;  %v1598_v51 = vor.u32 %v1597_v31, %v4928_v30  ;;  %v1570_v54 = vsel %vm4343_vm2, %v1565_v37, %v4903_v52  ;;  %v1680_v31 = vrot.slane %v1678_v17, 4  ;;  %v3885_v34 = vld [vmem:[%s4332_s19 + $0xa0] sm:$0xf] }
 0x128   : > { %v1556_v57 = vsel %vm4343_vm2, %v1551_v40, %v1555_v41  ;;  %v3882_v37 = vld [vmem:[%s4332_s19 + $0x94] sm:$0xf]  ;;  %v4973_v35 = vrot.slane %v1663_v19, 5  ;;  %v1656_v38 = vrot.slane %v1654_v21, 4  ;;  %v3880_v41 = vld [vmem:[%s4332_s19 + $0x8c] sm:$0x1] }
 0x129   : > { %v1632_v60 = vrot.slane %v1630_v47, 4  ;;  %v1599_v52 = vrot.slane %v1598_v51, 4  ;;  %v1715_v46 = vshrl.u32 %v3885_v34, 16  ;;  %v1687_v51 = vshll.u32 %v3882_v37, 16  ;;  %v3883_v14 = vld [vmem:[%s4332_s19 + $0x98] sm:$0x1] }
 0x12a   : > { %1811 = vrot.lane.b32.xlu1 %v1508_v44, %s4283_s23 }
 0x12b   : > { %1809 = vrot.lane.b32.xlu0 %v1498_v45, %s4283_s23  ;;  %1807 = vrot.lane.b32.xlu2 %v1484_v58, %s4283_s23  ;;  %v1639_v45 = vshll.u32 %v3876_v32, 16  ;;  %v1588_v58 = vor.u32 %v1587_v43, %v1584_v42  ;;  %v1683_v32 = vrot.slane %v1681_v18, 5  ;;  %v1627_v43 = vrot.slane %v1625_v26, 5 }
 0x12c   : > { %v1098_v2 = vpop.permute.xlu1 %1097 }
 0x12d   : > { %1165 = vst.msk [vmem:[#allocation2 + $0x74] sm:$0xf] %vm1135_vm8, %v1098_v2  ;;  %v1096_v8 = vpop.permute.xlu0 %1095  ;;  %v1245_v12 = vpop.permute.xlu2 %1244  ;;  %v4947_v55 = vrot.slane %v1639_v45, 5  ;;  %v3877_v2 = vld [vmem:[%s4332_s19 + $0x80] sm:$0x1]  ;;  %v1589_v7 = vrot.slane %v1588_v58, 4  ;;  %v1684_v50 = vor.u32 %v1683_v32, %v1680_v31 }
 0x12e   : > { %1164 = vst.msk [vmem:[#allocation2 + $0x70] sm:$0xf] %vm1135_vm8, %v1096_v8  ;;  %v1621_v8 = vrot.slane %v1619_v56, 4  ;;  %v1649_v11 = vshll.u32 %v3877_v2, 16  ;;  %v1711_v45 = vshll.u32 %v3885_v34, 16  ;;  %v1673_v56 = vshll.u32 %v3880_v41, 16 }
 0x12f   : > { %1337 = vst.msk [vmem:[#allocation2 + $0x10] sm:$0xf] %vm1332_vm9, %v1245_v12  ;;  %v1646_v10 = vor.u32 %v1645_v59, %v4947_v55  ;;  %v1636_v12 = vor.u32 %v1635_v61, %v1632_v60  ;;  %v1594_v23 = vsel %vm4343_vm2, %v1589_v7, %v4928_v30  ;;  %v1669_v30 = vrot.slane %v1667_v20, 4  ;;  %v3886_v60 = vld [vmem:[%s4332_s19 + $0xa4] sm:$0x1] }
 0x130   : > { %v1622_v24 = vor.u32 %v1621_v8, %v1617_v63  ;;  %v1651_v28 = vrot.slane %v1649_v11, 5  ;;  %v1691_v58 = vshrl.u32 %v3882_v37, 16  ;;  %v4989_v61 = vrot.slane %v1711_v45, 5  ;;  %v3891_v32 = vld [vmem:[%s4332_s19 + $0xb8] sm:$0xf] }
 0x131   : > { %v1647_v27 = vrot.slane %v1646_v10, 4  ;;  %v1637_v29 = vrot.slane %v1636_v12, 4  ;;  %v1675_v4 = vrot.slane %v1673_v56, 5  ;;  %v1721_v8 = vshll.u32 %v3886_v60, 16 }
 0x132   : > { %1817 = vrot.lane.b32.xlu1 %v1546_v15, %s4283_s23  ;;  %v1618_v15 = vsel %vm4343_vm2, %v1613_v62, %v1617_v63  ;;  %v1623_v42 = vrot.slane %v1622_v24, 4  ;;  %v1717_v62 = vrot.slane %v1715_v46, 4  ;;  %v1693_v10 = vrot.slane %v1691_v58, 4 }
 0x133   : > { %1815 = vrot.lane.b32.xlu0 %v1532_v16, %s4283_s23  ;;  %1813 = vrot.lane.b32.xlu2 %v1522_v22, %s4283_s23  ;;  %v1604_v16 = vsel %vm4343_vm2, %v1599_v52, %v1603_v0  ;;  %v1657_v22 = vshll.u32 %v3878_v9, 16  ;;  %v1652_v49 = vsel %vm4343_vm2, %v1647_v27, %v1651_v28  ;;  %v1642_v53 = vsel %vm4343_vm2, %v1637_v29, %v4947_v55  ;;  %v3888_v9 = vld [vmem:[%s4332_s19 + $0xac] sm:$0xf] }
 0x134   : > { %v1237_v36 = vpop.permute.xlu1 %1236  ;;  %v1628_v59 = vsel %vm4343_vm2, %v1623_v42, %v1627_v43  ;;  %v1685_v55 = vrot.slane %v1684_v50, 4  ;;  %v1689_v0 = vrot.slane %v1687_v51, 5  ;;  %v1718_v11 = vor.u32 %v1717_v62, %v4989_v61 }
 0x135   : > { %1333 = vst.msk [vmem:[#allocation2] sm:$0xf] %vm1332_vm9, %v1237_v36  ;;  %v1102_v39 = vpop.permute.xlu0 %1101  ;;  %v1251_v44 = vpop.permute.xlu2 %1250  ;;  %v3884_v36 = vld [vmem:[%s4332_s19 + $0x9c] sm:$0xf]  ;;  %v1735_v21 = vshll.u32 %v3888_v9, 16  ;;  %v1697_v24 = vshll.u32 %v3883_v14, 16 }
 0x136   : > { %1167 = vst.msk [vmem:[#allocation2 + $0x7c] sm:$0xf] %vm1135_vm8, %v1102_v39  ;;  %v1659_v39 = vrot.slane %v1657_v22, 5  ;;  %v1702_v47 = vshrl.u32 %v3884_v36, 16  ;;  %v1705_v48 = vshll.u32 %v3884_v36, 16  ;;  %v1739_v22 = vshrl.u32 %v3888_v9, 16 }
 0x137   : > { %1340 = vst.msk [vmem:[#allocation2 + $0x1c] sm:$0xf] %vm1332_vm9, %v1251_v44  ;;  %v1719_v28 = vrot.slane %v1718_v11, 4  ;;  %v1723_v29 = vrot.slane %v1721_v8, 5  ;;  %v1699_v42 = vrot.slane %v1697_v24, 5  ;;  %v1763_v58 = vshrl.u32 %v3891_v32, 16 }
 0x138   : > { %v1704_v63 = vrot.slane %v1702_v47, 4  ;;  %v1707_v52 = vrot.slane %v1705_v48, 5  ;;  %v3897_v24 = vld [vmem:[%s4332_s19 + $0x10] sm:$0xf] }
 0x139   : > { %v1724_v45 = vsel %vm4343_vm2, %v1719_v28, %v1723_v29  ;;  %v1765_v8 = vrot.slane %v1763_v58, 4 }
 0x13a   : > { %1823 = vrot.lane.b32.xlu1 %v1580_v33, %s4283_s23  ;;  %v1708_v12 = vor.u32 %v1707_v52, %v1704_v63 }
 0x13b   : > { %1821 = vrot.lane.b32.xlu0 %v1570_v54, %s4283_s23  ;;  %1819 = vrot.lane.b32.xlu2 %v1556_v57, %s4283_s23  ;;  %v1670_v54 = vor.u32 %v1669_v30, %v4973_v35  ;;  %v1660_v57 = vor.u32 %v1659_v39, %v1656_v38  ;;  %v1741_v30 = vrot.slane %v1739_v22, 4  ;;  %v3894_v38 = vld [vmem:[%s4332_s19 + $0xc4] sm:$0xf]  ;;  %v3893_v39 = vld [vmem:[%s4332_s19 + $0xc0] sm:$0xf] }
 0x13c   : > { %v1243_v3 = vpop.permute.xlu1 %1242  ;;  %v1709_v31 = vrot.slane %v1708_v12, 4  ;;  %v1783_v50 = vshll.u32 %v3894_v38, 16  ;;  %v1787_v51 = vshrl.u32 %v3894_v38, 16  ;;  %v1774_v56 = vshrl.u32 %v3893_v39, 16 }
 0x13d   : > { %1336 = vst.msk [vmem:[#allocation2 + $0xc] sm:$0xf] %vm1332_vm9, %v1243_v3  ;;  %v1241_v6 = vpop.permute.xlu0 %1240  ;;  %v1257_v13 = vpop.permute.xlu2 %1256  ;;  %v1671_v3 = vrot.slane %v1670_v54, 4  ;;  %v1661_v5 = vrot.slane %v1660_v57, 4  ;;  %v1777_v57 = vshll.u32 %v3893_v39, 16 }
 0x13e   : > { %1335 = vst.msk [vmem:[#allocation2 + $0x8] sm:$0xf] %vm1332_vm9, %v1241_v6  ;;  %v3890_v6 = vld [vmem:[%s4332_s19 + $0xb4] sm:$0xf]  ;;  %v1714_v46 = vsel %vm4343_vm2, %v1709_v31, %v4989_v61  ;;  %v1785_v63 = vrot.slane %v1783_v50, 5  ;;  %v1789_v52 = vrot.slane %v1787_v51, 4 }
 0x13f   : > { %1343 = vst.msk [vmem:[#allocation2 + $0x28] sm:$0xf] %vm1332_vm9, %v1257_v13  ;;  %v1750_v17 = vshrl.u32 %v3890_v6, 16  ;;  %v1753_v18 = vshll.u32 %v3890_v6, 16  ;;  %v1676_v19 = vsel %vm4343_vm2, %v1671_v3, %v1675_v4  ;;  %v1666_v20 = vsel %vm4343_vm2, %v1661_v5, %v4973_v35  ;;  %v3895_v3 = vld [vmem:[%s4332_s19 + $0xc8] sm:$0x1] }
 0x140   : > { %v1737_v35 = vrot.slane %v1735_v21, 5  ;;  %v1776_v4 = vrot.slane %v1774_v56, 4  ;;  %v1779_v5 = vrot.slane %v1777_v57, 5  ;;  %v1790_v12 = vor.u32 %v1789_v52, %v1785_v63  ;;  %v3902_v50 = vld [vmem:[%s4332_s19 + $0x24] sm:$0xe] }
 0x141   : > { %v1752_v34 = vrot.slane %v1750_v17, 4  ;;  %v1755_v36 = vrot.slane %v1753_v18, 5  ;;  %v3946_v58 = vrot.slane %v3902_v50, 9 }
 0x142   : > { %1829 = vrot.lane.b32.xlu1 %v1618_v15, %s4283_s23  ;;  %v3887_v15 = vld [vmem:[%s4332_s19 + $0xa8] sm:$0xf] }
 0x143   : > { %1827 = vrot.lane.b32.xlu0 %v1604_v16, %s4283_s23  ;;  %1825 = vrot.lane.b32.xlu2 %v1594_v23, %s4283_s23  ;;  %v1690_v16 = vsel %vm4343_vm2, %v1685_v55, %v1689_v0  ;;  %v1694_v23 = vor.u32 %v1693_v10, %v1689_v0  ;;  %v1726_v26 = vshrl.u32 %v3887_v15, 16  ;;  %v1729_v27 = vshll.u32 %v3887_v15, 16  ;;  %v3892_v10 = vld [vmem:[%s4332_s19 + $0xbc] sm:$0x1] }
 0x144   : > { %v1249_v33 = vpop.permute.xlu1 %1248  ;;  %v1756_v48 = vor.u32 %v1755_v36, %v1752_v34  ;;  %v1780_v15 = vor.u32 %v1779_v5, %v1776_v4  ;;  %v1769_v18 = vshll.u32 %v3892_v10, 16  ;;  %v3900_v34 = vld [vmem:[%s4332_s19 + $0x1c] sm:$0xf]  ;;  %v2024_v36 = vrot.slane %v3897_v24, 5  ;;  %v3907_v4 = vld [vmem:[%s4332_s19 + $0x38] sm:$0x1] }
 0x145   : > { %1339 = vst.msk [vmem:[#allocation2 + $0x18] sm:$0xf] %vm1332_vm9, %v1249_v33  ;;  %v1247_v40 = vpop.permute.xlu0 %1246  ;;  %v1263_v44 = vpop.permute.xlu2 %1262  ;;  %v3889_v33 = vld [vmem:[%s4332_s19 + $0xb0] sm:$0x1]  ;;  %v1695_v41 = vrot.slane %v1694_v23, 4  ;;  %v1728_v43 = vrot.slane %v1726_v26, 4 }
 0x146   : > { %1338 = vst.msk [vmem:[#allocation2 + $0x14] sm:$0xf] %vm1332_vm9, %v1247_v40  ;;  %v1745_v54 = vshll.u32 %v3889_v33, 16  ;;  %v1757_v61 = vrot.slane %v1756_v48, 4  ;;  %v1781_v22 = vrot.slane %v1780_v15, 4  ;;  %v2031_v38 = vrot.slane %v3900_v34, 5 }
 0x147   : > { %1346 = vst.msk [vmem:[#allocation2 + $0x34] sm:$0xf] %vm1332_vm9, %v1263_v44  ;;  %v1731_v44 = vrot.slane %v1729_v27, 5  ;;  %v1771_v27 = vrot.slane %v1769_v18, 5  ;;  %v3898_v33 = vld [vmem:[%s4332_s19 + $0x14] sm:$0x1] }
 0x148   : > { %v1786_v31 = vsel %vm4343_vm2, %v1781_v22, %v1785_v63  ;;  %v3910_v22 = vld [vmem:[%s4332_s19 + $0x44] sm:$0x1] }
 0x149   : > { %v1732_v60 = vor.u32 %v1731_v44, %v1728_v43 }
 0x14a   : > { %1835 = vrot.lane.b32.xlu1 %v1652_v49, %s4283_s23  ;;  %v1759_v49 = vshll.u32 %v3891_v32, 16  ;;  %v3899_v32 = vld [vmem:[%s4332_s19 + $0x18] sm:$0xe] }
 0x14b   : > { %1833 = vrot.lane.b32.xlu0 %v1642_v53, %s4283_s23  ;;  %1831 = vrot.lane.b32.xlu2 %v1628_v59, %s4283_s23  ;;  %v1742_v53 = vor.u32 %v1741_v30, %v1737_v35  ;;  %v1700_v59 = vsel %vm4343_vm2, %v1695_v41, %v1699_v42  ;;  %v3945_v30 = vrot.slane %v3899_v32, 9  ;;  %v2027_v41 = vrot.slane %v3898_v33, 5  ;;  %v3903_v42 = vld [vmem:[%s4332_s19 + $0x28] sm:$0xf] }
 0x14c   : > { %v1255_v2 = vpop.permute.xlu1 %1254  ;;  %v1761_v62 = vrot.slane %v1759_v49, 5  ;;  %v3904_v49 = vld [vmem:[%s4332_s19 + $0x2c] sm:$0x1]  ;;  %v2055_v32 = vrot.slane %v3910_v22, 5 }
 0x14d   : > { %1342 = vst.msk [vmem:[#allocation2 + $0x24] sm:$0xf] %vm1332_vm9, %v1255_v2  ;;  %v1253_v7 = vpop.permute.xlu0 %1252  ;;  %v1269_v13 = vpop.permute.xlu2 %1268  ;;  %v1743_v0 = vrot.slane %v1742_v53, 4  ;;  %v1747_v2 = vrot.slane %v1745_v54, 5  ;;  %v3901_v53 = vld [vmem:[%s4332_s19 + $0x20] sm:$0x1] }
 0x14e   : > { %1341 = vst.msk [vmem:[#allocation2 + $0x20] sm:$0xf] %vm1332_vm9, %v1253_v7  ;;  %v1733_v7 = vrot.slane %v1732_v60, 4  ;;  %v1762_v11 = vsel %vm4343_vm2, %v1757_v61, %v1761_v62  ;;  %v1766_v17 = vor.u32 %v1765_v8, %v1761_v62  ;;  %v2041_v56 = vrot.slane %v3904_v49, 5  ;;  %v3906_v60 = vld [vmem:[%s4332_s19 + $0x34] sm:$0xf] }
 0x14f   : > { %1349 = vst.msk [vmem:[#allocation2 + $0x40] sm:$0xf] %vm1332_vm9, %v1269_v13  ;;  %v1793_v13 = vshll.u32 %v3895_v3, 16  ;;  %v1748_v14 = vsel %vm4343_vm2, %v1743_v0, %v1747_v2  ;;  %v2033_v61 = vrot.slane %v2031_v38, 4  ;;  %v2034_v62 = vrot.slane %v3901_v53, 5 }
 0x150   : > { %v1767_v26 = vrot.slane %v1766_v17, 4  ;;  %v3908_v0 = vld [vmem:[%s4332_s19 + $0x3c] sm:$0xe]  ;;  %v3909_v2 = vld [vmem:[%s4332_s19 + $0x40] sm:$0xf]  ;;  %v2045_v3 = vrot.slane %v3906_v60, 5 }
 0x151   : > { %v2035_v5 = vsel %vm4518_vm6, %v2033_v61, %v2034_v62  ;;  %v2052_v8 = vrot.slane %v3909_v2, 5 }
 0x152   : > { %1841 = vrot.lane.b32.xlu1 %v1690_v16, %s4283_s23  ;;  %v1738_v16 = vsel %vm4343_vm2, %v1733_v7, %v1737_v35  ;;  %v3896_v35 = vld [vmem:[%s4332_s19 + $0xc] sm:$0xe]  ;;  %v3948_v7 = vrot.slane %v3908_v0, 9  ;;  %v2047_v10 = vrot.slane %v2045_v3, 4 }
 0x153   : > { %1839 = vrot.lane.b32.xlu0 %v1676_v19, %s4283_s23  ;;  %1837 = vrot.lane.b32.xlu2 %v1666_v20, %s4283_s23  ;;  %v1791_v19 = vrot.slane %v1790_v12, 4  ;;  %v1795_v20 = vrot.slane %v1793_v13, 5  ;;  %v3944_v44 = vrot.slane %v3896_v35, 9  ;;  %v3912_v12 = vld [vmem:[%s4332_s19 + $0x4c] sm:$0xf] }
 0x154   : > { %v1261_v37 = vpop.permute.xlu1 %1260  ;;  %v2059_v17 = vrot.slane %v3912_v12, 5  ;;  %v3918_v35 = vld [vmem:[%s4332_s19 + $0x64] sm:$0xf] }
 0x155   : > { %1345 = vst.msk [vmem:[#allocation2 + $0x30] sm:$0xf] %vm1332_vm9, %v1261_v37  ;;  %v1259_v40 = vpop.permute.xlu0 %1258  ;;  %v1275_v47 = vpop.permute.xlu2 %1274  ;;  %v1796_v29 = vsel %vm4343_vm2, %v1791_v19, %v1795_v20  ;;  %v1772_v37 = vsel %vm4343_vm2, %v1767_v26, %v1771_v27  ;;  %v2025_v51 = vsel %vm4518_vm6, %v3944_v44, %v2024_v36  ;;  %v3913_v19 = vld [vmem:[%s4332_s19 + $0x50] sm:$0x1]  ;;  %v3911_v20 = vld [vmem:[%s4332_s19 + $0x48] sm:$0xe] }
 0x156   : > { %1344 = vst.msk [vmem:[#allocation2 + $0x2c] sm:$0xf] %vm1332_vm9, %v1259_v40  ;;  %v2026_v40 = vrot.slane %v2024_v36, 4  ;;  %v2062_v24 = vrot.slane %v3913_v19, 5  ;;  %v3949_v27 = vrot.slane %v3911_v20, 9 }
 0x157   : > { %1352 = vst.msk [vmem:[#allocation2 + $0x4c] sm:$0xf] %vm1332_vm9, %v1275_v47  ;;  %v2038_v47 = vrot.slane %v3903_v42, 5  ;;  %v2073_v42 = vrot.slane %v3918_v35, 5 }
 0x158   : > { %v2028_v48 = vsel %vm4518_vm6, %v2026_v40, %v2027_v41  ;;  %v2060_v33 = vsel %vm4518_vm6, %v3949_v27, %v2059_v17  ;;  %v3914_v40 = vld [vmem:[%s4332_s19 + $0x54] sm:$0xe]  ;;  %v3928_v27 = vld [vmem:[%s4332_s19 + $0x8c] sm:$0x1] }
 0x159   : > { %v2040_v54 = vrot.slane %v2038_v47, 4 }
 0x15a   : > { %1847 = vrot.lane.b32.xlu1 %v1724_v45, %s4283_s23 }
 0x15b   : > { %1845 = vrot.lane.b32.xlu0 %v1714_v46, %s4283_s23  ;;  %1843 = vrot.lane.b32.xlu2 %v1700_v59, %s4283_s23  ;;  %v2032_v46 = vsel %vm4518_vm6, %v3945_v30, %v2031_v38  ;;  %v2042_v52 = vsel %vm4518_vm6, %v2040_v54, %v2041_v56  ;;  %v3916_v38 = vld [vmem:[%s4332_s19 + $0x5c] sm:$0x1]  ;;  %v3922_v54 = vld [vmem:[%s4332_s19 + $0x74] sm:$0x1] }
 0x15c   : > { %v1267_v55 = vpop.permute.xlu1 %1266  ;;  %v3920_v56 = vld [vmem:[%s4332_s19 + $0x6c] sm:$0xe]  ;;  %v2083_v60 = vrot.slane %v3922_v54, 5 }
 0x15d   : > { %1348 = vst.msk [vmem:[#allocation2 + $0x3c] sm:$0xf] %vm1332_vm9, %v1267_v55  ;;  %v1265_v6 = vpop.permute.xlu0 %1264  ;;  %v1281_v9 = vpop.permute.xlu2 %1280  ;;  %v2039_v55 = vsel %vm4518_vm6, %v3946_v58, %v2038_v47  ;;  %v3919_v58 = vld [vmem:[%s4332_s19 + $0x68] sm:$0x1]  ;;  %v3952_v62 = vrot.slane %v3920_v56, 9 }
 0x15e   : > { %1347 = vst.msk [vmem:[#allocation2 + $0x38] sm:$0xf] %vm1332_vm9, %v1265_v6  ;;  %v3905_v6 = vld [vmem:[%s4332_s19 + $0x30] sm:$0xe]  ;;  %v2076_v0 = vrot.slane %v3919_v58, 5 }
 0x15f   : > { %1355 = vst.msk [vmem:[#allocation2 + $0x58] sm:$0xf] %vm1332_vm9, %v1281_v9 }
 0x162   : > { %1853 = vrot.lane.b32.xlu1 %v1762_v11, %s4283_s23  ;;  %v2048_v11 = vrot.slane %v3907_v4, 5 }
 0x163   : > { %1851 = vrot.lane.b32.xlu0 %v1748_v14, %s4283_s23  ;;  %1849 = vrot.lane.b32.xlu2 %v1738_v16, %s4283_s23  ;;  %v3947_v14 = vrot.slane %v3905_v6, 9  ;;  %v2053_v16 = vsel %vm4518_vm6, %v3948_v7, %v2052_v8  ;;  %v3927_v6 = vld [vmem:[%s4332_s19 + $0x88] sm:$0xf] }
 0x164   : > { %v1273_v21 = vpop.permute.xlu1 %1272  ;;  %v2049_v18 = vsel %vm4518_vm6, %v2047_v10, %v2048_v11  ;;  %v3923_v10 = vld [vmem:[%s4332_s19 + $0x78] sm:$0xe]  ;;  %v2094_v12 = vrot.slane %v3927_v6, 5 }
 0x165   : > { %1351 = vst.msk [vmem:[#allocation2 + $0x48] sm:$0xf] %vm1332_vm9, %v1273_v21  ;;  %v1271_v23 = vpop.permute.xlu0 %1270  ;;  %v1287_v28 = vpop.permute.xlu2 %1286  ;;  %v2046_v21 = vsel %vm4518_vm6, %v3947_v14, %v2045_v3 }
 0x166   : > { %1350 = vst.msk [vmem:[#allocation2 + $0x44] sm:$0xf] %vm1332_vm9, %v1271_v23  ;;  %v2061_v23 = vrot.slane %v2059_v17, 4 }
 0x167   : > { %1358 = vst.msk [vmem:[#allocation2 + $0x64] sm:$0xf] %vm1332_vm9, %v1287_v28 }
 0x168   : > { %v2063_v36 = vsel %vm4518_vm6, %v2061_v23, %v2062_v24  ;;  %v3931_v23 = vld [vmem:[%s4332_s19 + $0x98] sm:$0x1]  ;;  %v3929_v24 = vld [vmem:[%s4332_s19 + $0x90] sm:$0xe] }
 0x16a   : > { %1859 = vrot.lane.b32.xlu1 %v1796_v29, %s4283_s23  ;;  %v3915_v29 = vld [vmem:[%s4332_s19 + $0x58] sm:$0xf] }
 0x16b   : > { %1857 = vrot.lane.b32.xlu0 %v1786_v31, %s4283_s23  ;;  %1855 = vrot.lane.b32.xlu2 %v1772_v37, %s4283_s23  ;;  %v2054_v31 = vrot.slane %v2052_v8, 4  ;;  %v3917_v37 = vld [vmem:[%s4332_s19 + $0x60] sm:$0xe]  ;;  %v2066_v30 = vrot.slane %v3915_v29, 5  ;;  %v3925_v8 = vld [vmem:[%s4332_s19 + $0x80] sm:$0x1] }
 0x16c   : > { %v1279_v39 = vpop.permute.xlu1 %1278  ;;  %v3951_v41 = vrot.slane %v3917_v37, 9  ;;  %v2104_v29 = vrot.slane %v3931_v23, 5  ;;  %v2097_v37 = vrot.slane %v3928_v27, 5  ;;  %v3962_v27 = vld [vmem:[%s4332_s19 + $0x24] sm:$0xf] }
 0x16d   : > { %1354 = vst.msk [vmem:[#allocation2 + $0x54] sm:$0xf] %vm1332_vm9, %v1279_v39  ;;  %v1277_v43 = vpop.permute.xlu0 %1276  ;;  %v1293_v45 = vpop.permute.xlu2 %1292  ;;  %v2056_v39 = vsel %vm4518_vm6, %v2054_v31, %v2055_v32  ;;  %v2068_v44 = vrot.slane %v2066_v30, 4  ;;  %v3955_v32 = vrot.slane %v3929_v24, 9 }
 0x16e   : > { %1353 = vst.msk [vmem:[#allocation2 + $0x50] sm:$0xf] %vm1332_vm9, %v1277_v43  ;;  %v2074_v50 = vsel %vm4518_vm6, %v3951_v41, %v2073_v42 }
 0x16f   : > { %1361 = vst.msk [vmem:[#allocation2 + $0x70] sm:$0xf] %vm1332_vm9, %v1293_v45  ;;  %v2069_v45 = vrot.slane %v3916_v38, 5 }
 0x171   : > { %v2070_v53 = vsel %vm4518_vm6, %v2068_v44, %v2069_v45  ;;  %v3932_v44 = vld [vmem:[%s4332_s19 + $0x9c] sm:$0xe] }
 0x172   : > { %2138 = vrot.lane.b32.xlu1 %v2032_v46, %s4284_s24  ;;  %v3921_v46 = vld [vmem:[%s4332_s19 + $0x70] sm:$0xf] }
 0x173   : > { %2136 = vrot.lane.b32.xlu0 %v2028_v48, %s4284_s24  ;;  %2134 = vrot.lane.b32.xlu2 %v2025_v51, %s4284_s24  ;;  %v3950_v48 = vrot.slane %v3914_v40, 9  ;;  %v2080_v51 = vrot.slane %v3921_v46, 5  ;;  %v3936_v40 = vld [vmem:[%s4332_s19 + $0xac] sm:$0xf] }
 0x174   : > { %v1285_v57 = vpop.permute.xlu1 %1284  ;;  %v2115_v46 = vrot.slane %v3936_v40, 5  ;;  %v3967_v40 = vld [vmem:[%s4332_s19 + $0x40] sm:$0xf] }
 0x175   : > { %1357 = vst.msk [vmem:[#allocation2 + $0x60] sm:$0xf] %vm1332_vm9, %v1285_v57  ;;  %v1283_v59 = vpop.permute.xlu0 %1282  ;;  %v1299_v63 = vpop.permute.xlu2 %1298  ;;  %v2067_v57 = vsel %vm4518_vm6, %v3950_v48, %v2066_v30  ;;  %v2081_v4 = vsel %vm4518_vm6, %v3952_v62, %v2080_v51  ;;  %v3937_v62 = vld [vmem:[%s4332_s19 + $0xb0] sm:$0x1] }
 0x176   : > { %1356 = vst.msk [vmem:[#allocation2 + $0x5c] sm:$0xf] %vm1332_vm9, %v1283_v59  ;;  %v2082_v59 = vrot.slane %v2080_v51, 4 }
 0x177   : > { %1364 = vst.msk [vmem:[#allocation2 + $0x7c] sm:$0xf] %vm1332_vm9, %v1299_v63 }
 0x178   : > { %v2084_v3 = vsel %vm4518_vm6, %v2082_v59, %v2083_v60  ;;  %v3940_v59 = vld [vmem:[%s4332_s19 + $0xbc] sm:$0x1]  ;;  %v3938_v60 = vld [vmem:[%s4332_s19 + $0xb4] sm:$0xe] }
 0x17a   : > { %2144 = vrot.lane.b32.xlu1 %v2042_v52, %s4284_s24  ;;  %v3924_v52 = vld [vmem:[%s4332_s19 + $0x7c] sm:$0xf] }
 0x17b   : > { %2142 = vrot.lane.b32.xlu0 %v2039_v55, %s4284_s24  ;;  %2140 = vrot.lane.b32.xlu2 %v2035_v5, %s4284_s24  ;;  %v2075_v55 = vrot.slane %v2073_v42, 4  ;;  %v3926_v5 = vld [vmem:[%s4332_s19 + $0x84] sm:$0xe]  ;;  %v2087_v7 = vrot.slane %v3924_v52, 5  ;;  %v3934_v42 = vld [vmem:[%s4332_s19 + $0xa4] sm:$0x1] }
 0x17c   : > { %v1291_v9 = vpop.permute.xlu1 %1290  ;;  %v3954_v11 = vrot.slane %v3926_v5, 9  ;;  %v2125_v52 = vrot.slane %v3940_v59, 5  ;;  %v2118_v5 = vrot.slane %v3937_v62, 5 }
 0x17d   : > { %1360 = vst.msk [vmem:[#allocation2 + $0x6c] sm:$0xf] %vm1332_vm9, %v1291_v9  ;;  %v1289_v13 = vpop.permute.xlu0 %1288  ;;  %v1802_v15 = vpop.permute.xlu2 %1801  ;;  %v2077_v9 = vsel %vm4518_vm6, %v2075_v55, %v2076_v0  ;;  %v2089_v14 = vrot.slane %v2087_v7, 4  ;;  %v3958_v0 = vrot.slane %v3938_v60, 9 }
 0x17e   : > { %1359 = vst.msk [vmem:[#allocation2 + $0x68] sm:$0xf] %vm1332_vm9, %v1289_v13  ;;  %v2095_v20 = vsel %vm4518_vm6, %v3954_v11, %v2094_v12 }
 0x17f   : > { %1896 = vst.msk [vmem:[#allocation2 + $0x8] sm:$0xf] %vm1893_vm10, %v1802_v15  ;;  %v2090_v15 = vrot.slane %v3925_v8, 5 }
 0x181   : > { %v2091_v22 = vsel %vm4518_vm6, %v2089_v14, %v2090_v15 }
 0x182   : > { %2150 = vrot.lane.b32.xlu1 %v2053_v16, %s4284_s24  ;;  %v3930_v16 = vld [vmem:[%s4332_s19 + $0x94] sm:$0xf] }
 0x183   : > { %2148 = vrot.lane.b32.xlu0 %v2049_v18, %s4284_s24  ;;  %2146 = vrot.lane.b32.xlu2 %v2046_v21, %s4284_s24  ;;  %v3953_v18 = vrot.slane %v3923_v10, 9  ;;  %v2101_v21 = vrot.slane %v3930_v16, 5  ;;  %v3943_v10 = vld [vmem:[%s4332_s19 + $0xc8] sm:$0x1] }
 0x184   : > { %v1297_v26 = vpop.permute.xlu1 %1296  ;;  %v2132_v15 = vrot.slane %v3943_v10, 5  ;;  %v3985_v10 = vld [vmem:[%s4332_s19 + $0xac] sm:$0xf] }
 0x185   : > { %1363 = vst.msk [vmem:[#allocation2 + $0x78] sm:$0xf] %vm1332_vm9, %v1297_v26  ;;  %v1295_v28 = vpop.permute.xlu0 %1294  ;;  %v1808_v34 = vpop.permute.xlu2 %1807  ;;  %v2088_v26 = vsel %vm4518_vm6, %v3953_v18, %v2087_v7  ;;  %v2102_v38 = vsel %vm4518_vm6, %v3955_v32, %v2101_v21 }
 0x186   : > { %1362 = vst.msk [vmem:[#allocation2 + $0x74] sm:$0xf] %vm1332_vm9, %v1295_v28  ;;  %v2103_v28 = vrot.slane %v2101_v21, 4 }
 0x187   : > { %1899 = vst.msk [vmem:[#allocation2 + $0x14] sm:$0xf] %vm1893_vm10, %v1808_v34 }
 0x188   : > { %v2105_v30 = vsel %vm4518_vm6, %v2103_v28, %v2104_v29  ;;  %v3961_v28 = vld [vmem:[%s4332_s19 + $0x1c] sm:$0xf] }
 0x18a   : > { %2156 = vrot.lane.b32.xlu1 %v2063_v36, %s4284_s24  ;;  %v3933_v36 = vld [vmem:[%s4332_s19 + $0xa0] sm:$0xf] }
 0x18b   : > { %2154 = vrot.lane.b32.xlu0 %v2060_v33, %s4284_s24  ;;  %2152 = vrot.lane.b32.xlu2 %v2056_v39, %s4284_s24  ;;  %v2096_v33 = vrot.slane %v2094_v12, 4  ;;  %v3935_v39 = vld [vmem:[%s4332_s19 + $0xa8] sm:$0xe]  ;;  %v2108_v41 = vrot.slane %v3933_v36, 5  ;;  %v3941_v12 = vld [vmem:[%s4332_s19 + $0xc0] sm:$0xe] }
 0x18c   : > { %v1800_v43 = vpop.permute.xlu1 %1799  ;;  %v3957_v45 = vrot.slane %v3935_v39, 9  ;;  %v3965_v36 = vld [vmem:[%s4332_s19 + $0x34] sm:$0xf]  ;;  %v3968_v39 = vld [vmem:[%s4332_s19 + $0x48] sm:$0xf] }
 0x18d   : > { %1895 = vst.msk [vmem:[#allocation2 + $0x4] sm:$0xf] %vm1893_vm10, %v1800_v43  ;;  %v1798_v47 = vpop.permute.xlu0 %1797  ;;  %v1814_v49 = vpop.permute.xlu2 %1813  ;;  %v2098_v43 = vsel %vm4518_vm6, %v2096_v33, %v2097_v37  ;;  %v2110_v48 = vrot.slane %v2108_v41, 4  ;;  %v3964_v33 = vld [vmem:[%s4332_s19 + $0x30] sm:$0xf] }
 0x18e   : > { %1894 = vst.msk [vmem:[#allocation2] sm:$0xf] %vm1893_vm10, %v1798_v47  ;;  %v2116_v56 = vsel %vm4518_vm6, %v3957_v45, %v2115_v46  ;;  %v3971_v45 = vld [vmem:[%s4332_s19 + $0x58] sm:$0xf] }
 0x18f   : > { %1902 = vst.msk [vmem:[#allocation2 + $0x20] sm:$0xf] %vm1893_vm10, %v1814_v49  ;;  %v2111_v49 = vrot.slane %v3934_v42, 5 }
 0x191   : > { %v2112_v58 = vsel %vm4518_vm6, %v2110_v48, %v2111_v49  ;;  %v4028_v48 = vld [vmem:[%s4332_s19 + $0xa8] sm:$0xf] }
 0x192   : > { %2162 = vrot.lane.b32.xlu1 %v2074_v50, %s4284_s24  ;;  %v3939_v50 = vld [vmem:[%s4332_s19 + $0xb8] sm:$0xf] }
 0x193   : > { %2160 = vrot.lane.b32.xlu0 %v2070_v53, %s4284_s24  ;;  %2158 = vrot.lane.b32.xlu2 %v2067_v57, %s4284_s24  ;;  %v3956_v53 = vrot.slane %v3932_v44, 9  ;;  %v2122_v57 = vrot.slane %v3939_v50, 5  ;;  %v3972_v44 = vld [vmem:[%s4332_s19 + $0x60] sm:$0xf]  ;;  %v4017_v50 = vld [vmem:[%s4332_s19 + $0x7c] sm:$0xf] }
 0x194   : > { %v1806_v61 = vpop.permute.xlu1 %1805  ;;  %v2710_v59 = vshll.u32 %v4017_v50, 16  ;;  %v2714_v60 = vshrl.u32 %v4017_v50, 16  ;;  %v4005_v50 = vld [vmem:[%s4332_s19 + $0x4c] sm:$0xf] }
 0x195   : > { %1898 = vst.msk [vmem:[#allocation2 + $0x10] sm:$0xf] %vm1893_vm10, %v1806_v61  ;;  %v1804_v63 = vpop.permute.xlu0 %1803  ;;  %v1820_v2 = vpop.permute.xlu2 %1819  ;;  %v2109_v61 = vsel %vm4518_vm6, %v3956_v53, %v2108_v41  ;;  %v2123_v8 = vsel %vm4518_vm6, %v3958_v0, %v2122_v57  ;;  %v4016_v53 = vld [vmem:[%s4332_s19 + $0x78] sm:$0xf] }
 0x196   : > { %1897 = vst.msk [vmem:[#allocation2 + $0xc] sm:$0xf] %vm1893_vm10, %v1804_v63  ;;  %v2124_v63 = vrot.slane %v2122_v57, 4  ;;  %v2800_v57 = vshll.u32 %v4028_v48, 16  ;;  %v2701_v62 = vshrl.u32 %v4016_v53, 16 }
 0x197   : > { %1905 = vst.msk [vmem:[#allocation2 + $0x2c] sm:$0xf] %vm1893_vm10, %v1820_v2 }
 0x198   : > { %v2126_v7 = vsel %vm4518_vm6, %v2124_v63, %v2125_v52  ;;  %v2704_v63 = vshll.u32 %v4016_v53, 16 }
 0x19a   : > { %2168 = vrot.lane.b32.xlu1 %v2084_v3, %s4284_s24  ;;  %v3942_v3 = vld [vmem:[%s4332_s19 + $0xc4] sm:$0xf] }
 0x19b   : > { %2166 = vrot.lane.b32.xlu0 %v2081_v4, %s4284_s24  ;;  %2164 = vrot.lane.b32.xlu2 %v2077_v9, %s4284_s24  ;;  %v2117_v4 = vrot.slane %v2115_v46, 4  ;;  %v2129_v9 = vrot.slane %v3942_v3, 5  ;;  %v3970_v46 = vld [vmem:[%s4332_s19 + $0x54] sm:$0xf]  ;;  %v2712_v3 = vrot.slane %v2710_v59, 5 }
 0x19c   : > { %v1812_v13 = vpop.permute.xlu1 %1811 }
 0x19d   : > { %1901 = vst.msk [vmem:[#allocation2 + $0x1c] sm:$0xf] %vm1893_vm10, %v1812_v13  ;;  %v1810_v17 = vpop.permute.xlu0 %1809  ;;  %v1826_v19 = vpop.permute.xlu2 %1825  ;;  %v2119_v11 = vsel %vm4518_vm6, %v2117_v4, %v2118_v5  ;;  %v2131_v14 = vrot.slane %v2129_v9, 4  ;;  %v2716_v4 = vrot.slane %v2714_v60, 4 }
 0x19e   : > { %1900 = vst.msk [vmem:[#allocation2 + $0x18] sm:$0xf] %vm1893_vm10, %v1810_v17  ;;  %v3959_v17 = vrot.slane %v3941_v12, 9 }
 0x19f   : > { %1908 = vst.msk [vmem:[#allocation2 + $0x38] sm:$0xf] %vm1893_vm10, %v1826_v19  ;;  %v3960_v19 = vld [vmem:[%s4332_s19 + $0x18] sm:$0xf] }
 0x1a0   : > { %v2130_v21 = vsel %vm4518_vm6, %v3959_v17, %v2129_v9  ;;  %v3977_v17 = vld [vmem:[%s4332_s19 + $0x7c] sm:$0xf] }
 0x1a2   : > { %2174 = vrot.lane.b32.xlu1 %v2095_v20, %s4284_s24  ;;  %v2133_v20 = vsel %vm4518_vm6, %v2131_v14, %v2132_v15  ;;  %v2717_v14 = vor.u32 %v2716_v4, %v2712_v3 }
 0x1a3   : > { %2172 = vrot.lane.b32.xlu0 %v2091_v22, %s4284_s24  ;;  %2170 = vrot.lane.b32.xlu2 %v2088_v26, %s4284_s24  ;;  %v3963_v26 = vld [vmem:[%s4332_s19 + $0x28] sm:$0xf] }
 0x1a4   : > { %v1818_v31 = vpop.permute.xlu1 %1817 }
 0x1a5   : > { %1904 = vst.msk [vmem:[#allocation2 + $0x28] sm:$0xf] %vm1893_vm10, %v1818_v31  ;;  %v1816_v34 = vpop.permute.xlu0 %1815  ;;  %v1832_v35 = vpop.permute.xlu2 %1831 }
 0x1a6   : > { %1903 = vst.msk [vmem:[#allocation2 + $0x24] sm:$0xf] %vm1893_vm10, %v1816_v34  ;;  %v3966_v34 = vld [vmem:[%s4332_s19 + $0x3c] sm:$0xf] }
 0x1a7   : > { %1911 = vst.msk [vmem:[#allocation2 + $0x44] sm:$0xf] %vm1893_vm10, %v1832_v35 }
 0x1aa   : > { %2180 = vrot.lane.b32.xlu1 %v2105_v30, %s4284_s24 }
 0x1ab   : > { %2178 = vrot.lane.b32.xlu0 %v2102_v38, %s4284_s24  ;;  %2176 = vrot.lane.b32.xlu2 %v2098_v43, %s4284_s24  ;;  %v3969_v38 = vld [vmem:[%s4332_s19 + $0x4c] sm:$0xf] }
 0x1ac   : > { %v1824_v47 = vpop.permute.xlu1 %1823 }
 0x1ad   : > { %1907 = vst.msk [vmem:[#allocation2 + $0x34] sm:$0xf] %vm1893_vm10, %v1824_v47  ;;  %v1822_v51 = vpop.permute.xlu0 %1821  ;;  %v1838_v54 = vpop.permute.xlu2 %1837 }
 0x1ae   : > { %1906 = vst.msk [vmem:[#allocation2 + $0x30] sm:$0xf] %vm1893_vm10, %v1822_v51 }
 0x1af   : > { %1914 = vst.msk [vmem:[#allocation2 + $0x50] sm:$0xf] %vm1893_vm10, %v1838_v54  ;;  %v3976_v54 = vld [vmem:[%s4332_s19 + $0x78] sm:$0xf] }
 0x1b2   : > { %2186 = vrot.lane.b32.xlu1 %v2116_v56, %s4284_s24  ;;  %v2797_v56 = vshrl.u32 %v4028_v48, 16  ;;  %v3993_v48 = vld [vmem:[%s4332_s19 + $0x1c] sm:$0xf] }
 0x1b3   : > { %2184 = vrot.lane.b32.xlu0 %v2112_v58, %s4284_s24  ;;  %2182 = vrot.lane.b32.xlu2 %v2109_v61, %s4284_s24  ;;  %v3974_v58 = vld [vmem:[%s4332_s19 + $0x6c] sm:$0xf]  ;;  %v3973_v61 = vld [vmem:[%s4332_s19 + $0x64] sm:$0xf]  ;;  %v2518_v60 = vshll.u32 %v3993_v48, 16 }
 0x1b4   : > { %v1830_v55 = vpop.permute.xlu1 %1829  ;;  %v2799_v52 = vrot.slane %v2797_v56, 4  ;;  %v4004_v56 = vld [vmem:[%s4332_s19 + $0x48] sm:$0xf] }
 0x1b5   : > { %1910 = vst.msk [vmem:[#allocation2 + $0x40] sm:$0xf] %vm1893_vm10, %v1830_v55  ;;  %v1828_v2 = vpop.permute.xlu0 %1827  ;;  %v1844_v6 = vpop.permute.xlu2 %1843  ;;  %v2802_v55 = vrot.slane %v2800_v57, 5 }
 0x1b6   : > { %1909 = vst.msk [vmem:[#allocation2 + $0x3c] sm:$0xf] %vm1893_vm10, %v1828_v2  ;;  %v4029_v2 = vld [vmem:[%s4332_s19 + $0xac] sm:$0xf] }
 0x1b7   : > { %1917 = vst.msk [vmem:[#allocation2 + $0x5c] sm:$0xf] %vm1893_vm10, %v1844_v6  ;;  %v4018_v6 = vld [vmem:[%s4332_s19 + $0x80] sm:$0x1]  ;;  %v2806_v12 = vshll.u32 %v4029_v2, 16 }
 0x1b8   : > { %v2720_v15 = vshll.u32 %v4018_v6, 16 }
 0x1ba   : > { %2192 = vrot.lane.b32.xlu1 %v2126_v7, %s4284_s24  ;;  %v2703_v7 = vrot.slane %v2701_v62, 4  ;;  %v2618_v62 = vshrl.u32 %v4005_v50, 16 }
 0x1bb   : > { %2190 = vrot.lane.b32.xlu0 %v2123_v8, %s4284_s24  ;;  %2188 = vrot.lane.b32.xlu2 %v2119_v11, %s4284_s24  ;;  %v2706_v8 = vrot.slane %v2704_v63, 5  ;;  %v2803_v11 = vor.u32 %v2802_v55, %v2799_v52  ;;  %v2605_v55 = vshrl.u32 %v4004_v56, 16 }
 0x1bc   : > { %v1836_v13 = vpop.permute.xlu1 %1835 }
 0x1bd   : > { %1913 = vst.msk [vmem:[#allocation2 + $0x4c] sm:$0xf] %vm1893_vm10, %v1836_v13  ;;  %v1834_v16 = vpop.permute.xlu0 %1833  ;;  %v1850_v18 = vpop.permute.xlu2 %1849  ;;  %v3984_v13 = vld [vmem:[%s4332_s19 + $0xa8] sm:$0xf] }
 0x1be   : > { %1912 = vst.msk [vmem:[#allocation2 + $0x48] sm:$0xf] %vm1893_vm10, %v1834_v16  ;;  %v2810_v16 = vshrl.u32 %v4029_v2, 16  ;;  %v2522_v2 = vshrl.u32 %v3993_v48, 16 }
 0x1bf   : > { %1920 = vst.msk [vmem:[#allocation2 + $0x68] sm:$0xf] %vm1893_vm10, %v1850_v18  ;;  %v2707_v18 = vor.u32 %v2706_v8, %v2703_v7  ;;  %v2520_v7 = vrot.slane %v2518_v60, 5 }
 0x1c2   : > { %2331 = vrot.lane.b32.xlu1 %v3960_v19, %s4285_s25  ;;  %v2804_v19 = vrot.slane %v2803_v11, 4 }
 0x1c3   : > { %2196 = vrot.lane.b32.xlu0 %v2133_v20, %s4284_s24  ;;  %2194 = vrot.lane.b32.xlu2 %v2130_v21, %s4284_s24  ;;  %v2808_v20 = vrot.slane %v2806_v12, 5  ;;  %v4065_v21 = vld [vmem:[%s4332_s19 + $0x7c] sm:$0xf] }
 0x1c4   : > { %v1842_v22 = vpop.permute.xlu1 %1841 }
 0x1c5   : > { %1916 = vst.msk [vmem:[#allocation2 + $0x58] sm:$0xf] %vm1893_vm10, %v1842_v22  ;;  %v1840_v23 = vpop.permute.xlu0 %1839  ;;  %v1856_v24 = vpop.permute.xlu2 %1855 }
 0x1c6   : > { %1915 = vst.msk [vmem:[#allocation2 + $0x54] sm:$0xf] %vm1893_vm10, %v1840_v23  ;;  %v2718_v23 = vrot.slane %v2717_v14, 4  ;;  %v2607_v14 = vrot.slane %v2605_v55, 4 }
 0x1c7   : > { %1923 = vst.msk [vmem:[#allocation2 + $0x74] sm:$0xf] %vm1893_vm10, %v1856_v24  ;;  %v2722_v24 = vrot.slane %v2720_v15, 5 }
 0x1ca   : > { %2337 = vrot.lane.b32.xlu1 %v3963_v26, %s4285_s25  ;;  %v3992_v26 = vld [vmem:[%s4332_s19 + $0x18] sm:$0xf] }
 0x1cb   : > { %2335 = vrot.lane.b32.xlu0 %v3962_v27, %s4285_s25  ;;  %2333 = vrot.lane.b32.xlu2 %v3961_v28, %s4285_s25  ;;  %v2708_v28 = vrot.slane %v2707_v18, 4  ;;  %v2524_v18 = vrot.slane %v2522_v2, 4  ;;  %v4020_v2 = vld [vmem:[%s4332_s19 + $0x88] sm:$0xf] }
 0x1cc   : > { %v1848_v29 = vpop.permute.xlu1 %1847 }
 0x1cd   : > { %1919 = vst.msk [vmem:[#allocation2 + $0x64] sm:$0xf] %vm1893_vm10, %v1848_v29  ;;  %v1846_v31 = vpop.permute.xlu0 %1845  ;;  %v2135_v32 = vpop.permute.xlu2 %2134  ;;  %v2812_v29 = vrot.slane %v2810_v16, 4 }
 0x1ce   : > { %1918 = vst.msk [vmem:[#allocation2 + $0x60] sm:$0xf] %vm1893_vm10, %v1846_v31  ;;  %v3175_v31 = vrot.slane %v4065_v21, 5 }
 0x1cf   : > { %2231 = vst.msk [vmem:[#allocation2] sm:$0xf] %vm2230_vm11, %v2135_v32 }
 0x1d2   : > { %2343 = vrot.lane.b32.xlu1 %v3966_v34, %s4285_s25  ;;  %v4030_v34 = vld [vmem:[%s4332_s19 + $0xb0] sm:$0x1] }
 0x1d3   : > { %2341 = vrot.lane.b32.xlu0 %v3965_v36, %s4285_s25  ;;  %2339 = vrot.lane.b32.xlu2 %v3964_v33, %s4285_s25  ;;  %v2809_v36 = vsel %vm4343_vm2, %v2804_v19, %v2808_v20  ;;  %v4066_v33 = vld [vmem:[%s4332_s19 + $0x80] sm:$0x1] }
 0x1d4   : > { %v1854_v37 = vpop.permute.xlu1 %1853 }
 0x1d5   : > { %1922 = vst.msk [vmem:[#allocation2 + $0x70] sm:$0xf] %vm1893_vm10, %v1854_v37  ;;  %v1852_v35 = vpop.permute.xlu0 %1851  ;;  %v2141_v30 = vpop.permute.xlu2 %2140  ;;  %v2509_v37 = vshrl.u32 %v3992_v26, 16 }
 0x1d6   : > { %1921 = vst.msk [vmem:[#allocation2 + $0x6c] sm:$0xf] %vm1893_vm10, %v1852_v35  ;;  %v2512_v35 = vshll.u32 %v3992_v26, 16 }
 0x1d7   : > { %2234 = vst.msk [vmem:[#allocation2 + $0xc] sm:$0xf] %vm2230_vm11, %v2141_v30  ;;  %v2723_v30 = vsel %vm4343_vm2, %v2718_v23, %v2722_v24 }
 0x1da   : > { %2349 = vrot.lane.b32.xlu1 %v3969_v38, %s4285_s25  ;;  %v4064_v38 = vld [vmem:[%s4332_s19 + $0x78] sm:$0xe] }
 0x1db   : > { %2347 = vrot.lane.b32.xlu0 %v3968_v39, %s4285_s25  ;;  %2345 = vrot.lane.b32.xlu2 %v3967_v40, %s4285_s25  ;;  %v2713_v39 = vsel %vm4343_vm2, %v2708_v28, %v2712_v3  ;;  %v2813_v40 = vor.u32 %v2812_v29, %v2808_v20  ;;  %v4078_v3 = vld [vmem:[%s4332_s19 + $0xb0] sm:$0x1]  ;;  %v3994_v20 = vld [vmem:[%s4332_s19 + $0x20] sm:$0x1]  ;;  %v2525_v28 = vor.u32 %v2524_v18, %v2520_v7 }
 0x1dc   : > { %v1860_v41 = vpop.permute.xlu1 %1859  ;;  %v3206_v12 = vrot.slane %v4078_v3, 5  ;;  %v2528_v29 = vshll.u32 %v3994_v20, 16  ;;  %v4032_v3 = vld [vmem:[%s4332_s19 + $0xb8] sm:$0xf] }
 0x1dd   : > { %1925 = vst.msk [vmem:[#allocation2 + $0x7c] sm:$0xf] %vm1893_vm10, %v1860_v41  ;;  %v1858_v42 = vpop.permute.xlu0 %1857  ;;  %v2147_v43 = vpop.permute.xlu2 %2146  ;;  %v2816_v41 = vshll.u32 %v4030_v34, 16  ;;  %v2814_v53 = vrot.slane %v2813_v40, 4 }
 0x1de   : > { %1924 = vst.msk [vmem:[#allocation2 + $0x78] sm:$0xf] %vm1893_vm10, %v1858_v42  ;;  %v3177_v42 = vrot.slane %v3175_v31, 4 }
 0x1df   : > { %2237 = vst.msk [vmem:[#allocation2 + $0x18] sm:$0xf] %vm2230_vm11, %v2147_v43  ;;  %v3178_v43 = vrot.slane %v4066_v33, 5 }
 0x1e1   : > { %v3179_v57 = vsel %vm4518_vm6, %v3177_v42, %v3178_v43  ;;  %v4053_v42 = vld [vmem:[%s4332_s19 + $0x4c] sm:$0xf] }
 0x1e2   : > { %2355 = vrot.lane.b32.xlu1 %v3972_v44, %s4285_s25  ;;  %v4096_v44 = vrot.slane %v4064_v38, 9  ;;  %v3147_v48 = vrot.slane %v4053_v42, 5 }
 0x1e3   : > { %2353 = vrot.lane.b32.xlu0 %v3971_v45, %s4285_s25  ;;  %2351 = vrot.lane.b32.xlu2 %v3970_v46, %s4285_s25  ;;  %v2511_v45 = vrot.slane %v2509_v37, 4  ;;  %v2514_v46 = vrot.slane %v2512_v35, 5  ;;  %v4041_v37 = vld [vmem:[%s4332_s19 + $0x1c] sm:$0xf]  ;;  %v2526_v35 = vrot.slane %v2525_v28, 4 }
 0x1e4   : > { %v2139_v47 = vpop.permute.xlu1 %2138  ;;  %v3176_v63 = vsel %vm4518_vm6, %v4096_v44, %v3175_v31  ;;  %v3119_v43 = vrot.slane %v4041_v37, 5  ;;  %v4042_v44 = vld [vmem:[%s4332_s19 + $0x20] sm:$0x1]  ;;  %v3987_v37 = vld [vmem:[%s4332_s19 + $0xb8] sm:$0xf] }
 0x1e5   : > { %2233 = vst.msk [vmem:[#allocation2 + $0x8] sm:$0xf] %vm2230_vm11, %v2139_v47  ;;  %v2137_v49 = vpop.permute.xlu0 %2136  ;;  %v2153_v51 = vpop.permute.xlu2 %2152  ;;  %v2515_v59 = vor.u32 %v2514_v46, %v2511_v45  ;;  %v4040_v46 = vld [vmem:[%s4332_s19 + $0x18] sm:$0xe] }
 0x1e6   : > { %2232 = vst.msk [vmem:[#allocation2 + $0x4] sm:$0xf] %vm2230_vm11, %v2137_v49  ;;  %v4077_v49 = vld [vmem:[%s4332_s19 + $0xac] sm:$0xf] }
 0x1e7   : > { %2240 = vst.msk [vmem:[#allocation2 + $0x24] sm:$0xf] %vm2230_vm11, %v2153_v51  ;;  %v3203_v52 = vrot.slane %v4077_v49, 5  ;;  %v2516_v6 = vrot.slane %v2515_v59, 4 }
 0x1e9   : > { %v3205_v11 = vrot.slane %v3203_v52, 4  ;;  %v2521_v21 = vsel %vm4343_vm2, %v2516_v6, %v2520_v7  ;;  %v4031_v7 = vld [vmem:[%s4332_s19 + $0xb4] sm:$0xf] }
 0x1ea   : > { %2363 = vrot.lane.b32.xlu1 %v3976_v54, %s4285_s25  ;;  %v2818_v54 = vrot.slane %v2816_v41, 5  ;;  %v4052_v41 = vld [vmem:[%s4332_s19 + $0x48] sm:$0xe] }
 0x1eb   : > { %2359 = vrot.lane.b32.xlu0 %v3974_v58, %s4285_s25  ;;  %2357 = vrot.lane.b32.xlu2 %v3973_v61, %s4285_s25  ;;  %v2614_v61 = vshll.u32 %v4005_v50, 16  ;;  %v3207_v24 = vsel %vm4518_vm6, %v3205_v11, %v3206_v12  ;;  %v3121_v50 = vrot.slane %v3119_v43, 4  ;;  %v2734_v11 = vshll.u32 %v4020_v2, 16 }
 0x1ec   : > { %v2145_v0 = vpop.permute.xlu1 %2144  ;;  %v2819_v4 = vsel %vm4343_vm2, %v2814_v53, %v2818_v54  ;;  %v4019_v53 = vld [vmem:[%s4332_s19 + $0x84] sm:$0xf]  ;;  %v2830_v12 = vshll.u32 %v4032_v3, 16 }
 0x1ed   : > { %2236 = vst.msk [vmem:[#allocation2 + $0x14] sm:$0xf] %vm2230_vm11, %v2145_v0  ;;  %v2143_v5 = vpop.permute.xlu0 %2142  ;;  %v2159_v9 = vpop.permute.xlu2 %2158  ;;  %v2608_v0 = vshll.u32 %v4004_v56, 16  ;;  %v2616_v8 = vrot.slane %v2614_v61, 5  ;;  %v4088_v56 = vrot.slane %v4040_v46, 9  ;;  %v2725_v59 = vshrl.u32 %v4019_v53, 16 }
 0x1ee   : > { %2235 = vst.msk [vmem:[#allocation2 + $0x10] sm:$0xf] %vm2230_vm11, %v2143_v5  ;;  %v4076_v5 = vld [vmem:[%s4332_s19 + $0xa8] sm:$0xe]  ;;  %v2728_v60 = vshll.u32 %v4019_v53, 16  ;;  %v2736_v20 = vrot.slane %v2734_v11, 5 }
 0x1ef   : > { %2243 = vst.msk [vmem:[#allocation2 + $0x30] sm:$0xf] %vm2230_vm11, %v2159_v9  ;;  %v2620_v9 = vrot.slane %v2618_v62, 4  ;;  %v2610_v15 = vrot.slane %v2608_v0, 5  ;;  %v3120_v62 = vsel %vm4518_vm6, %v4088_v56, %v3119_v43  ;;  %v4079_v53 = vld [vmem:[%s4332_s19 + $0xb4] sm:$0xe] }
 0x1f0   : > { %v2730_v55 = vrot.slane %v2728_v60, 5 }
 0x1f1   : > { %v2611_v26 = vor.u32 %v2610_v15, %v2607_v14  ;;  %v3978_v14 = vld [vmem:[%s4332_s19 + $0x84] sm:$0xf]  ;;  %v2821_v15 = vshrl.u32 %v4031_v7, 16 }
 0x1f2   : > { %2381 = vrot.lane.b32.xlu1 %v3985_v10, %s4285_s25 }
 0x1f3   : > { %2379 = vrot.lane.b32.xlu0 %v3984_v13, %s4285_s25  ;;  %2365 = vrot.lane.b32.xlu2 %v3977_v17, %s4285_s25  ;;  %v4006_v13 = vld [vmem:[%s4332_s19 + $0x50] sm:$0x1]  ;;  %v4100_v17 = vrot.slane %v4076_v5, 9  ;;  %v3149_v5 = vrot.slane %v3147_v48, 4 }
 0x1f4   : > { %v2151_v22 = vpop.permute.xlu1 %2150  ;;  %v2624_v23 = vshll.u32 %v4006_v13, 16  ;;  %v2834_v13 = vshrl.u32 %v4032_v3, 16 }
 0x1f5   : > { %2239 = vst.msk [vmem:[#allocation2 + $0x20] sm:$0xf] %vm2230_vm11, %v2151_v22  ;;  %v2149_v27 = vpop.permute.xlu0 %2148  ;;  %v2165_v32 = vpop.permute.xlu2 %2164  ;;  %v2621_v22 = vor.u32 %v2620_v9, %v2616_v8 }
 0x1f6   : > { %2238 = vst.msk [vmem:[#allocation2 + $0x1c] sm:$0xf] %vm2230_vm11, %v2149_v27  ;;  %v3204_v27 = vsel %vm4518_vm6, %v4100_v17, %v3203_v52  ;;  %v2727_v52 = vrot.slane %v2725_v59, 4  ;;  %v2738_v17 = vshrl.u32 %v4020_v2, 16 }
 0x1f7   : > { %2246 = vst.msk [vmem:[#allocation2 + $0x3c] sm:$0xf] %vm2230_vm11, %v2165_v32  ;;  %v2622_v31 = vrot.slane %v2621_v22, 4  ;;  %v2626_v32 = vrot.slane %v2624_v23, 5  ;;  %v2836_v22 = vrot.slane %v2834_v13, 4 }
 0x1fa   : > { %2940 = vrot.lane.b32.xlu1 %v2809_v36, %s4286_s26  ;;  %v2612_v36 = vrot.slane %v2611_v26, 4  ;;  %v2823_v26 = vrot.slane %v2821_v15, 4 }
 0x1fb   : > { %2926 = vrot.lane.b32.xlu0 %v2723_v30, %s4286_s26  ;;  %2924 = vrot.lane.b32.xlu2 %v2713_v39, %s4286_s26  ;;  %v2530_v30 = vrot.slane %v2528_v29, 5  ;;  %v2627_v39 = vsel %vm4343_vm2, %v2622_v31, %v2626_v32  ;;  %v2740_v29 = vrot.slane %v2738_v17, 4  ;;  %v4021_v32 = vld [vmem:[%s4332_s19 + $0x8c] sm:$0x1] }
 0x1fc   : > { %v2157_v47 = vpop.permute.xlu1 %2156  ;;  %v2617_v40 = vsel %vm4343_vm2, %v2612_v36, %v2616_v8  ;;  %v3979_v8 = vld [vmem:[%s4332_s19 + $0x88] sm:$0xf] }
 0x1fd   : > { %2242 = vst.msk [vmem:[#allocation2 + $0x2c] sm:$0xf] %vm2230_vm11, %v2157_v47  ;;  %v2155_v51 = vpop.permute.xlu0 %2154  ;;  %v2171_v58 = vpop.permute.xlu2 %2170  ;;  %v2531_v45 = vsel %vm4343_vm2, %v2526_v35, %v2530_v30  ;;  %v4092_v47 = vrot.slane %v4052_v41, 9  ;;  %v3986_v30 = vld [vmem:[%s4332_s19 + $0xb4] sm:$0xf] }
 0x1fe   : > { %2241 = vst.msk [vmem:[#allocation2 + $0x28] sm:$0xf] %vm2230_vm11, %v2155_v51  ;;  %v3122_v51 = vrot.slane %v4042_v44, 5  ;;  %v4068_v44 = vld [vmem:[%s4332_s19 + $0x88] sm:$0xf] }
 0x1ff   : > { %2249 = vst.msk [vmem:[#allocation2 + $0x48] sm:$0xf] %vm2230_vm11, %v2171_v58  ;;  %v3148_v58 = vsel %vm4518_vm6, %v4092_v47, %v3147_v48  ;;  %v3182_v59 = vrot.slane %v4068_v44, 5 }
 0x200   : > { %v3123_v61 = vsel %vm4518_vm6, %v3121_v50, %v3122_v51 }
 0x202   : > { %3263 = vrot.lane.b32.xlu1 %v3179_v57, %s4287_s27 }
 0x203   : > { %3261 = vrot.lane.b32.xlu0 %v3176_v63, %s4287_s27  ;;  %2942 = vrot.lane.b32.xlu2 %v2819_v4, %s4286_s26  ;;  %v4054_v63 = vld [vmem:[%s4332_s19 + $0x50] sm:$0x1] }
 0x204   : > { %v2163_v10 = vpop.permute.xlu1 %2162  ;;  %v3150_v6 = vrot.slane %v4054_v63, 5 }
 0x205   : > { %2245 = vst.msk [vmem:[#allocation2 + $0x38] sm:$0xf] %vm2230_vm11, %v2163_v10  ;;  %v2161_v16 = vpop.permute.xlu0 %2160  ;;  %v2177_v19 = vpop.permute.xlu2 %2176  ;;  %v2731_v10 = vor.u32 %v2730_v55, %v2727_v52  ;;  %v4067_v52 = vld [vmem:[%s4332_s19 + $0x84] sm:$0xe]  ;;  %v4101_v55 = vrot.slane %v4079_v53, 9 }
 0x206   : > { %2244 = vst.msk [vmem:[#allocation2 + $0x34] sm:$0xf] %vm2230_vm11, %v2161_v16  ;;  %v2824_v16 = vshll.u32 %v4031_v7, 16  ;;  %v3151_v18 = vsel %vm4518_vm6, %v3149_v5, %v3150_v6  ;;  %v3184_v5 = vrot.slane %v3182_v59, 4  ;;  %v3997_v7 = vld [vmem:[%s4332_s19 + $0x2c] sm:$0x1] }
 0x207   : > { %2252 = vst.msk [vmem:[#allocation2 + $0x54] sm:$0xf] %vm2230_vm11, %v2177_v19  ;;  %v2732_v19 = vrot.slane %v2731_v10, 4  ;;  %v4097_v11 = vrot.slane %v4067_v52, 9  ;;  %v2552_v17 = vshll.u32 %v3997_v7, 16 }
 0x20a   : > { %2892 = vrot.lane.b32.xlu1 %v2521_v21, %s4286_s26  ;;  %v2832_v21 = vrot.slane %v2830_v12, 5  ;;  %v4008_v12 = vld [vmem:[%s4332_s19 + $0x58] sm:$0xf] }
 0x20b   : > { %3279 = vrot.lane.b32.xlu0 %v3207_v24, %s4287_s27  ;;  %3277 = vrot.lane.b32.xlu2 %v3204_v27, %s4287_s27  ;;  %v4033_v24 = vld [vmem:[%s4332_s19 + $0xbc] sm:$0x1]  ;;  %v2826_v27 = vrot.slane %v2824_v16, 5 }
 0x20c   : > { %v2169_v34 = vpop.permute.xlu1 %2168  ;;  %v2837_v36 = vor.u32 %v2836_v22, %v2832_v21  ;;  %v3183_v22 = vsel %vm4518_vm6, %v4097_v11, %v3182_v59 }
 0x20d   : > { %2248 = vst.msk [vmem:[#allocation2 + $0x44] sm:$0xf] %vm2230_vm11, %v2169_v34  ;;  %v2167_v33 = vpop.permute.xlu0 %2166  ;;  %v2183_v38 = vpop.permute.xlu2 %2182  ;;  %v2737_v34 = vsel %vm4343_vm2, %v2732_v19, %v2736_v20  ;;  %v2827_v35 = vor.u32 %v2826_v27, %v2823_v26  ;;  %v4081_v26 = vld [vmem:[%s4332_s19 + $0xbc] sm:$0x1] }
 0x20e   : > { %2247 = vst.msk [vmem:[#allocation2 + $0x40] sm:$0xf] %vm2230_vm11, %v2167_v33  ;;  %v2840_v33 = vshll.u32 %v4033_v24, 16 }
 0x20f   : > { %2255 = vst.msk [vmem:[#allocation2 + $0x60] sm:$0xf] %vm2230_vm11, %v2183_v38  ;;  %v2741_v38 = vor.u32 %v2740_v29, %v2736_v20  ;;  %v2828_v43 = vrot.slane %v2827_v35, 4  ;;  %v2638_v20 = vshll.u32 %v4008_v12, 16  ;;  %v3213_v35 = vrot.slane %v4081_v26, 5 }
 0x210   : > { %v2842_v41 = vrot.slane %v2840_v33, 5 }
 0x211   : > { %v2742_v47 = vrot.slane %v2741_v38, 4 }
 0x212   : > { %2910 = vrot.lane.b32.xlu1 %v2627_v39, %s4286_s26  ;;  %v2744_v39 = vshll.u32 %v4021_v32, 16  ;;  %v4009_v32 = vld [vmem:[%s4332_s19 + $0x5c] sm:$0x1] }
 0x213   : > { %2908 = vrot.lane.b32.xlu0 %v2617_v40, %s4286_s26  ;;  %2894 = vrot.lane.b32.xlu2 %v2531_v45, %s4286_s26  ;;  %v2838_v40 = vrot.slane %v2837_v36, 4  ;;  %v3996_v45 = vld [vmem:[%s4332_s19 + $0x28] sm:$0xf] }
 0x214   : > { %v2175_v49 = vpop.permute.xlu1 %2174  ;;  %v2746_v48 = vrot.slane %v2744_v39, 5  ;;  %v2546_v56 = vshrl.u32 %v3996_v45, 16 }
 0x215   : > { %2251 = vst.msk [vmem:[#allocation2 + $0x50] sm:$0xf] %vm2230_vm11, %v2175_v49  ;;  %v2173_v54 = vpop.permute.xlu0 %2172  ;;  %v2189_v57 = vpop.permute.xlu2 %2188  ;;  %v3995_v49 = vld [vmem:[%s4332_s19 + $0x24] sm:$0xf]  ;;  %v2843_v51 = vsel %vm4343_vm2, %v2838_v40, %v2842_v41 }
 0x216   : > { %2250 = vst.msk [vmem:[#allocation2 + $0x4c] sm:$0xf] %vm2230_vm11, %v2173_v54  ;;  %v2542_v54 = vshll.u32 %v3996_v45, 16  ;;  %v2533_v60 = vshrl.u32 %v3995_v49, 16  ;;  %v2747_v63 = vsel %vm4343_vm2, %v2742_v47, %v2746_v48  ;;  %v2548_v3 = vrot.slane %v2546_v56, 4 }
 0x217   : > { %2258 = vst.msk [vmem:[#allocation2 + $0x6c] sm:$0xf] %vm2230_vm11, %v2189_v57  ;;  %v2833_v57 = vsel %vm4343_vm2, %v2828_v43, %v2832_v21  ;;  %v2642_v21 = vshrl.u32 %v4008_v12, 16  ;;  %v4044_v43 = vld [vmem:[%s4332_s19 + $0x28] sm:$0xf]  ;;  %v2648_v45 = vshll.u32 %v4009_v32, 16 }
 0x218   : > { %v2544_v2 = vrot.slane %v2542_v54, 5  ;;  %v4056_v54 = vld [vmem:[%s4332_s19 + $0x58] sm:$0xf] }
 0x219   : > { %v2644_v36 = vrot.slane %v2642_v21, 4  ;;  %v2650_v53 = vrot.slane %v2648_v45, 5 }
 0x21a   : > { %3245 = vrot.lane.b32.xlu1 %v3148_v58, %s4287_s27  ;;  %v4080_v58 = vld [vmem:[%s4332_s19 + $0xb8] sm:$0xf]  ;;  %v2549_v16 = vor.u32 %v2548_v3, %v2544_v2 }
 0x21b   : > { %3231 = vrot.lane.b32.xlu0 %v3123_v61, %s4287_s27  ;;  %3229 = vrot.lane.b32.xlu2 %v3120_v62, %s4287_s27  ;;  %v2536_v61 = vshll.u32 %v3995_v49, 16  ;;  %v4069_v62 = vld [vmem:[%s4332_s19 + $0x8c] sm:$0x1]  ;;  %v3126_v49 = vrot.slane %v4044_v43, 5 }
 0x21c   : > { %v2181_v0 = vpop.permute.xlu1 %2180  ;;  %v3185_v6 = vrot.slane %v4069_v62, 5  ;;  %v2550_v27 = vrot.slane %v2549_v16, 4  ;;  %v4057_v62 = vld [vmem:[%s4332_s19 + $0x5c] sm:$0x1] }
 0x21d   : > { %2254 = vst.msk [vmem:[#allocation2 + $0x5c] sm:$0xf] %vm2230_vm11, %v2181_v0  ;;  %v2179_v4 = vpop.permute.xlu0 %2178  ;;  %v2195_v9 = vpop.permute.xlu2 %2194  ;;  %v3210_v0 = vrot.slane %v4080_v58, 5  ;;  %v3128_v7 = vrot.slane %v3126_v49, 4 }
 0x21e   : > { %2253 = vst.msk [vmem:[#allocation2 + $0x58] sm:$0xf] %vm2230_vm11, %v2179_v4 }
 0x21f   : > { %2261 = vst.msk [vmem:[#allocation2 + $0x78] sm:$0xf] %vm2230_vm11, %v2195_v9  ;;  %v2538_v9 = vrot.slane %v2536_v61, 5  ;;  %v3211_v15 = vsel %vm4518_vm6, %v4101_v55, %v3210_v0  ;;  %v4045_v55 = vld [vmem:[%s4332_s19 + $0x2c] sm:$0x1] }
 0x222   : > { %2369 = vrot.lane.b32.xlu1 %v3979_v8, %s4285_s25  ;;  %v2535_v8 = vrot.slane %v2533_v60, 4  ;;  %v3154_v60 = vrot.slane %v4056_v54, 5 }
 0x223   : > { %2367 = vrot.lane.b32.xlu0 %v3978_v14, %s4285_s25  ;;  %3247 = vrot.lane.b32.xlu2 %v3151_v18, %s4287_s27  ;;  %v4007_v14 = vld [vmem:[%s4332_s19 + $0x54] sm:$0xf]  ;;  %v3186_v18 = vsel %vm4518_vm6, %v3184_v5, %v3185_v6 }
 0x224   : > { %v2187_v23 = vpop.permute.xlu1 %2186  ;;  %v2539_v19 = vor.u32 %v2538_v9, %v2535_v8  ;;  %v2632_v24 = vshll.u32 %v4007_v14, 16  ;;  %v4023_v5 = vld [vmem:[%s4332_s19 + $0x94] sm:$0xf]  ;;  %v3129_v8 = vrot.slane %v4045_v55, 5  ;;  %v4022_v9 = vld [vmem:[%s4332_s19 + $0x90] sm:$0xf] }
 0x225   : > { %2257 = vst.msk [vmem:[#allocation2 + $0x68] sm:$0xf] %vm2230_vm11, %v2187_v23  ;;  %v2185_v28 = vpop.permute.xlu0 %2184  ;;  %v2334_v31 = vpop.permute.xlu2 %2333  ;;  %v2629_v23 = vshrl.u32 %v4007_v14, 16  ;;  %v2758_v12 = vshll.u32 %v4023_v5, 16  ;;  %v2752_v16 = vshll.u32 %v4022_v9, 16 }
 0x226   : > { %2256 = vst.msk [vmem:[#allocation2 + $0x64] sm:$0xf] %vm2230_vm11, %v2185_v28  ;;  %v2554_v28 = vrot.slane %v2552_v17, 5  ;;  %v2634_v38 = vrot.slane %v2632_v24, 5  ;;  %v3394_v17 = vld [vmem:[%s5870_s1 + $0x10] sm:$0x3] }
 0x227   : > { %2429 = vst.msk [vmem:[#allocation2 + $0x4] sm:$0xf] %vm2427_vm12, %v2334_v31  ;;  %v2540_v31 = vrot.slane %v2539_v19, 4  ;;  %v3488_v19 = vunpack.c.l.b16 %v3394_v17  ;;  %v4024_v24 = vld [vmem:[%s4332_s19 + $0x98] sm:$0x1] }
 0x228   : > { %v2555_v40 = vsel %vm4343_vm2, %v2550_v27, %v2554_v28  ;;  %v2754_v27 = vrot.slane %v2752_v16, 5 }
 0x229   : > { %v2545_v41 = vsel %vm4343_vm2, %v2540_v31, %v2544_v2  ;;  %v3157_v2 = vrot.slane %v4057_v62, 5 }
 0x22a   : > { %2928 = vrot.lane.b32.xlu1 %v2737_v34, %s4286_s26  ;;  %v2640_v34 = vrot.slane %v2638_v20, 5  ;;  %v5479_v20 = vrot.slane %v2758_v12, 5 }
 0x22b   : > { %2385 = vrot.lane.b32.xlu0 %v3987_v37, %s4285_s25  ;;  %2383 = vrot.lane.b32.xlu2 %v3986_v30, %s4285_s25  ;;  %v3212_v37 = vrot.slane %v3210_v0, 4  ;;  %v2631_v30 = vrot.slane %v2629_v23, 4  ;;  %v3156_v0 = vrot.slane %v3154_v60, 4 }
 0x22c   : > { %v2193_v42 = vpop.permute.xlu1 %2192  ;;  %v2645_v44 = vor.u32 %v2644_v36, %v2640_v34  ;;  %v4034_v36 = vld [vmem:[%s4332_s19 + $0xc0] sm:$0xf] }
 0x22d   : > { %2260 = vst.msk [vmem:[#allocation2 + $0x74] sm:$0xf] %vm2230_vm11, %v2193_v42  ;;  %v2191_v46 = vpop.permute.xlu0 %2190  ;;  %v2340_v50 = vpop.permute.xlu2 %2339  ;;  %v4043_v42 = vld [vmem:[%s4332_s19 + $0x24] sm:$0xe]  ;;  %v2635_v47 = vor.u32 %v2634_v38, %v2631_v30  ;;  %v3158_v11 = vsel %vm4518_vm6, %v3156_v0, %v3157_v2  ;;  %v3981_v30 = vld [vmem:[%s4332_s19 + $0x94] sm:$0xf] }
 0x22e   : > { %2259 = vst.msk [vmem:[#allocation2 + $0x70] sm:$0xf] %vm2230_vm11, %v2191_v46  ;;  %v3214_v46 = vsel %vm4518_vm6, %v3212_v37, %v3213_v35  ;;  %v4089_v48 = vrot.slane %v4043_v42, 9  ;;  %v2768_v35 = vshll.u32 %v4024_v24, 16  ;;  %v2845_v42 = vshrl.u32 %v4034_v36, 16 }
 0x22f   : > { %2432 = vst.msk [vmem:[#allocation2 + $0x10] sm:$0xf] %vm2427_vm12, %v2340_v50  ;;  %v2848_v43 = vshll.u32 %v4034_v36, 16  ;;  %v4072_v24 = vld [vmem:[%s4332_s19 + $0x98] sm:$0x1] }
 0x230   : > { %v3127_v59 = vsel %vm4518_vm6, %v4089_v48, %v3126_v49  ;;  %v2847_v54 = vrot.slane %v2845_v42, 4  ;;  %v4011_v36 = vld [vmem:[%s4332_s19 + $0x64] sm:$0xf] }
 0x232   : > { %2946 = vrot.lane.b32.xlu1 %v2843_v51, %s4286_s26  ;;  %v2646_v51 = vrot.slane %v2645_v44, 4  ;;  %v4211_v44 = vld [vmem:[%s5870_s1] sm:$0xff] }
 0x233   : > { %2944 = vrot.lane.b32.xlu0 %v2833_v57, %s4286_s26  ;;  %2930 = vrot.lane.b32.xlu2 %v2747_v63, %s4286_s26  ;;  %v2636_v57 = vrot.slane %v2635_v47, 4  ;;  %v4055_v63 = vld [vmem:[%s4332_s19 + $0x54] sm:$0xe] }
 0x234   : > { %v2332_v4 = vpop.permute.xlu1 %2331  ;;  %v2651_v61 = vsel %vm4343_vm2, %v2646_v51, %v2650_v53  ;;  %v4036_v53 = vld [vmem:[%s4332_s19 + $0xc8] sm:$0x1] }
 0x235   : > { %2428 = vst.msk [vmem:[#allocation2] sm:$0xf] %vm2427_vm12, %v2332_v4  ;;  %v2197_v10 = vpop.permute.xlu0 %2196  ;;  %v2346_v13 = vpop.permute.xlu2 %2345  ;;  %v2641_v52 = vsel %vm4343_vm2, %v2636_v57, %v2640_v34  ;;  %v4093_v4 = vrot.slane %v4055_v63, 9  ;;  %v4212_v34 = vld [vmem:[%s5870_s1 + $0x8] sm:$0xff]  ;;  %v2864_v63 = vshll.u32 %v4036_v53, 16 }
 0x236   : > { %2262 = vst.msk [vmem:[#allocation2 + $0x7c] sm:$0xf] %vm2230_vm11, %v2197_v10 }
 0x237   : > { %2435 = vst.msk [vmem:[#allocation2 + $0x1c] sm:$0xf] %vm2427_vm12, %v2346_v13  ;;  %v2762_v13 = vshrl.u32 %v4023_v5, 16  ;;  %v3155_v14 = vsel %vm4518_vm6, %v4093_v4, %v3154_v60  ;;  %v4070_v60 = vld [vmem:[%s4332_s19 + $0x90] sm:$0xe]  ;;  %v2866_v5 = vrot.slane %v2864_v63, 5 }
 0x238   : > { %v4098_v0 = vrot.slane %v4070_v60, 9 }
 0x239   : > { %v2764_v21 = vrot.slane %v2762_v13, 4 }
 0x23a   : > { %3281 = vrot.lane.b32.xlu1 %v3211_v15, %s4287_s27  ;;  %v2749_v15 = vshrl.u32 %v4022_v9, 16 }
 0x23b   : > { %3267 = vrot.lane.b32.xlu0 %v3186_v18, %s4287_s27  ;;  %3265 = vrot.lane.b32.xlu2 %v3183_v22, %s4287_s27  ;;  %v3130_v18 = vsel %vm4518_vm6, %v3128_v7, %v3129_v8  ;;  %v3491_v22 = vpack.c.b16 %v3488_v19, %v3488_v19  ;;  %v2765_v37 = vor.u32 %v2764_v21, %v5479_v20  ;;  %v4010_v7 = vld [vmem:[%s4332_s19 + $0x60] sm:$0xf] }
 0x23c   : > { %v2338_v29 = vpop.permute.xlu1 %2337  ;;  %v2751_v26 = vrot.slane %v2749_v15, 4  ;;  %v2653_v15 = vshrl.u32 %v4010_v7, 16  ;;  %v2656_v16 = vshll.u32 %v4010_v7, 16 }
 0x23d   : > { %2431 = vst.msk [vmem:[#allocation2 + $0xc] sm:$0xf] %vm2427_vm12, %v2338_v29  ;;  %v2336_v33 = vpop.permute.xlu0 %2335  ;;  %v2352_v39 = vpop.permute.xlu2 %2351  ;;  %v4035_v29 = vld [vmem:[%s4332_s19 + $0xc4] sm:$0xf]  ;;  %v3545_v31 = vsel %vm3543_vm13, %v3491_v22, 0  ;;  %v2766_v45 = vrot.slane %v2765_v37, 4 }
 0x23e   : > { %2430 = vst.msk [vmem:[#allocation2 + $0x8] sm:$0xf] %vm2427_vm12, %v2336_v33  ;;  %4214 = vmatpush.bf16.msra.mxu2 %v3545_v31  ;;  %4215 = vmatpush.bf16.msra.mxu3 %v3545_v31  ;;  %v3988_v33 = vld [vmem:[%s4332_s19 + $0xc0] sm:$0xf]  ;;  %v2755_v38 = vor.u32 %v2754_v27, %v2751_v26  ;;  %v3998_v22 = vld [vmem:[%s4332_s19 + $0x30] sm:$0xf] }
 0x23f   : > { %2438 = vst.msk [vmem:[#allocation2 + $0x28] sm:$0xf] %vm2427_vm12, %v2352_v39  ;;  %3552 = vmatpush.bf16.msra.mxu0 %v3545_v31  ;;  %4213 = vmatpush.bf16.msra.mxu1 %v3545_v31  ;;  %v2854_v39 = vshll.u32 %v4035_v29, 16  ;;  %v2557_v26 = vshrl.u32 %v3998_v22, 16  ;;  %v2560_v27 = vshll.u32 %v3998_v22, 16  ;;  %v2655_v31 = vrot.slane %v2653_v15, 4 }
 0x240   : > { %v2756_v48 = vrot.slane %v2755_v38, 4 }
 0x241   : > { %v5500_v49 = vrot.slane %v2854_v39, 5  ;;  %v3192_v39 = vrot.slane %v4072_v24, 5 }
 0x242   : > { %2898 = vrot.lane.b32.xlu1 %v2555_v40, %s4286_s26  ;;  %v2858_v40 = vshrl.u32 %v4035_v29, 16  ;;  %4217 = vmatpush.bf16.msra.mxu2 %v4212_v34 }
 0x243   : > { %2896 = vrot.lane.b32.xlu0 %v2545_v41, %s4286_s26  ;;  %3283 = vrot.lane.b32.xlu2 %v3214_v46, %s4287_s27  ;;  %v3980_v41 = vld [vmem:[%s4332_s19 + $0x90] sm:$0xf]  ;;  %v2770_v46 = vrot.slane %v2768_v35, 5 }
 0x244   : > { %v2344_v50 = vpop.permute.xlu1 %2343  ;;  %4218 = vmatpush.bf16.msra.mxu3 %v4212_v34  ;;  %3553 = vmatpush.bf16.msra.mxu0 %v4212_v34 }
 0x245   : > { %2434 = vst.msk [vmem:[#allocation2 + $0x18] sm:$0xf] %vm2427_vm12, %v2344_v50  ;;  %v2342_v56 = vpop.permute.xlu0 %2341  ;;  %v2358_v58 = vpop.permute.xlu2 %2357  ;;  %v2860_v50 = vrot.slane %v2858_v40, 4  ;;  %4216 = vmatpush.bf16.msra.mxu1 %v4212_v34  ;;  %v2559_v40 = vrot.slane %v2557_v26, 4 }
 0x246   : > { %2433 = vst.msk [vmem:[#allocation2 + $0x14] sm:$0xf] %vm2427_vm12, %v2342_v56  ;;  %v2850_v56 = vrot.slane %v2848_v43, 5  ;;  %4220 = vmatpush.bf16.msra.mxu2 %v4211_v44 }
 0x247   : > { %2441 = vst.msk [vmem:[#allocation2 + $0x34] sm:$0xf] %vm2427_vm12, %v2358_v58  ;;  %v2771_v58 = vsel %vm4343_vm2, %v2766_v45, %v2770_v46  ;;  %v2861_v62 = vor.u32 %v2860_v50, %v5500_v49  ;;  %v2662_v45 = vshll.u32 %v4011_v36, 16 }
 0x248   : > { %4221 = vmatpush.bf16.msra.mxu3 %v4211_v44  ;;  %3554 = vmatpush.bf16.msra.mxu0 %v4211_v44  ;;  %v2851_v55 = vor.u32 %v2850_v56, %v2847_v54 }
 0x249   : > { %4219 = vmatpush.bf16.msra.mxu1 %v4211_v44  ;;  %v2862_v4 = vrot.slane %v2861_v62, 4  ;;  %v2664_v54 = vrot.slane %v2662_v45, 5 }
 0x24a   : > { %3233 = vrot.lane.b32.xlu1 %v3127_v59, %s4287_s27  ;;  %v2761_v59 = vsel %vm4343_vm2, %v2756_v48, %v5479_v20  ;;  %v2852_v9 = vrot.slane %v2851_v55, 4 }
 0x24b   : > { %2914 = vrot.lane.b32.xlu0 %v2651_v61, %s4286_s26  ;;  %2912 = vrot.lane.b32.xlu2 %v2641_v52, %s4286_s26  ;;  %v4071_v61 = vld [vmem:[%s4332_s19 + $0x94] sm:$0xf]  ;;  %v3989_v52 = vld [vmem:[%s4332_s19 + $0xc4] sm:$0xf]  ;;  %v2867_v17 = vsel %vm4343_vm2, %v2862_v4, %v2866_v5 }
 0x24c   : > { %v2350_v3 = vpop.permute.xlu1 %2349  ;;  %v3189_v2 = vrot.slane %v4071_v61, 5  ;;  %v2857_v21 = vsel %vm4343_vm2, %v2852_v9, %v5500_v49  ;;  %v2666_v49 = vshrl.u32 %v4011_v36, 16  ;;  %v4046_v4 = vld [vmem:[%s4332_s19 + $0x30] sm:$0xe] }
 0x24d   : > { %2437 = vst.msk [vmem:[#allocation2 + $0x24] sm:$0xf] %vm2427_vm12, %v2350_v3  ;;  %v2348_v6 = vpop.permute.xlu0 %2347  ;;  %v2366_v10 = vpop.permute.xlu2 %2365 }
 0x24e   : > { %2436 = vst.msk [vmem:[#allocation2 + $0x20] sm:$0xf] %vm2427_vm12, %v2348_v6  ;;  %v4083_v6 = vld [vmem:[%s4332_s19 + $0xc4] sm:$0xf]  ;;  %v3190_v13 = vsel %vm4518_vm6, %v4098_v0, %v3189_v2  ;;  %v3191_v38 = vrot.slane %v3189_v2, 4  ;;  %v2668_v62 = vrot.slane %v2666_v49, 4 }
 0x24f   : > { %2445 = vst.msk [vmem:[#allocation2 + $0x44] sm:$0xf] %vm2427_vm12, %v2366_v10  ;;  %v3999_v10 = vld [vmem:[%s4332_s19 + $0x34] sm:$0xf] }
 0x250   : > { %v2566_v19 = vshll.u32 %v3999_v10, 16  ;;  %v2570_v20 = vshrl.u32 %v3999_v10, 16  ;;  %v3193_v50 = vsel %vm4518_vm6, %v3191_v38, %v3192_v39 }
 0x252   : > { %3251 = vrot.lane.b32.xlu1 %v3158_v11, %s4287_s27  ;;  %v4084_v11 = vld [vmem:[%s4332_s19 + $0xc8] sm:$0x1]  ;;  %v2568_v37 = vrot.slane %v2566_v19, 5  ;;  %v2572_v35 = vrot.slane %v2570_v20, 4 }
 0x253   : > { %3249 = vrot.lane.b32.xlu0 %v3155_v14, %s4287_s27  ;;  %3235 = vrot.lane.b32.xlu2 %v3130_v18, %s4287_s27  ;;  %v3217_v14 = vrot.slane %v4083_v6, 5  ;;  %v4082_v18 = vld [vmem:[%s4332_s19 + $0xc0] sm:$0xe]  ;;  %v2669_v6 = vor.u32 %v2668_v62, %v2664_v54 }
 0x254   : > { %v2356_v23 = vpop.permute.xlu1 %2355  ;;  %v4102_v29 = vrot.slane %v4082_v18, 9 }
 0x255   : > { %2440 = vst.msk [vmem:[#allocation2 + $0x30] sm:$0xf] %vm2427_vm12, %v2356_v23  ;;  %v2354_v28 = vpop.permute.xlu0 %2353  ;;  %v2925_v32 = vpop.permute.xlu2 %2924  ;;  %v3220_v23 = vrot.slane %v4084_v11, 5  ;;  %v4090_v11 = vrot.slane %v4046_v4, 9  ;;  %v2670_v15 = vrot.slane %v2669_v6, 4 }
 0x256   : > { %2439 = vst.msk [vmem:[#allocation2 + $0x2c] sm:$0xf] %vm2427_vm12, %v2354_v28  ;;  %v3219_v28 = vrot.slane %v3217_v14, 4  ;;  %v3218_v46 = vsel %vm4518_vm6, %v4102_v29, %v3217_v14 }
 0x258   : > { %v3221_v43 = vsel %vm4518_vm6, %v3219_v28, %v3220_v23  ;;  %v4058_v23 = vld [vmem:[%s4332_s19 + $0x60] sm:$0xe]  ;;  %v4037_v28 = vld [vmem:[%s4332_s19 + $0xcc] sm:$0xf] }
 0x25a   : > { %2387 = vrot.lane.b32.xlu1 %v3988_v33, %s4285_s25  ;;  %v4000_v33 = vld [vmem:[%s4332_s19 + $0x38] sm:$0x1] }
 0x25b   : > { %2373 = vrot.lane.b32.xlu0 %v3981_v30, %s4285_s25  ;;  %2371 = vrot.lane.b32.xlu2 %v3980_v41, %s4285_s25  ;;  %v2562_v41 = vrot.slane %v2560_v27, 5  ;;  %v2576_v48 = vshll.u32 %v4000_v33, 16  ;;  %v3982_v33 = vld [vmem:[%s4332_s19 + $0x9c] sm:$0xf] }
 0x25c   : > { %v2364_v47 = vpop.permute.xlu1 %2363 }
 0x25d   : > { %2444 = vst.msk [vmem:[#allocation2 + $0x40] sm:$0xf] %vm2427_vm12, %v2364_v47  ;;  %v2360_v51 = vpop.permute.xlu0 %2359  ;;  %v2943_v57 = vpop.permute.xlu2 %2942  ;;  %v2573_v47 = vor.u32 %v2572_v35, %v2568_v37  ;;  %v2872_v35 = vshll.u32 %v4037_v28, 16 }
 0x25e   : > { %2442 = vst.msk [vmem:[#allocation2 + $0x38] sm:$0xf] %vm2427_vm12, %v2360_v51  ;;  %v2563_v51 = vor.u32 %v2562_v41, %v2559_v40  ;;  %v4025_v41 = vld [vmem:[%s4332_s19 + $0x9c] sm:$0xf] }
 0x25f   : > { %3005 = vst.msk [vmem:[#allocation2 + $0x40] sm:$0xf] %vm2988_vm14, %v2925_v32  ;;  %v2658_v32 = vrot.slane %v2656_v16, 5  ;;  %v2874_v45 = vrot.slane %v2872_v35, 5 }
 0x260   : > { %v2564_v61 = vrot.slane %v2563_v51, 4  ;;  %v4027_v51 = vld [vmem:[%s4332_s19 + $0xa4] sm:$0x1] }
 0x261   : > { %v2659_v44 = vor.u32 %v2658_v32, %v2655_v31  ;;  %v4026_v32 = vld [vmem:[%s4332_s19 + $0xa0] sm:$0xf]  ;;  %v2792_v62 = vshll.u32 %v4027_v51, 16 }
 0x262   : > { %2934 = vrot.lane.b32.xlu1 %v2771_v58, %s4286_s26  ;;  %v2578_v58 = vrot.slane %v2576_v48, 5  ;;  %v2569_v5 = vsel %vm4343_vm2, %v2564_v61, %v2568_v37  ;;  %v2869_v37 = vshrl.u32 %v4037_v28, 16  ;;  %v2782_v38 = vshll.u32 %v4026_v32, 16  ;;  %v4013_v28 = vld [vmem:[%s4332_s19 + $0x6c] sm:$0xf] }
 0x263   : > { %2932 = vrot.lane.b32.xlu0 %v2761_v59, %s4286_s26  ;;  %2389 = vrot.lane.b32.xlu2 %v3989_v52, %s4285_s25  ;;  %v2660_v53 = vrot.slane %v2659_v44, 4  ;;  %v4047_v59 = vld [vmem:[%s4332_s19 + $0x34] sm:$0xf]  ;;  %v4012_v52 = vld [vmem:[%s4332_s19 + $0x68] sm:$0x1]  ;;  %v2786_v39 = vshrl.u32 %v4026_v32, 16 }
 0x264   : > { %v2382_v3 = vpop.permute.xlu1 %2381  ;;  %v3133_v0 = vrot.slane %v4047_v59, 5  ;;  %v2672_v7 = vshll.u32 %v4012_v52, 16  ;;  %v2871_v44 = vrot.slane %v2869_v37, 4  ;;  %v2784_v48 = vrot.slane %v2782_v38, 5  ;;  %v3983_v52 = vld [vmem:[%s4332_s19 + $0xa0] sm:$0xf] }
 0x265   : > { %2453 = vst.msk [vmem:[#allocation2 + $0x64] sm:$0xf] %vm2427_vm12, %v2382_v3  ;;  %v2380_v8 = vpop.permute.xlu0 %2379  ;;  %v3278_v12 = vpop.permute.xlu2 %3277  ;;  %v2665_v55 = vsel %vm4343_vm2, %v2660_v53, %v2664_v54  ;;  %v4048_v3 = vld [vmem:[%s4332_s19 + $0x38] sm:$0x1]  ;;  %v2788_v49 = vrot.slane %v2786_v39, 4  ;;  %v2794_v6 = vrot.slane %v2792_v62, 5 }
 0x266   : > { %2452 = vst.msk [vmem:[#allocation2 + $0x60] sm:$0xf] %vm2427_vm12, %v2380_v8  ;;  %v3135_v8 = vrot.slane %v3133_v0, 4  ;;  %v3136_v9 = vrot.slane %v4048_v3, 5  ;;  %v2674_v16 = vrot.slane %v2672_v7, 5  ;;  %v3134_v19 = vsel %vm4518_vm6, %v4090_v11, %v3133_v0 }
 0x267   : > { %3014 = vst.msk [vmem:[#allocation2 + $0x64] sm:$0xf] %vm2988_vm14, %v2943_v57  ;;  %v2574_v57 = vrot.slane %v2573_v47, 4  ;;  %v4038_v47 = vld [vmem:[%s4332_s19 + $0xd0] sm:$0xf]  ;;  %v2789_v61 = vor.u32 %v2788_v49, %v2784_v48  ;;  %v2677_v35 = vshrl.u32 %v4013_v28, 16 }
 0x268   : > { %v3137_v18 = vsel %vm4518_vm6, %v3135_v8, %v3136_v9  ;;  %v2675_v22 = vsel %vm4343_vm2, %v2670_v15, %v2674_v16  ;;  %v2878_v59 = vshll.u32 %v4038_v47, 16  ;;  %v4074_v7 = vld [vmem:[%s4332_s19 + $0xa0] sm:$0xf]  ;;  %v4087_v39 = vld [vmem:[%s4332_s19 + $0xd4] sm:$0x1] }
 0x269   : > { %v2579_v2 = vsel %vm4343_vm2, %v2574_v57, %v2578_v58  ;;  %v3991_v57 = vld [vmem:[%s4332_s19 + $0xd0] sm:$0xf]  ;;  %v2875_v58 = vor.u32 %v2874_v45, %v2871_v44  ;;  %v3196_v15 = vrot.slane %v4074_v7, 5  ;;  %v4085_v44 = vld [vmem:[%s4332_s19 + $0xcc] sm:$0xe]  ;;  %v2679_v49 = vrot.slane %v2677_v35, 4 }
 0x26a   : > { %3269 = vrot.lane.b32.xlu1 %v3190_v13, %s4287_s27 }
 0x26b   : > { %2950 = vrot.lane.b32.xlu0 %v2867_v17, %s4286_s26  ;;  %2948 = vrot.lane.b32.xlu2 %v2857_v21, %s4286_s26  ;;  %v4060_v21 = vld [vmem:[%s4332_s19 + $0x68] sm:$0x1]  ;;  %v2876_v0 = vrot.slane %v2875_v58, 4 }
 0x26c   : > { %v2941_v34 = vpop.permute.xlu1 %2940  ;;  %v3164_v27 = vrot.slane %v4060_v21, 5 }
 0x26d   : > { %3013 = vst.msk [vmem:[#allocation2 + $0x60] sm:$0xf] %vm2988_vm14, %v2941_v34  ;;  %v2927_v30 = vpop.permute.xlu0 %2926  ;;  %v2895_v42 = vpop.permute.xlu2 %2894  ;;  %v4094_v34 = vrot.slane %v4058_v23, 9 }
 0x26e   : > { %3006 = vst.msk [vmem:[#allocation2 + $0x44] sm:$0xf] %vm2988_vm14, %v2927_v30 }
 0x26f   : > { %3350 = vst.msk [vmem:[#allocation2 + $0x60] sm:$0xf] %vm3325_vm15, %v3278_v12  ;;  %v4059_v12 = vld [vmem:[%s4332_s19 + $0x64] sm:$0xf] }
 0x270   : > { %2990 = vst.msk [vmem:[#allocation2 + $0x4] sm:$0xf] %vm2988_vm14, %v2895_v42  ;;  %v3161_v20 = vrot.slane %v4059_v12, 5  ;;  %v2773_v42 = vshrl.u32 %v4025_v41, 16 }
 0x272   : > { %3287 = vrot.lane.b32.xlu1 %v3221_v43, %s4287_s27  ;;  %v3163_v26 = vrot.slane %v3161_v20, 4  ;;  %v3162_v40 = vsel %vm4518_vm6, %v4094_v34, %v3161_v20  ;;  %v2776_v43 = vshll.u32 %v4025_v41, 16  ;;  %v2775_v53 = vrot.slane %v2773_v42, 4 }
 0x273   : > { %3285 = vrot.lane.b32.xlu0 %v3218_v46, %s4287_s27  ;;  %3271 = vrot.lane.b32.xlu2 %v3193_v50, %s4287_s27 }
 0x274   : > { %v3264_v56 = vpop.permute.xlu1 %3263  ;;  %v3165_v30 = vsel %vm4518_vm6, %v3163_v26, %v3164_v27  ;;  %v2778_v54 = vrot.slane %v2776_v43, 5  ;;  %v4086_v27 = vld [vmem:[%s4332_s19 + $0xd0] sm:$0xf]  ;;  %v4001_v43 = vld [vmem:[%s4332_s19 + $0x3c] sm:$0xf] }
 0x275   : > { %3343 = vst.msk [vmem:[#allocation2 + $0x44] sm:$0xf] %vm3325_vm15, %v3264_v56  ;;  %v3262_v60 = vpop.permute.xlu0 %3261  ;;  %v3230_v63 = vpop.permute.xlu2 %3229  ;;  %v3224_v37 = vrot.slane %v4086_v27, 5  ;;  %v2581_v45 = vshrl.u32 %v4001_v43, 16 }
 0x276   : > { %3342 = vst.msk [vmem:[#allocation2 + $0x40] sm:$0xf] %vm3325_vm15, %v3262_v60  ;;  %v3990_v60 = vld [vmem:[%s4332_s19 + $0xcc] sm:$0xf] }
 0x27a   : > { %2916 = vrot.lane.b32.xlu1 %v2665_v55, %s4286_s26  ;;  %v2779_v55 = vor.u32 %v2778_v54, %v2775_v53  ;;  %v4014_v53 = vld [vmem:[%s4332_s19 + $0x70] sm:$0xf]  ;;  %v4003_v54 = vld [vmem:[%s4332_s19 + $0x44] sm:$0x1] }
 0x27b   : > { %2902 = vrot.lane.b32.xlu0 %v2579_v2, %s4286_s26  ;;  %2900 = vrot.lane.b32.xlu2 %v2569_v5, %s4286_s26  ;;  %v2880_v2 = vrot.slane %v2878_v59, 5  ;;  %v2790_v5 = vrot.slane %v2789_v61, 4  ;;  %v4103_v59 = vrot.slane %v4085_v44, 9 }
 0x27c   : > { %v2893_v10 = vpop.permute.xlu1 %2892 }
 0x27d   : > { %2989 = vst.msk [vmem:[#allocation2] sm:$0xf] %vm2988_vm14, %v2893_v10  ;;  %v3280_v13 = vpop.permute.xlu0 %3279  ;;  %v4203_v14 = vld [vmem:[#allocation2 + $0x40] sm:$0xff]  ;;  %v3248_v17 = vpop.permute.xlu2 %3247  ;;  %v2780_v10 = vrot.slane %v2779_v55, 4  ;;  %v2795_v16 = vsel %vm4343_vm2, %v2790_v5, %v2794_v6  ;;  %v2686_v55 = vshll.u32 %v4014_v53, 16  ;;  %v3225_v5 = vsel %vm4518_vm6, %v4103_v59, %v3224_v37 }
 0x27e   : > { %3351 = vst.msk [vmem:[#allocation2 + $0x64] sm:$0xf] %vm3325_vm15, %v3280_v13  ;;  %4184 = vmatmul.msk.bf16.vlgmr.msra.gmra.mxu2 %vm3494_vm0, %v4203_v14  ;;  %v4039_v13 = vld [vmem:[%s4332_s19 + $0xd4] sm:$0x1]  ;;  %v2881_v14 = vsel %vm4343_vm2, %v2876_v0, %v2880_v2 }
 0x27f   : > { %3326 = vst.msk [vmem:[#allocation2] sm:$0xf] %vm3325_vm15, %v3230_v63  ;;  %v2882_v63 = vshrl.u32 %v4038_v47, 16  ;;  %v2888_v21 = vshll.u32 %v4039_v13, 16  ;;  %v3226_v47 = vrot.slane %v3224_v37, 4 }
 0x281   : > { %v2884_v11 = vrot.slane %v2882_v63, 4  ;;  %v2890_v34 = vrot.slane %v2888_v21, 5  ;;  %v3975_v63 = vld [vmem:[%s4332_s19 + $0x70] sm:$0xf]  ;;  %v4051_v21 = vld [vmem:[%s4332_s19 + $0x44] sm:$0x1] }
 0x282   : > { %3239 = vrot.lane.b32.xlu1 %v3137_v18, %s4287_s27  ;;  %v4073_v18 = vld [vmem:[%s4332_s19 + $0x9c] sm:$0xe] }
 0x283   : > { %3237 = vrot.lane.b32.xlu0 %v3134_v19, %s4287_s27  ;;  %2918 = vrot.lane.b32.xlu2 %v2675_v22, %s4286_s26  ;;  %v2785_v19 = vsel %vm4343_vm2, %v2780_v10, %v2784_v48  ;;  %v2885_v20 = vor.u32 %v2884_v11, %v2880_v2  ;;  %v3198_v22 = vrot.slane %v3196_v15, 4  ;;  %v4099_v26 = vrot.slane %v4073_v18, 9 }
 0x284   : > { %v2911_v24 = vpop.permute.xlu1 %2910  ;;  %v3227_v48 = vrot.slane %v4087_v39, 5 }
 0x285   : > { %2998 = vst.msk [vmem:[#allocation2 + $0x24] sm:$0xf] %vm2988_vm14, %v2911_v24  ;;  %v2909_v29 = vpop.permute.xlu0 %2908  ;;  %v4207_v31 = vld [vmem:[#allocation2 + $0x60] sm:$0xff]  ;;  %v2384_v36 = vpop.permute.xlu2 %2383  ;;  %v2886_v32 = vrot.slane %v2885_v20, 4  ;;  %v3197_v38 = vsel %vm4518_vm6, %v4099_v26, %v3196_v15 }
 0x286   : > { %2997 = vst.msk [vmem:[#allocation2 + $0x20] sm:$0xf] %vm2988_vm14, %v2909_v29  ;;  %4188 = vmatmul.msk.bf16.vlgmr.msra.gmra.mxu3 %vm3494_vm0, %v4207_v31  ;;  %v4002_v31 = vld [vmem:[%s4332_s19 + $0x40] sm:$0xf]  ;;  %v3228_v0 = vsel %vm4518_vm6, %v3226_v47, %v3227_v48 }
 0x287   : > { %3335 = vst.msk [vmem:[#allocation2 + $0x24] sm:$0xf] %vm3325_vm15, %v3248_v17  ;;  %v4075_v17 = vld [vmem:[%s4332_s19 + $0xa4] sm:$0x1]  ;;  %v2594_v41 = vshrl.u32 %v4002_v31, 16  ;;  %v2891_v42 = vsel %vm4343_vm2, %v2886_v32, %v2890_v34 }
 0x288   : > { %2454 = vst.msk [vmem:[#allocation2 + $0x68] sm:$0xf] %vm2427_vm12, %v2384_v36  ;;  %v3199_v23 = vrot.slane %v4075_v17, 5  ;;  %v4015_v17 = vld [vmem:[%s4332_s19 + $0x74] sm:$0x1] }
 0x289   : > { %v2696_v26 = vshll.u32 %v4015_v17, 16  ;;  %v4062_v34 = vld [vmem:[%s4332_s19 + $0x70] sm:$0xf] }
 0x28a   : > { %2375 = vrot.lane.b32.xlu1 %v3982_v33, %s4285_s25  ;;  %v3200_v33 = vsel %vm4518_vm6, %v3198_v22, %v3199_v23  ;;  %v4049_v22 = vld [vmem:[%s4332_s19 + $0x3c] sm:$0xe] }
 0x28b   : > { %3255 = vrot.lane.b32.xlu0 %v3165_v30, %s4287_s27  ;;  %3253 = vrot.lane.b32.xlu2 %v3162_v40, %s4287_s27  ;;  %v2680_v30 = vshll.u32 %v4013_v28, 16  ;;  %v2590_v40 = vshll.u32 %v4002_v31, 16  ;;  %v3143_v28 = vrot.slane %v4051_v21, 5  ;;  %v4091_v32 = vrot.slane %v4049_v22, 9 }
 0x28c   : > { %v3246_v46 = vpop.permute.xlu1 %3245  ;;  %v2698_v35 = vrot.slane %v2696_v26, 5 }
 0x28d   : > { %3334 = vst.msk [vmem:[#allocation2 + $0x20] sm:$0xf] %vm3325_vm15, %v3246_v46  ;;  %v3232_v50 = vpop.permute.xlu0 %3231  ;;  %v2931_v56 = vpop.permute.xlu2 %2930  ;;  %v2584_v46 = vshll.u32 %v4001_v43, 16  ;;  %v4061_v43 = vld [vmem:[%s4332_s19 + $0x6c] sm:$0xe] }
 0x28e   : > { %3327 = vst.msk [vmem:[#allocation2 + $0x4] sm:$0xf] %vm3325_vm15, %v3232_v50  ;;  %v2682_v50 = vrot.slane %v2680_v30, 5  ;;  %v4095_v48 = vrot.slane %v4061_v43, 9 }
 0x28f   : > { %v2586_v61 = vrot.slane %v2584_v46, 5 }
 0x292   : > { %2393 = vrot.lane.b32.xlu1 %v3991_v57, %s4285_s25  ;;  %v2596_v57 = vrot.slane %v2594_v41, 4  ;;  %v4063_v41 = vld [vmem:[%s4332_s19 + $0x74] sm:$0x1] }
 0x293   : > { %2391 = vrot.lane.b32.xlu0 %v3990_v60, %s4285_s25  ;;  %2377 = vrot.lane.b32.xlu2 %v3983_v52, %s4285_s25  ;;  %v2583_v60 = vrot.slane %v2581_v45, 4  ;;  %v2683_v52 = vor.u32 %v2682_v50, %v2679_v49  ;;  %v3171_v46 = vrot.slane %v4063_v41, 5 }
 0x294   : > { %v2370_v3 = vpop.permute.xlu1 %2369  ;;  %v4199_v4 = vld [vmem:[#allocation2 + $0x20] sm:$0xff] }
 0x295   : > { %2447 = vst.msk [vmem:[#allocation2 + $0x4c] sm:$0xf] %vm2427_vm12, %v2370_v3  ;;  %v2368_v8 = vpop.permute.xlu0 %2367  ;;  %v4195_v9 = vld [vmem:[#allocation2] sm:$0xff]  ;;  %4180 = vmatmul.msk.bf16.vlgmr.msra.gmra.mxu1 %vm3494_vm0, %v4199_v4  ;;  %v3266_v12 = vpop.permute.xlu2 %3265  ;;  %v2600_v3 = vshll.u32 %v4003_v54, 16  ;;  %v2690_v4 = vshrl.u32 %v4014_v53, 16  ;;  %v2587_v6 = vor.u32 %v2586_v61, %v2583_v60  ;;  %v2684_v7 = vrot.slane %v2683_v52, 4 }
 0x296   : > { %2446 = vst.msk [vmem:[#allocation2 + $0x48] sm:$0xf] %vm2427_vm12, %v2368_v8  ;;  %4176 = vmatmul.msk.bf16.vlgmr.msra.gmra.mxu0 %vm3494_vm0, %v4195_v9  ;;  %v2688_v8 = vrot.slane %v2686_v55, 5 }
 0x297   : > { %3008 = vst.msk [vmem:[#allocation2 + $0x4c] sm:$0xf] %vm2988_vm14, %v2931_v56  ;;  %v2592_v56 = vrot.slane %v2590_v40, 5  ;;  %v2602_v11 = vrot.slane %v2600_v3, 5  ;;  %v2692_v15 = vrot.slane %v2690_v4, 4  ;;  %v3168_v40 = vrot.slane %v4062_v34, 5 }
 0x298   : > { %v2689_v18 = vsel %vm4343_vm2, %v2684_v7, %v2688_v8 }
 0x299   : > { %v2597_v2 = vor.u32 %v2596_v57, %v2592_v56  ;;  %v3170_v45 = vrot.slane %v3168_v40, 4  ;;  %v3169_v50 = vsel %vm4518_vm6, %v4095_v48, %v3168_v40 }
 0x29a   : > { %2952 = vrot.lane.b32.xlu1 %v2881_v14, %s4286_s26  ;;  %v2588_v14 = vrot.slane %v2587_v6, 4 }
 0x29b   : > { %2938 = vrot.lane.b32.xlu0 %v2795_v16, %s4286_s26  ;;  %2936 = vrot.lane.b32.xlu2 %v2785_v19, %s4286_s26  ;;  %v2598_v10 = vrot.slane %v2597_v2, 4  ;;  %v3172_v25 = vsel %vm4518_vm6, %v3170_v45, %v3171_v46 }
 0x29c   : > { %v2929_v24 = vpop.permute.xlu1 %2928  ;;  %v2593_v23 = vsel %vm4343_vm2, %v2588_v14, %v2592_v56 }
 0x29d   : > { %3007 = vst.msk [vmem:[#allocation2 + $0x48] sm:$0xf] %vm2988_vm14, %v2929_v24  ;;  %v2386_v29 = vpop.permute.xlu0 %2385  ;;  %v3284_v36 = vpop.permute.xlu2 %3283  ;;  %v2603_v20 = vsel %vm4343_vm2, %v2598_v10, %v2602_v11  ;;  %v2693_v24 = vor.u32 %v2692_v15, %v2688_v8 }
 0x29e   : > { %2455 = vst.msk [vmem:[#allocation2 + $0x6c] sm:$0xf] %vm2427_vm12, %v2386_v29 }
 0x29f   : > { %3344 = vst.msk [vmem:[#allocation2 + $0x48] sm:$0xf] %vm3325_vm15, %v3266_v12  ;;  %v4050_v12 = vld [vmem:[%s4332_s19 + $0x40] sm:$0xf]  ;;  %v2694_v37 = vrot.slane %v2693_v24, 4 }
 0x2a0   : > { %v3140_v19 = vrot.slane %v4050_v12, 5 }
 0x2a2   : > { %3275 = vrot.lane.b32.xlu1 %v3200_v33, %s4287_s27  ;;  %v3142_v27 = vrot.slane %v3140_v19, 4  ;;  %v3141_v39 = vsel %vm4518_vm6, %v4091_v32, %v3140_v19 }
 0x2a3   : > { %3273 = vrot.lane.b32.xlu0 %v3197_v38, %s4287_s27  ;;  %2954 = vrot.lane.b32.xlu2 %v2891_v42, %s4286_s26  ;;  %v2699_v42 = vsel %vm4343_vm2, %v2694_v37, %v2698_v35 }
 0x2a4   : > { %v2947_v51 = vpop.permute.xlu1 %2946  ;;  %v3144_v38 = vsel %vm4518_vm6, %v3142_v27, %v3143_v28 }
 0x2a5   : > { %3016 = vst.msk [vmem:[#allocation2 + $0x6c] sm:$0xf] %vm2988_vm14, %v2947_v51  ;;  %v2945_v58 = vpop.permute.xlu0 %2944  ;;  %v2913_v62 = vpop.permute.xlu2 %2912 }
 0x2a6   : > { %3015 = vst.msk [vmem:[#allocation2 + $0x68] sm:$0xf] %vm2988_vm14, %v2945_v58 }
 0x2a7   : > { %3353 = vst.msk [vmem:[#allocation2 + $0x6c] sm:$0xf] %vm3325_vm15, %v3284_v36 }
 0x2a8   : > { %2999 = vst.msk [vmem:[#allocation2 + $0x28] sm:$0xf] %vm2988_vm14, %v2913_v62 }
 0x2aa   : > { %2361 = vrot.lane.b32.xlu1 %v3975_v63, %s4285_s25 }
 0x2ab   : > { %3291 = vrot.lane.b32.xlu0 %v3228_v0, %s4287_s27  ;;  %3289 = vrot.lane.b32.xlu2 %v3225_v5, %s4287_s27 }
 0x2ac   : > { %v3282_v9 = vpop.permute.xlu1 %3281 }
 0x2ad   : > { %3352 = vst.msk [vmem:[#allocation2 + $0x68] sm:$0xf] %vm3325_vm15, %v3282_v9  ;;  %v3268_v13 = vpop.permute.xlu0 %3267  ;;  %v3236_v16 = vpop.permute.xlu2 %3235 }
 0x2ae   : > { %3345 = vst.msk [vmem:[#allocation2 + $0x4c] sm:$0xf] %vm3325_vm15, %v3268_v13 }
 0x2b2   : > { %2920 = vrot.lane.b32.xlu1 %v2689_v18, %s4286_s26 }
 0x2b3   : > { %2906 = vrot.lane.b32.xlu0 %v2603_v20, %s4286_s26  ;;  %2904 = vrot.lane.b32.xlu2 %v2593_v23, %s4286_s26 }
 0x2b4   : > { %v2899_v29 = vpop.permute.xlu1 %2898  ;;  %v4208_v31 = vld [vmem:[#allocation2 + $0x68] sm:$0xff] }
 0x2b5   : > { %2992 = vst.msk [vmem:[#allocation2 + $0xc] sm:$0xf] %vm2988_vm14, %v2899_v29  ;;  %v2897_v36 = vpop.permute.xlu0 %2896  ;;  %v4204_v33 = vld [vmem:[#allocation2 + $0x48] sm:$0xff]  ;;  %4189 = vmatmul.msk.bf16.gmra.mxu3 %vm3494_vm0, %v4208_v31  ;;  %v2372_v30 = vpop.permute.xlu2 %2371 }
 0x2b6   : > { %2991 = vst.msk [vmem:[#allocation2 + $0x8] sm:$0xf] %vm2988_vm14, %v2897_v36  ;;  %4185 = vmatmul.msk.bf16.gmra.mxu2 %vm3494_vm0, %v4204_v33 }
 0x2b7   : > { %3329 = vst.msk [vmem:[#allocation2 + $0xc] sm:$0xf] %vm3325_vm15, %v3236_v16  ;;  %v5732_v16 = vld [vmem:[%s5871_s2] ss:$0 sm:$0xff] }
 0x2b8   : > { %2448 = vst.msk [vmem:[#allocation2 + $0x50] sm:$0xf] %vm2427_vm12, %v2372_v30 }
 0x2ba   : > { %3243 = vrot.lane.b32.xlu1 %v3144_v38, %s4287_s27 }
 0x2bb   : > { %3241 = vrot.lane.b32.xlu0 %v3141_v39, %s4287_s27  ;;  %2922 = vrot.lane.b32.xlu2 %v2699_v42, %s4286_s26 }
 0x2bc   : > { %v3234_v44 = vpop.permute.xlu1 %3233 }
 0x2bd   : > { %3328 = vst.msk [vmem:[#allocation2 + $0x8] sm:$0xf] %vm3325_vm15, %v3234_v44  ;;  %v2915_v47 = vpop.permute.xlu0 %2914  ;;  %v2390_v49 = vpop.permute.xlu2 %2389 }
 0x2be   : > { %3000 = vst.msk [vmem:[#allocation2 + $0x2c] sm:$0xf] %vm2988_vm14, %v2915_v47 }
 0x2bf   : > { %2457 = vst.msk [vmem:[#allocation2 + $0x74] sm:$0xf] %vm2427_vm12, %v2390_v49 }
 0x2c3   : > { %3259 = vrot.lane.b32.xlu0 %v3172_v25, %s4287_s27  ;;  %3257 = vrot.lane.b32.xlu2 %v3169_v50, %s4287_s27 }
 0x2c4   : > { %v3252_v51 = vpop.permute.xlu1 %3251  ;;  %v4196_v53 = vld [vmem:[#allocation2 + $0x8] sm:$0xff] }
 0x2c5   : > { %3337 = vst.msk [vmem:[#allocation2 + $0x2c] sm:$0xf] %vm3325_vm15, %v3252_v51  ;;  %v3250_v54 = vpop.permute.xlu0 %3249  ;;  %4177 = vmatmul.msk.bf16.gmra.mxu0 %vm3494_vm0, %v4196_v53  ;;  %v2949_v56 = vpop.permute.xlu2 %2948 }
 0x2c6   : > { %3336 = vst.msk [vmem:[#allocation2 + $0x28] sm:$0xf] %vm3325_vm15, %v3250_v54 }
 0x2cc   : > { %v2388_v57 = vpop.permute.xlu1 %2387 }
 0x2cd   : > { %2456 = vst.msk [vmem:[#allocation2 + $0x70] sm:$0xf] %vm2427_vm12, %v2388_v57  ;;  %v2374_v58 = vpop.permute.xlu0 %2373  ;;  %v4200_v1 = vld [vmem:[#allocation2 + $0x28] sm:$0xff]  ;;  %v3272_v59 = vpop.permute.xlu2 %3271 }
 0x2ce   : > { %2449 = vst.msk [vmem:[#allocation2 + $0x54] sm:$0xf] %vm2427_vm12, %v2374_v58  ;;  %4181 = vmatmul.msk.bf16.gmra.mxu1 %vm3494_vm0, %v4200_v1 }
 0x2cf   : > { %3017 = vst.msk [vmem:[#allocation2 + $0x70] sm:$0xf] %vm2988_vm14, %v2949_v56 }
 0x2d4   : > { %v2935_v60 = vpop.permute.xlu1 %2934 }
 0x2d5   : > { %3010 = vst.msk [vmem:[#allocation2 + $0x54] sm:$0xf] %vm2988_vm14, %v2935_v60  ;;  %v2933_v61 = vpop.permute.xlu0 %2932  ;;  %v2901_v62 = vpop.permute.xlu2 %2900 }
 0x2d6   : > { %3009 = vst.msk [vmem:[#allocation2 + $0x50] sm:$0xf] %vm2988_vm14, %v2933_v61 }
 0x2d7   : > { %3347 = vst.msk [vmem:[#allocation2 + $0x54] sm:$0xf] %vm3325_vm15, %v3272_v59 }
 0x2d8   : > { %2993 = vst.msk [vmem:[#allocation2 + $0x10] sm:$0xf] %vm2988_vm14, %v2901_v62 }
 0x2dc   : > { %v3270_v63 = vpop.permute.xlu1 %3269 }
 0x2dd   : > { %3346 = vst.msk [vmem:[#allocation2 + $0x50] sm:$0xf] %vm3325_vm15, %v3270_v63  ;;  %v2951_v52 = vpop.permute.xlu0 %2950  ;;  %v2919_v55 = vpop.permute.xlu2 %2918 }
 0x2de   : > { %3018 = vst.msk [vmem:[#allocation2 + $0x74] sm:$0xf] %vm2988_vm14, %v2951_v52 }
 0x2df   : > { %3002 = vst.msk [vmem:[#allocation2 + $0x34] sm:$0xf] %vm2988_vm14, %v2919_v55 }
 0x2e4   : > { %v3288_v0 = vpop.permute.xlu1 %3287  ;;  %v4205_v2 = vld [vmem:[#allocation2 + $0x50] sm:$0xff] }
 0x2e5   : > { %3355 = vst.msk [vmem:[#allocation2 + $0x74] sm:$0xf] %vm3325_vm15, %v3288_v0  ;;  %v3286_v3 = vpop.permute.xlu0 %3285  ;;  %4186 = vmatmul.msk.bf16.gmra.mxu2 %vm3494_vm0, %v4205_v2  ;;  %v3254_v4 = vpop.permute.xlu2 %3253 }
 0x2e6   : > { %3354 = vst.msk [vmem:[#allocation2 + $0x70] sm:$0xf] %vm3325_vm15, %v3286_v3 }
 0x2ec   : > { %v2917_v5 = vpop.permute.xlu1 %2916 }
 0x2ed   : > { %3001 = vst.msk [vmem:[#allocation2 + $0x30] sm:$0xf] %vm2988_vm14, %v2917_v5  ;;  %v2903_v6 = vpop.permute.xlu0 %2902  ;;  %v4209_v7 = vld [vmem:[#allocation2 + $0x70] sm:$0xff]  ;;  %v2378_v8 = vpop.permute.xlu2 %2377 }
 0x2ee   : > { %2994 = vst.msk [vmem:[#allocation2 + $0x14] sm:$0xf] %vm2988_vm14, %v2903_v6  ;;  %4190 = vmatmul.msk.bf16.gmra.mxu3 %vm3494_vm0, %v4209_v7 }
 0x2ef   : > { %3338 = vst.msk [vmem:[#allocation2 + $0x30] sm:$0xf] %vm3325_vm15, %v3254_v4 }
 0x2f0   : > { %2451 = vst.msk [vmem:[#allocation2 + $0x5c] sm:$0xf] %vm2427_vm12, %v2378_v8 }
 0x2f4   : > { %v3240_v9 = vpop.permute.xlu1 %3239 }
 0x2f5   : > { %3331 = vst.msk [vmem:[#allocation2 + $0x14] sm:$0xf] %vm3325_vm15, %v3240_v9  ;;  %v3238_v10 = vpop.permute.xlu0 %3237  ;;  %v2937_v11 = vpop.permute.xlu2 %2936 }
 0x2f6   : > { %3330 = vst.msk [vmem:[#allocation2 + $0x10] sm:$0xf] %vm3325_vm15, %v3238_v10 }
 0x2fc   : > { %v2376_v12 = vpop.permute.xlu1 %2375 }
 0x2fd   : > { %2450 = vst.msk [vmem:[#allocation2 + $0x58] sm:$0xf] %vm2427_vm12, %v2376_v12  ;;  %v3256_v13 = vpop.permute.xlu0 %3255  ;;  %v4197_v14 = vld [vmem:[#allocation2 + $0x10] sm:$0xff]  ;;  %v2955_v15 = vpop.permute.xlu2 %2954 }
 0x2fe   : > { %3339 = vst.msk [vmem:[#allocation2 + $0x34] sm:$0xf] %vm3325_vm15, %v3256_v13  ;;  %4178 = vmatmul.msk.bf16.gmra.mxu0 %vm3494_vm0, %v4197_v14 }
 0x2ff   : > { %3011 = vst.msk [vmem:[#allocation2 + $0x58] sm:$0xf] %vm2988_vm14, %v2937_v11 }
 0x301   : > { %v3596_v17 = vpop.f32.mrf.mxu2 }
 0x302   : > { %v3597_v18 = vadd.f32 %v5732_v16, %v3596_v17 }
 0x304   : > { %v2394_v19 = vpop.permute.xlu1 %2393  ;;  %v3652_v20 = vmax.f32 %v3597_v18, 0.0 }
 0x305   : > { %2459 = vst.msk [vmem:[#allocation2 + $0x7c] sm:$0xf] %vm2427_vm12, %v2394_v19  ;;  %v2392_v21 = vpop.permute.xlu0 %2391  ;;  %v4201_v22 = vld [vmem:[#allocation2 + $0x30] sm:$0xff]  ;;  %v3290_v23 = vpop.permute.xlu2 %3289 }
 0x306   : > { %2458 = vst.msk [vmem:[#allocation2 + $0x78] sm:$0xf] %vm2427_vm12, %v2392_v21  ;;  %4182 = vmatmul.msk.bf16.gmra.mxu1 %vm3494_vm0, %v4201_v22 }
 0x307   : > { %3685 = vst.msk [vmem:[%s5740_s16 + $0x80] sm:$0xff] %vm3668_vm1, %v3652_v20 }
 0x308   : > { %3020 = vst.msk [vmem:[#allocation2 + $0x7c] sm:$0xf] %vm2988_vm14, %v2955_v15 }
 0x309   : > { %v3598_v24 = vpop.f32.mrf.mxu2  ;;  %v3616_v26 = vpop.f32.mrf.mxu3 }
 0x30a   : > { %v3599_v27 = vadd.f32 %v5732_v16, %v3598_v24  ;;  %v3617_v28 = vadd.f32 %v5732_v16, %v3616_v26 }
 0x30c   : > { %v2953_v29 = vpop.permute.xlu1 %2952  ;;  %v3653_v31 = vmax.f32 %v3599_v27, 0.0  ;;  %v3660_v32 = vmax.f32 %v3617_v28, 0.0 }
 0x30d   : > { %3019 = vst.msk [vmem:[#allocation2 + $0x78] sm:$0xf] %vm2988_vm14, %v2953_v29  ;;  %v2939_v34 = vpop.permute.xlu0 %2938  ;;  %v2905_v36 = vpop.permute.xlu2 %2904 }
 0x30e   : > { %3012 = vst.msk [vmem:[#allocation2 + $0x5c] sm:$0xf] %vm2988_vm14, %v2939_v34 }
 0x30f   : > { %3686 = vst.msk [vmem:[%s5740_s16 + $0x88] sm:$0xff] %vm3668_vm1, %v3653_v31 }
 0x310   : > { %3693 = vst.msk [vmem:[%s5740_s16 + $0xc0] sm:$0xff] %vm3668_vm1, %v3660_v32 }
 0x311   : > { %3356 = vst.msk [vmem:[#allocation2 + $0x78] sm:$0xf] %vm3325_vm15, %v3290_v23  ;;  %v3618_v33 = vpop.f32.mrf.mxu3 }
 0x312   : > { %2995 = vst.msk [vmem:[#allocation2 + $0x18] sm:$0xf] %vm2988_vm14, %v2905_v36  ;;  %v3619_v37 = vadd.f32 %v5732_v16, %v3618_v33  ;;  %v3576_v35 = vpop.f32.mrf.mxu1 }
 0x313   : > { %v3556_v38 = vpop.f32.mrf.mxu0  ;;  %v3577_v39 = vadd.f32 %v5732_v16, %v3576_v35 }
 0x314   : > { %v3276_v30 = vpop.permute.xlu1 %3275  ;;  %v3661_v40 = vmax.f32 %v3619_v37, 0.0  ;;  %v3557_v42 = vadd.f32 %v5732_v16, %v3556_v38 }
 0x315   : > { %3349 = vst.msk [vmem:[#allocation2 + $0x5c] sm:$0xf] %vm3325_vm15, %v3276_v30  ;;  %v3274_v41 = vpop.permute.xlu0 %3273  ;;  %v3644_v43 = vmax.f32 %v3577_v39, 0.0  ;;  %v2923_v45 = vpop.permute.xlu2 %2922 }
 0x316   : > { %3348 = vst.msk [vmem:[#allocation2 + $0x58] sm:$0xf] %vm3325_vm15, %v3274_v41  ;;  %v3636_v44 = vmax.f32 %v3557_v42, 0.0 }
 0x317   : > { %3694 = vst.msk [vmem:[%s5740_s16 + $0xc8] sm:$0xff] %vm3668_vm1, %v3661_v40 }
 0x318   : > { %3677 = vst.msk [vmem:[%s5740_s16 + $0x40] sm:$0xff] %vm3668_vm1, %v3644_v43 }
 0x319   : > { %3669 = vst.msk [vmem:[%s5740_s16] sm:$0xff] %vm3668_vm1, %v3636_v44 }
 0x31a   : > { %v3578_v46 = vpop.f32.mrf.mxu1 }
 0x31b   : > { %v3558_v48 = vpop.f32.mrf.mxu0  ;;  %v3579_v49 = vadd.f32 %v5732_v16, %v3578_v46 }
 0x31c   : > { %v2362_v47 = vpop.permute.xlu1 %2361  ;;  %v3559_v50 = vadd.f32 %v5732_v16, %v3558_v48 }
 0x31d   : > { %2443 = vst.msk [vmem:[#allocation2 + $0x3c] sm:$0xf] %vm2427_vm12, %v2362_v47  ;;  %v3292_v25 = vpop.permute.xlu0 %3291  ;;  %v4206_v51 = vld [vmem:[#allocation2 + $0x58] sm:$0xff]  ;;  %v3645_v53 = vmax.f32 %v3579_v49, 0.0  ;;  %v3258_v57 = vpop.permute.xlu2 %3257 }
 0x31e   : > { %3357 = vst.msk [vmem:[#allocation2 + $0x7c] sm:$0xf] %vm3325_vm15, %v3292_v25  ;;  %v3637_v54 = vmax.f32 %v3559_v50, 0.0  ;;  %4187 = vmatmul.msk.bf16.gmra.mxu2 %vm3494_vm0, %v4206_v51 }
 0x31f   : > { %3004 = vst.msk [vmem:[#allocation2 + $0x3c] sm:$0xf] %vm2988_vm14, %v2923_v45 }
 0x320   : > { %3678 = vst.msk [vmem:[%s5740_s16 + $0x48] sm:$0xff] %vm3668_vm1, %v3645_v53 }
 0x321   : > { %3670 = vst.msk [vmem:[%s5740_s16 + $0x8] sm:$0xff] %vm3668_vm1, %v3637_v54 }
 0x324   : > { %v2921_v56 = vpop.permute.xlu1 %2920 }
 0x325   : > { %3003 = vst.msk [vmem:[#allocation2 + $0x38] sm:$0xf] %vm2988_vm14, %v2921_v56  ;;  %v2907_v58 = vpop.permute.xlu0 %2906  ;;  %v4210_v1 = vld [vmem:[#allocation2 + $0x78] sm:$0xff] }
 0x326   : > { %2996 = vst.msk [vmem:[#allocation2 + $0x1c] sm:$0xf] %vm2988_vm14, %v2907_v58  ;;  %4191 = vmatmul.msk.bf16.gmra.mxu3 %vm3494_vm0, %v4210_v1 }
 0x327   : > { %3340 = vst.msk [vmem:[#allocation2 + $0x38] sm:$0xf] %vm3325_vm15, %v3258_v57 }
 0x32c   : > { %v3244_v59 = vpop.permute.xlu1 %3243 }
 0x32d   : > { %3333 = vst.msk [vmem:[#allocation2 + $0x1c] sm:$0xf] %vm3325_vm15, %v3244_v59  ;;  %v3242_v60 = vpop.permute.xlu0 %3241 }
 0x32e   : > { %3332 = vst.msk [vmem:[#allocation2 + $0x18] sm:$0xf] %vm3325_vm15, %v3242_v60 }
 0x335   : > { %v3260_v61 = vpop.permute.xlu0 %3259  ;;  %v4198_v62 = vld [vmem:[#allocation2 + $0x18] sm:$0xff] }
 0x336   : > { %3341 = vst.msk [vmem:[#allocation2 + $0x3c] sm:$0xf] %vm3325_vm15, %v3260_v61  ;;  %4179 = vmatmul.msk.bf16.gmra.mxu0 %vm3494_vm0, %v4198_v62 }
 0x338   : > { %v3621_v63 = vpop.f32.mrf.mxu3 }
 0x339   : > { %v3601_v52 = vpop.f32.mrf.mxu2  ;;  %v3622_v55 = vadd.f32 %v5732_v16, %v3621_v63 }
 0x33a   : > { %v3602_v0 = vadd.f32 %v5732_v16, %v3601_v52 }
 0x33b   : > { %v3662_v2 = vmax.f32 %v3622_v55, 0.0 }
 0x33c   : > { %v3654_v3 = vmax.f32 %v3602_v0, 0.0 }
 0x33d   : > { %v4202_v4 = vld [vmem:[#allocation2 + $0x38] sm:$0xff]  ;;  %3695 = vst.msk [vmem:[%s5740_s16 + $0xd0] sm:$0xff] %vm3668_vm1, %v3662_v2 }
 0x33e   : > { %3687 = vst.msk [vmem:[%s5740_s16 + $0x90] sm:$0xff] %vm3668_vm1, %v3654_v3  ;;  %4183 = vmatmul.msk.bf16.gmra.mxu1 %vm3494_vm0, %v4202_v4 }
 0x340   : > { %v3623_v5 = vpop.f32.mrf.mxu3 }
 0x341   : > { %v3603_v6 = vpop.f32.mrf.mxu2  ;;  %v3624_v7 = vadd.f32 %v5732_v16, %v3623_v5 }
 0x342   : > { %v3604_v8 = vadd.f32 %v5732_v16, %v3603_v6  ;;  %v3561_v9 = vpop.f32.mrf.mxu0 }
 0x343   : > { %v3663_v10 = vmax.f32 %v3624_v7, 0.0  ;;  %v3562_v11 = vadd.f32 %v5732_v16, %v3561_v9 }
 0x344   : > { %v3655_v12 = vmax.f32 %v3604_v8, 0.0 }
 0x345   : > { %3696 = vst.msk [vmem:[%s5740_s16 + $0xd8] sm:$0xff] %vm3668_vm1, %v3663_v10  ;;  %v3638_v13 = vmax.f32 %v3562_v11, 0.0 }
 0x346   : > { %3688 = vst.msk [vmem:[%s5740_s16 + $0x98] sm:$0xff] %vm3668_vm1, %v3655_v12 }
 0x347   : > { %3671 = vst.msk [vmem:[%s5740_s16 + $0x10] sm:$0xff] %vm3668_vm1, %v3638_v13 }
 0x34a   : > { %v3563_v14 = vpop.f32.mrf.mxu0 }
 0x34b   : > { %v3564_v15 = vadd.f32 %v5732_v16, %v3563_v14  ;;  %v3581_v17 = vpop.f32.mrf.mxu1 }
 0x34c   : > { %v3582_v18 = vadd.f32 %v5732_v16, %v3581_v17 }
 0x34d   : > { %v3639_v19 = vmax.f32 %v3564_v15, 0.0 }
 0x34e   : > { %v3646_v20 = vmax.f32 %v3582_v18, 0.0 }
 0x34f   : > { %3672 = vst.msk [vmem:[%s5740_s16 + $0x18] sm:$0xff] %vm3668_vm1, %v3639_v19 }
 0x350   : > { %3679 = vst.msk [vmem:[%s5740_s16 + $0x50] sm:$0xff] %vm3668_vm1, %v3646_v20 }
 0x353   : > { %v3583_v21 = vpop.f32.mrf.mxu1 }
 0x354   : > { %v3584_v22 = vadd.f32 %v5732_v16, %v3583_v21 }
 0x356   : > { %v3647_v23 = vmax.f32 %v3584_v22, 0.0 }
 0x358   : > { %3680 = vst.msk [vmem:[%s5740_s16 + $0x58] sm:$0xff] %vm3668_vm1, %v3647_v23 }
 0x368   : > { %v3606_v24 = vpop.f32.mrf.mxu2 }
 0x369   : > { %v3607_v26 = vadd.f32 %v5732_v16, %v3606_v24 }
 0x36b   : > { %v3656_v27 = vmax.f32 %v3607_v26, 0.0 }
 0x36d   : > { %3689 = vst.msk [vmem:[%s5740_s16 + $0xa0] sm:$0xff] %vm3668_vm1, %v3656_v27 }
 0x370   : > { %v3608_v28 = vpop.f32.mrf.mxu2 }
 0x371   : > { %v3609_v29 = vadd.f32 %v5732_v16, %v3608_v28  ;;  %v3626_v31 = vpop.f32.mrf.mxu3 }
 0x372   : > { %v3627_v32 = vadd.f32 %v5732_v16, %v3626_v31 }
 0x373   : > { %v3657_v34 = vmax.f32 %v3609_v29, 0.0 }
 0x374   : > { %v3664_v36 = vmax.f32 %v3627_v32, 0.0 }
 0x375   : > { %3690 = vst.msk [vmem:[%s5740_s16 + $0xa8] sm:$0xff] %vm3668_vm1, %v3657_v34 }
 0x376   : > { %3697 = vst.msk [vmem:[%s5740_s16 + $0xe0] sm:$0xff] %vm3668_vm1, %v3664_v36 }
 0x379   : > { %v3628_v33 = vpop.f32.mrf.mxu3 }
 0x37a   : > { %v3629_v37 = vadd.f32 %v5732_v16, %v3628_v33 }
 0x37b   : > { %v3566_v35 = vpop.f32.mrf.mxu0 }
 0x37c   : > { %v3665_v30 = vmax.f32 %v3629_v37, 0.0  ;;  %v3567_v38 = vadd.f32 %v5732_v16, %v3566_v35 }
 0x37e   : > { %3698 = vst.msk [vmem:[%s5740_s16 + $0xe8] sm:$0xff] %vm3668_vm1, %v3665_v30  ;;  %v3640_v39 = vmax.f32 %v3567_v38, 0.0 }
 0x380   : > { %3673 = vst.msk [vmem:[%s5740_s16 + $0x20] sm:$0xff] %vm3668_vm1, %v3640_v39 }
 0x383   : > { %v3568_v40 = vpop.f32.mrf.mxu0  ;;  %v3586_v41 = vpop.f32.mrf.mxu1 }
 0x384   : > { %v3569_v42 = vadd.f32 %v5732_v16, %v3568_v40  ;;  %v3587_v43 = vadd.f32 %v5732_v16, %v3586_v41 }
 0x386   : > { %v3641_v44 = vmax.f32 %v3569_v42, 0.0  ;;  %v3648_v45 = vmax.f32 %v3587_v43, 0.0 }
 0x388   : > { %3674 = vst.msk [vmem:[%s5740_s16 + $0x28] sm:$0xff] %vm3668_vm1, %v3641_v44 }
 0x389   : > { %3681 = vst.msk [vmem:[%s5740_s16 + $0x60] sm:$0xff] %vm3668_vm1, %v3648_v45 }
 0x38b   : > { %v3588_v46 = vpop.f32.mrf.mxu1 }
 0x38c   : > { %v3589_v47 = vadd.f32 %v5732_v16, %v3588_v46 }
 0x38e   : > { %v3649_v48 = vmax.f32 %v3589_v47, 0.0 }
 0x390   : > { %3682 = vst.msk [vmem:[%s5740_s16 + $0x68] sm:$0xff] %vm3668_vm1, %v3649_v48 }
 0x3a1   : > { %v3611_v49 = vpop.f32.mrf.mxu2 }
 0x3a2   : > { %v3612_v25 = vadd.f32 %v5732_v16, %v3611_v49 }
 0x3a4   : > { %v3658_v50 = vmax.f32 %v3612_v25, 0.0 }
 0x3a6   : > { %3691 = vst.msk [vmem:[%s5740_s16 + $0xb0] sm:$0xff] %vm3668_vm1, %v3658_v50 }
 0x3a9   : > { %v3613_v51 = vpop.f32.mrf.mxu2  ;;  %v3631_v53 = vpop.f32.mrf.mxu3 }
 0x3aa   : > { %v3614_v54 = vadd.f32 %v5732_v16, %v3613_v51  ;;  %v3632_v56 = vadd.f32 %v5732_v16, %v3631_v53 }
 0x3ac   : > { %v3659_v57 = vmax.f32 %v3614_v54, 0.0  ;;  %v3666_v58 = vmax.f32 %v3632_v56, 0.0 }
 0x3ae   : > { %3692 = vst.msk [vmem:[%s5740_s16 + $0xb8] sm:$0xff] %vm3668_vm1, %v3659_v57 }
 0x3af   : > { %3699 = vst.msk [vmem:[%s5740_s16 + $0xf0] sm:$0xff] %vm3668_vm1, %v3666_v58 }
 0x3b1   : > { %v3633_v1 = vpop.f32.mrf.mxu3 }
 0x3b2   : > { %v3634_v59 = vadd.f32 %v5732_v16, %v3633_v1 }
 0x3b3   : > { %v3571_v60 = vpop.f32.mrf.mxu0 }
 0x3b4   : > { %v3667_v61 = vmax.f32 %v3634_v59, 0.0  ;;  %v3572_v62 = vadd.f32 %v5732_v16, %v3571_v60 }
 0x3b6   : > { %3700 = vst.msk [vmem:[%s5740_s16 + $0xf8] sm:$0xff] %vm3668_vm1, %v3667_v61  ;;  %v3642_v63 = vmax.f32 %v3572_v62, 0.0 }
 0x3b8   : > { %3675 = vst.msk [vmem:[%s5740_s16 + $0x30] sm:$0xff] %vm3668_vm1, %v3642_v63 }
 0x3bb   : > { %v3573_v52 = vpop.f32.mrf.mxu0  ;;  %v3591_v55 = vpop.f32.mrf.mxu1 }
 0x3bc   : > { %v3574_v0 = vadd.f32 %v5732_v16, %v3573_v52  ;;  %v3592_v2 = vadd.f32 %v5732_v16, %v3591_v55 }
 0x3be   : > { %v3643_v3 = vmax.f32 %v3574_v0, 0.0  ;;  %v3650_v4 = vmax.f32 %v3592_v2, 0.0 }
 0x3c0   : > { %3676 = vst.msk [vmem:[%s5740_s16 + $0x38] sm:$0xff] %vm3668_vm1, %v3643_v3 }
 0x3c1   : > { %3683 = vst.msk [vmem:[%s5740_s16 + $0x70] sm:$0xff] %vm3668_vm1, %v3650_v4 }
 0x3c3   : > { %v3593_v5 = vpop.f32.mrf.mxu1 }
 0x3c4   : > { %v3594_v6 = vadd.f32 %v5732_v16, %v3593_v5 }
 0x3c6   : > { %v3651_v7 = vmax.f32 %v3594_v6, 0.0 }
 0x3c8   : > { %3684 = vst.msk [vmem:[%s5740_s16 + $0x78] sm:$0xff] %vm3668_vm1, %v3651_v7 }
 0x3c9 PF: > { %s13_s14 = sadd.s32 1, %s4278_s14   ;;  %s5877_s12 = smov %s4274_s13 }
 0x3ca   : > { %p10_p5 = scmp.ge.s32.totalorder %s13_s14, 4   ;;  %s5878_s13 = smov %s5880_s15 }
 0x3cc   :  { %12 = sbr.rel (!%p10_p5) target bundleno = 2 (0x2), region = 65 }

</bundles_post_ra>
